<compile_context>
chip_gen: v7x
topology: tpu7x:2x2x1
jax: 0.10.0
libtpu: 0.0.40
codegen_flags: <defaults>
</compile_context>

<pallas_src>
import functools
from math import floor

import jax
import jax.numpy as jnp
import numpy as np
from jax.experimental import pallas as pl
from jax.experimental.pallas import tpu as pltpu


def conv_output_shape(h_w, kernel_size=1, stride=1, pad=0, dilation=1):
    h = floor((h_w[0] + 2 * pad - dilation * (kernel_size - 1) - 1) / stride + 1)
    w = floor((h_w[1] + 2 * pad - dilation * (kernel_size - 1) - 1) / stride + 1)
    return (h, w)


# ----------------------------------------------------------------------------
# Fused kernel: conv1 + conv2 + dense1 + dense2 for one tile of `tb` samples.
# ----------------------------------------------------------------------------
def _critic_kernel(cols1_ref, vec_ref,
                   w1_ref, b1_ref, w2_ref, b2_ref,
                   wd1a_ref, wd1b_ref, bd1_ref, wd2_ref, bd2_ref,
                   out_ref, y1_sc, *, tb, oh1, ow1, oh2, ow2):
    f32 = jnp.float32

    # ---- conv1: y1[t] = relu(cols1[t] @ W1 + b1), kept resident in VMEM ------
    w1 = w1_ref[...]                      # (8*8*C, 16), rows ordered (kh, kw, c)
    b1 = b1_ref[...]                      # (1, 16)
    for t in range(tb):
        y = jnp.dot(cols1_ref[t], w1, preferred_element_type=f32)   # (oh1*ow1, 16)
        y1_sc[t] = jnp.maximum(y + b1, 0.0)

    # ---- dense1, vec-observation part (replaces torch.cat) -------------------
    hid = jnp.dot(vec_ref[...], wd1b_ref[...], preferred_element_type=f32)  # (tb, enc)

    # Hoist the 16 conv2 weight blocks (one per 4x4 kernel offset) out of the loop.
    w2_blocks = [w2_ref[k * 16:(k + 1) * 16, :] for k in range(16)]          # (16, 32)
    b2 = b2_ref[...]                      # (1, 32)

    # ---- conv2 + dense1 conv part, per conv2 output position -----------------
    # In-kernel patch gather: y1 rows are indexed statically; the channel-major
    # (NCHW) flatten of PyTorch is absorbed into the pre-permuted dense1 weights.
    for i in range(oh2):
        for j in range(ow2):
            acc = None
            for dh in range(4):
                for dw in range(4):
                    r = (2 * i + dh) * ow1 + (2 * j + dw)
                    blk = y1_sc[:, r, :]                              # (tb, 16)
                    d = jnp.dot(blk, w2_blocks[dh * 4 + dw],
                                preferred_element_type=f32)           # (tb, 32)
                    acc = d if acc is None else acc + d
            y2 = jnp.maximum(acc + b2, 0.0)                           # (tb, 32)
            q = i * ow2 + j
            wa_blk = wd1a_ref[q * 32:(q + 1) * 32, :]                 # (32, enc)
            hid = hid + jnp.dot(y2, wa_blk, preferred_element_type=f32)

    hidden = jnp.maximum(hid + bd1_ref[...], 0.0)                     # (tb, enc)

    # ---- dense2 as a VPU reduction epilogue (K=64, N=1) -----------------------
    out = jnp.sum(hidden * wd2_ref[...], axis=-1, keepdims=True) + bd2_ref[...]
    out_ref[...] = out.astype(out_ref.dtype)


# ----------------------------------------------------------------------------
# One-time parameter packing: PyTorch layouts -> kernel-ready (K, N) layouts.
# ----------------------------------------------------------------------------
def pack_critic_params(params, meta):
    oh2, ow2 = meta["conv2_hw"]
    ff = meta["final_flat"]
    enc = params["dense1_w"].shape[0]

    # conv1: (O=16, C, 8, 8) -> rows (kh, kw, c), cols o
    w1 = params["conv1_w"].transpose(2, 3, 1, 0).reshape(-1, 16)
    # conv2: (P=32, O=16, 4, 4) -> rows (dh, dw, o), cols p
    w2 = params["conv2_w"].transpose(2, 3, 1, 0).reshape(-1, 32)
    # dense1 conv part: (enc, 32*oh2*ow2) with f = p*oh2*ow2 + i*ow2 + j (NCHW flatten)
    # -> rows ordered (i, j, p) so the kernel's HWC-ordered conv2 outputs match.
    wd1a = (params["dense1_w"][:, :ff]
            .reshape(enc, 32, oh2, ow2)
            .transpose(2, 3, 1, 0)
            .reshape(ff, enc))
    wd1b = params["dense1_w"][:, ff:].T                       # (vec_dim, enc)

    packed = {
        "w1": w1, "b1": params["conv1_b"].reshape(1, -1),
        "w2": w2, "b2": params["conv2_b"].reshape(1, -1),
        "wd1a": wd1a, "wd1b": wd1b,
        "bd1": params["dense1_b"].reshape(1, -1),
        "wd2": params["dense2_w"].reshape(1, -1),             # (1, enc)
        "bd2": params["dense2_b"].reshape(1, 1),
    }
    return jax.tree_util.tree_map(lambda a: a.astype(jnp.float32), packed)


def _pick_batch_tile(n):
    # Tile must be a multiple of 8 or the full batch (8,128 block rule on (N,*) arrays).
    if n % 8 == 0:
        t = 32
        while n % t:
            t //= 2
        return t
    return n


def _conv1_patches(x, oh1, ow1):
    """(N, H, W, C) -> (N, oh1*ow1, 8*8*C); column order (kh, kw, c)."""
    n, _, _, c = x.shape
    pieces = []
    for kh in range(8):
        for kw in range(8):
            pieces.append(x[:, kh:kh + 4 * oh1:4, kw:kw + 4 * ow1:4, :])
    p = jnp.stack(pieces, axis=3)                 # (N, oh1, ow1, 64, C)
    return p.reshape(n, oh1 * ow1, 64 * c)


# ----------------------------------------------------------------------------
# Forward pass.
# ----------------------------------------------------------------------------
def critic_forward(packed, meta, visual_obs_nhwc, vec_obs):
    """visual_obs_nhwc: (N, H, W, C); vec_obs: (N, vec_dim) -> (N, 1) float32."""
    x = visual_obs_nhwc.astype(jnp.float32)
    vec = vec_obs.astype(jnp.float32)
    n = x.shape[0]
    c = x.shape[-1]
    oh1, ow1 = meta["conv1_hw"]
    oh2, ow2 = meta["conv2_hw"]
    enc = packed["bd1"].shape[1]
    vdim = vec.shape[1]
    k1 = 64 * c
    s1 = oh1 * ow1

    cols1 = _conv1_patches(x, oh1, ow1)           # (N, oh1*ow1, 64*C)

    tb = _pick_batch_tile(n)
    grid = (n // tb,)

    kernel = functools.partial(_critic_kernel, tb=tb, oh1=oh1, ow1=ow1,
                               oh2=oh2, ow2=ow2)

    return pl.pallas_call(
        kernel,
        out_shape=jax.ShapeDtypeStruct((n, 1), jnp.float32),
        grid=grid,
        in_specs=[
            pl.BlockSpec((tb, s1, k1), lambda i: (i, 0, 0)),          # conv1 patches
            pl.BlockSpec((tb, vdim), lambda i: (i, 0)),               # vec obs
            pl.BlockSpec((k1, 16), lambda i: (0, 0)),                 # w1
            pl.BlockSpec((1, 16), lambda i: (0, 0)),                  # b1
            pl.BlockSpec((256, 32), lambda i: (0, 0)),                # w2
            pl.BlockSpec((1, 32), lambda i: (0, 0)),                  # b2
            pl.BlockSpec((32 * oh2 * ow2, enc), lambda i: (0, 0)),    # dense1 conv part
            pl.BlockSpec((vdim, enc), lambda i: (0, 0)),              # dense1 vec part
            pl.BlockSpec((1, enc), lambda i: (0, 0)),                 # dense1 bias
            pl.BlockSpec((1, enc), lambda i: (0, 0)),                 # dense2 weight row
            pl.BlockSpec((1, 1), lambda i: (0, 0)),                   # dense2 bias
        ],
        out_specs=pl.BlockSpec((tb, 1), lambda i: (i, 0)),
        scratch_shapes=[pltpu.VMEM((tb, s1, 16), jnp.float32)],       # conv1 activations
        compiler_params=pltpu.CompilerParams(
            dimension_semantics=("parallel",)),
    )(cols1, vec, packed["w1"], packed["b1"], packed["w2"], packed["b2"],
      packed["wd1a"], packed["wd1b"], packed["bd1"], packed["wd2"], packed["bd2"])


# ----------------------------------------------------------------------------
# Parameter init (PyTorch layouts) and pure-JAX reference for validation.
# ----------------------------------------------------------------------------
def init_critic_params(key, vis_shape, vec_dim, encoding_size=64):
    h, w, c = vis_shape
    conv1_hw = conv_output_shape((h, w), 8, 4)
    conv2_hw = conv_output_shape(conv1_hw, 4, 2)
    final_flat = conv2_hw[0] * conv2_hw[1] * 32

    ks = jax.random.split(key, 8)
    s = 0.1
    params = {
        # PyTorch Conv2d weight layout: (out_c, in_c, kh, kw)
        "conv1_w": s * jax.random.normal(ks[0], (16, c, 8, 8), jnp.float32),
        "conv1_b": s * jax.random.normal(ks[1], (16,), jnp.float32),
        "conv2_w": s * jax.random.normal(ks[2], (32, 16, 4, 4), jnp.float32),
        "conv2_b": s * jax.random.normal(ks[3], (32,), jnp.float32),
        # PyTorch Linear weight layout: (out, in)
        "dense1_w": s * jax.random.normal(
            ks[4], (encoding_size, final_flat + vec_dim), jnp.float32),
        "dense1_b": s * jax.random.normal(ks[5], (encoding_size,), jnp.float32),
        "dense2_w": s * jax.random.normal(ks[6], (1, encoding_size), jnp.float32),
        "dense2_b": s * jax.random.normal(ks[7], (1,), jnp.float32),
    }
    meta = {"conv1_hw": conv1_hw, "conv2_hw": conv2_hw, "final_flat": final_flat}
    return params, meta


def critic_reference(params, visual, vec):
    """Plain-JAX re-implementation of the PyTorch module's forward()."""
    hi = jax.lax.Precision.HIGHEST
    x = jnp.transpose(visual.astype(jnp.float32), (0, 3, 1, 2))       # NCHW
    y = jax.lax.conv_general_dilated(
        x, params["conv1_w"], (4, 4), "VALID",
        dimension_numbers=("NCHW", "OIHW", "NCHW"), precision=hi)
    y = jax.nn.relu(y + params["conv1_b"][None, :, None, None])
    y = jax.lax.conv_general_dilated(
        y, params["conv2_w"], (2, 2), "VALID",
        dimension_numbers=("NCHW", "OIHW", "NCHW"), precision=hi)
    y = jax.nn.relu(y + params["conv2_b"][None, :, None, None])
    conv_out = y.reshape(y.shape[0], -1)
    concat = jnp.concatenate([conv_out, vec.astype(jnp.float32)], axis=1)
    h = jax.nn.relu(jnp.dot(concat, params["dense1_w"].T, precision=hi)
                    + params["dense1_b"])
    return jnp.dot(h, params["dense2_w"].T, precision=hi) + params["dense2_b"]


# ----------------------------------------------------------------------------
if __name__ == "__main__":
    # vis_shape=(36,36,3): conv1 -> 8x8x16, conv2 -> 3x3x32, final_flat=288.
    batch = 2
    vis_shape = (36, 36, 3)       # (H, W, C), exactly what the PyTorch module expects
    vec_dim = 8
    encoding_size = 64

    key = jax.random.PRNGKey(0)
    k_par, k_vis, k_vec = jax.random.split(key, 3)

    params, meta = init_critic_params(k_par, vis_shape, vec_dim, encoding_size)
    packed = pack_critic_params(params, meta)     # one-time weight re-layout

    visual_obs = jax.random.uniform(k_vis, (batch,) + vis_shape, jnp.float32)
    vec_obs = jax.random.uniform(k_vec, (batch, vec_dim), jnp.float32)

    fwd = jax.jit(functools.partial(critic_forward, packed, meta))
    out = jax.block_until_ready(fwd(visual_obs, vec_obs))

    assert out.shape == (batch, 1), out.shape
    assert out.dtype == jnp.float32

    ref = jax.block_until_ready(critic_reference(params, visual_obs, vec_obs))
    np.testing.assert_allclose(np.asarray(out), np.asarray(ref),
                               rtol=5e-2, atol=5e-3)

    print("KERNEL_OK")
</pallas_src>

<mosaic_0001>
module attributes {stable_mosaic.version = 11 : i64} {
  func.func @_critic_kernel(%arg0: i32, %arg1: memref<2x64x192xf32, #tpu.memory_space<vmem>>, %arg2: memref<2x8xf32, #tpu.memory_space<vmem>>, %arg3: memref<192x16xf32, #tpu.memory_space<vmem>>, %arg4: memref<1x16xf32, #tpu.memory_space<vmem>>, %arg5: memref<256x32xf32, #tpu.memory_space<vmem>>, %arg6: memref<1x32xf32, #tpu.memory_space<vmem>>, %arg7: memref<288x64xf32, #tpu.memory_space<vmem>>, %arg8: memref<8x64xf32, #tpu.memory_space<vmem>>, %arg9: memref<1x64xf32, #tpu.memory_space<vmem>>, %arg10: memref<1x64xf32, #tpu.memory_space<vmem>>, %arg11: memref<1x1xf32, #tpu.memory_space<vmem>>, %arg12: memref<2x1xf32, #tpu.memory_space<vmem>>, %arg13: memref<2x64x16xf32, #tpu.memory_space<vmem>>) attributes {dimension_semantics = [#tpu.dimension_semantics<parallel>], iteration_bounds = array<i64: 1>, scalar_prefetch = 0 : i64, scratch_operands = 1 : i64, tpu.core_type = #tpu.core_type<tc>, window_params = [{transform_indices = @transform_0, window_bounds = array<i64: 2, 64, 192>}, {transform_indices = @transform_1, window_bounds = array<i64: 2, 8>}, {pipeline_mode = #tpu.pipeline_mode<synchronous>, transform_indices = @transform_2, window_bounds = array<i64: 192, 16>}, {pipeline_mode = #tpu.pipeline_mode<synchronous>, transform_indices = @transform_3, window_bounds = array<i64: 1, 16>}, {pipeline_mode = #tpu.pipeline_mode<synchronous>, transform_indices = @transform_4, window_bounds = array<i64: 256, 32>}, {pipeline_mode = #tpu.pipeline_mode<synchronous>, transform_indices = @transform_5, window_bounds = array<i64: 1, 32>}, {pipeline_mode = #tpu.pipeline_mode<synchronous>, transform_indices = @transform_6, window_bounds = array<i64: 288, 64>}, {pipeline_mode = #tpu.pipeline_mode<synchronous>, transform_indices = @transform_7, window_bounds = array<i64: 8, 64>}, {pipeline_mode = #tpu.pipeline_mode<synchronous>, transform_indices = @transform_8, window_bounds = array<i64: 1, 64>}, {pipeline_mode = #tpu.pipeline_mode<synchronous>, transform_indices = @transform_9, window_bounds = array<i64: 1, 64>}, {pipeline_mode = #tpu.pipeline_mode<synchronous>, transform_indices = @transform_10, window_bounds = array<i64: 1, 1>}, {transform_indices = @transform_11, window_bounds = array<i64: 2, 1>}]} {
    %c0 = arith.constant 0 : index
    %c0_0 = arith.constant 0 : index
    %0 = vector.load %arg3[%c0, %c0_0] : memref<192x16xf32, #tpu.memory_space<vmem>>, vector<192x16xf32>
    %c0_1 = arith.constant 0 : index
    %c0_2 = arith.constant 0 : index
    %1 = vector.load %arg4[%c0_1, %c0_2] : memref<1x16xf32, #tpu.memory_space<vmem>>, vector<1x16xf32>
    %c0_3 = arith.constant 0 : index
    %c0_4 = arith.constant 0 : index
    %c0_5 = arith.constant 0 : index
    %2 = vector.load %arg1[%c0_3, %c0_4, %c0_5] : memref<2x64x192xf32, #tpu.memory_space<vmem>>, vector<1x64x192xf32>
    %3 = vector.shape_cast %2 : vector<1x64x192xf32> to vector<64x192xf32>
    %cst = arith.constant dense<0.000000e+00> : vector<64x16xf32>
    %4 = tpu.matmul %3, %0, %cst {dimension_numbers = #tpu.dot_dimension_numbers<[1], [0], [0], [1], [0, 0, 1, 1], [], []>} : vector<64x192xf32>, vector<192x16xf32>, vector<64x16xf32> -> vector<64x16xf32>
    %5 = vector.broadcast %1 : vector<1x16xf32> to vector<64x16xf32>
    %6 = arith.addf %4, %5 : vector<64x16xf32>
    %cst_6 = arith.constant 0.000000e+00 : f32
    %7 = vector.broadcast %cst_6 : f32 to vector<64x16xf32>
    %8 = arith.maximumf %6, %7 : vector<64x16xf32>
    %c0_7 = arith.constant 0 : index
    %c0_8 = arith.constant 0 : index
    %c0_9 = arith.constant 0 : index
    %9 = vector.load %arg13[%c0_7, %c0_8, %c0_9] : memref<2x64x16xf32, #tpu.memory_space<vmem>>, vector<1x64x16xf32>
    %10 = vector.shape_cast %9 : vector<1x64x16xf32> to vector<64x16xf32>
    %11 = vector.shape_cast %8 : vector<64x16xf32> to vector<1x64x16xf32>
    tpu.vector_store %arg13[%c0_7, %c0_8, %c0_9], %11 {strides = array<i32>} : memref<2x64x16xf32, #tpu.memory_space<vmem>>, vector<1x64x16xf32>,
    %c1 = arith.constant 1 : index
    %c0_10 = arith.constant 0 : index
    %c0_11 = arith.constant 0 : index
    %12 = vector.load %arg1[%c1, %c0_10, %c0_11] : memref<2x64x192xf32, #tpu.memory_space<vmem>>, vector<1x64x192xf32>
    %13 = vector.shape_cast %12 : vector<1x64x192xf32> to vector<64x192xf32>
    %cst_12 = arith.constant dense<0.000000e+00> : vector<64x16xf32>
    %14 = tpu.matmul %13, %0, %cst_12 {dimension_numbers = #tpu.dot_dimension_numbers<[1], [0], [0], [1], [0, 0, 1, 1], [], []>} : vector<64x192xf32>, vector<192x16xf32>, vector<64x16xf32> -> vector<64x16xf32>
    %15 = vector.broadcast %1 : vector<1x16xf32> to vector<64x16xf32>
    %16 = arith.addf %14, %15 : vector<64x16xf32>
    %cst_13 = arith.constant 0.000000e+00 : f32
    %17 = vector.broadcast %cst_13 : f32 to vector<64x16xf32>
    %18 = arith.maximumf %16, %17 : vector<64x16xf32>
    %c1_14 = arith.constant 1 : index
    %c0_15 = arith.constant 0 : index
    %c0_16 = arith.constant 0 : index
    %19 = vector.load %arg13[%c1_14, %c0_15, %c0_16] : memref<2x64x16xf32, #tpu.memory_space<vmem>>, vector<1x64x16xf32>
    %20 = vector.shape_cast %19 : vector<1x64x16xf32> to vector<64x16xf32>
    %21 = vector.shape_cast %18 : vector<64x16xf32> to vector<1x64x16xf32>
    tpu.vector_store %arg13[%c1_14, %c0_15, %c0_16], %21 {strides = array<i32>} : memref<2x64x16xf32, #tpu.memory_space<vmem>>, vector<1x64x16xf32>,
    %c0_17 = arith.constant 0 : index
    %c0_18 = arith.constant 0 : index
    %22 = vector.load %arg2[%c0_17, %c0_18] : memref<2x8xf32, #tpu.memory_space<vmem>>, vector<2x8xf32>
    %c0_19 = arith.constant 0 : index
    %c0_20 = arith.constant 0 : index
    %23 = vector.load %arg8[%c0_19, %c0_20] : memref<8x64xf32, #tpu.memory_space<vmem>>, vector<8x64xf32>
    %cst_21 = arith.constant dense<0.000000e+00> : vector<2x64xf32>
    %24 = tpu.matmul %22, %23, %cst_21 {dimension_numbers = #tpu.dot_dimension_numbers<[1], [0], [0], [1], [0, 0, 1, 1], [], []>} : vector<2x8xf32>, vector<8x64xf32>, vector<2x64xf32> -> vector<2x64xf32>
    %c0_22 = arith.constant 0 : index
    %c0_23 = arith.constant 0 : index
    %25 = vector.load %arg5[%c0_22, %c0_23] : memref<256x32xf32, #tpu.memory_space<vmem>>, vector<16x32xf32>
    %c16 = arith.constant 16 : index
    %c0_24 = arith.constant 0 : index
    %26 = vector.load %arg5[%c16, %c0_24] : memref<256x32xf32, #tpu.memory_space<vmem>>, vector<16x32xf32>
    %c32 = arith.constant 32 : index
    %c0_25 = arith.constant 0 : index
    %27 = vector.load %arg5[%c32, %c0_25] : memref<256x32xf32, #tpu.memory_space<vmem>>, vector<16x32xf32>
    %c48 = arith.constant 48 : index
    %c0_26 = arith.constant 0 : index
    %28 = vector.load %arg5[%c48, %c0_26] : memref<256x32xf32, #tpu.memory_space<vmem>>, vector<16x32xf32>
    %c64 = arith.constant 64 : index
    %c0_27 = arith.constant 0 : index
    %29 = vector.load %arg5[%c64, %c0_27] : memref<256x32xf32, #tpu.memory_space<vmem>>, vector<16x32xf32>
    %c80 = arith.constant 80 : index
    %c0_28 = arith.constant 0 : index
    %30 = vector.load %arg5[%c80, %c0_28] : memref<256x32xf32, #tpu.memory_space<vmem>>, vector<16x32xf32>
    %c96 = arith.constant 96 : index
    %c0_29 = arith.constant 0 : index
    %31 = vector.load %arg5[%c96, %c0_29] : memref<256x32xf32, #tpu.memory_space<vmem>>, vector<16x32xf32>
    %c112 = arith.constant 112 : index
    %c0_30 = arith.constant 0 : index
    %32 = vector.load %arg5[%c112, %c0_30] : memref<256x32xf32, #tpu.memory_space<vmem>>, vector<16x32xf32>
    %c128 = arith.constant 128 : index
    %c0_31 = arith.constant 0 : index
    %33 = vector.load %arg5[%c128, %c0_31] : memref<256x32xf32, #tpu.memory_space<vmem>>, vector<16x32xf32>
    %c144 = arith.constant 144 : index
    %c0_32 = arith.constant 0 : index
    %34 = vector.load %arg5[%c144, %c0_32] : memref<256x32xf32, #tpu.memory_space<vmem>>, vector<16x32xf32>
    %c160 = arith.constant 160 : index
    %c0_33 = arith.constant 0 : index
    %35 = vector.load %arg5[%c160, %c0_33] : memref<256x32xf32, #tpu.memory_space<vmem>>, vector<16x32xf32>
    %c176 = arith.constant 176 : index
    %c0_34 = arith.constant 0 : index
    %36 = vector.load %arg5[%c176, %c0_34] : memref<256x32xf32, #tpu.memory_space<vmem>>, vector<16x32xf32>
    %c192 = arith.constant 192 : index
    %c0_35 = arith.constant 0 : index
    %37 = vector.load %arg5[%c192, %c0_35] : memref<256x32xf32, #tpu.memory_space<vmem>>, vector<16x32xf32>
    %c208 = arith.constant 208 : index
    %c0_36 = arith.constant 0 : index
    %38 = vector.load %arg5[%c208, %c0_36] : memref<256x32xf32, #tpu.memory_space<vmem>>, vector<16x32xf32>
    %c224 = arith.constant 224 : index
    %c0_37 = arith.constant 0 : index
    %39 = vector.load %arg5[%c224, %c0_37] : memref<256x32xf32, #tpu.memory_space<vmem>>, vector<16x32xf32>
    %c240 = arith.constant 240 : index
    %c0_38 = arith.constant 0 : index
    %40 = vector.load %arg5[%c240, %c0_38] : memref<256x32xf32, #tpu.memory_space<vmem>>, vector<16x32xf32>
    %c0_39 = arith.constant 0 : index
    %c0_40 = arith.constant 0 : index
    %41 = vector.load %arg6[%c0_39, %c0_40] : memref<1x32xf32, #tpu.memory_space<vmem>>, vector<1x32xf32>
    %c0_41 = arith.constant 0 : index
    %c0_42 = arith.constant 0 : index
    %c0_43 = arith.constant 0 : index
    %42 = vector.load %arg13[%c0_41, %c0_42, %c0_43] : memref<2x64x16xf32, #tpu.memory_space<vmem>>, vector<2x1x16xf32>
    %43 = vector.shape_cast %42 : vector<2x1x16xf32> to vector<2x16xf32>
    %cst_44 = arith.constant dense<0.000000e+00> : vector<2x32xf32>
    %44 = tpu.matmul %43, %25, %cst_44 {dimension_numbers = #tpu.dot_dimension_numbers<[1], [0], [0], [1], [0, 0, 1, 1], [], []>} : vector<2x16xf32>, vector<16x32xf32>, vector<2x32xf32> -> vector<2x32xf32>
    %c0_45 = arith.constant 0 : index
    %c1_46 = arith.constant 1 : index
    %c0_47 = arith.constant 0 : index
    %45 = vector.load %arg13[%c0_45, %c1_46, %c0_47] : memref<2x64x16xf32, #tpu.memory_space<vmem>>, vector<2x1x16xf32>
    %46 = vector.shape_cast %45 : vector<2x1x16xf32> to vector<2x16xf32>
    %cst_48 = arith.constant dense<0.000000e+00> : vector<2x32xf32>
    %47 = tpu.matmul %46, %26, %cst_48 {dimension_numbers = #tpu.dot_dimension_numbers<[1], [0], [0], [1], [0, 0, 1, 1], [], []>} : vector<2x16xf32>, vector<16x32xf32>, vector<2x32xf32> -> vector<2x32xf32>
    %48 = arith.addf %44, %47 : vector<2x32xf32>
    %c0_49 = arith.constant 0 : index
    %c2 = arith.constant 2 : index
    %c0_50 = arith.constant 0 : index
    %49 = vector.load %arg13[%c0_49, %c2, %c0_50] : memref<2x64x16xf32, #tpu.memory_space<vmem>>, vector<2x1x16xf32>
    %50 = vector.shape_cast %49 : vector<2x1x16xf32> to vector<2x16xf32>
    %cst_51 = arith.constant dense<0.000000e+00> : vector<2x32xf32>
    %51 = tpu.matmul %50, %27, %cst_51 {dimension_numbers = #tpu.dot_dimension_numbers<[1], [0], [0], [1], [0, 0, 1, 1], [], []>} : vector<2x16xf32>, vector<16x32xf32>, vector<2x32xf32> -> vector<2x32xf32>
    %52 = arith.addf %48, %51 : vector<2x32xf32>
    %c0_52 = arith.constant 0 : index
    %c3 = arith.constant 3 : index
    %c0_53 = arith.constant 0 : index
    %53 = vector.load %arg13[%c0_52, %c3, %c0_53] : memref<2x64x16xf32, #tpu.memory_space<vmem>>, vector<2x1x16xf32>
    %54 = vector.shape_cast %53 : vector<2x1x16xf32> to vector<2x16xf32>
    %cst_54 = arith.constant dense<0.000000e+00> : vector<2x32xf32>
    %55 = tpu.matmul %54, %28, %cst_54 {dimension_numbers = #tpu.dot_dimension_numbers<[1], [0], [0], [1], [0, 0, 1, 1], [], []>} : vector<2x16xf32>, vector<16x32xf32>, vector<2x32xf32> -> vector<2x32xf32>
    %56 = arith.addf %52, %55 : vector<2x32xf32>
    %c0_55 = arith.constant 0 : index
    %c8 = arith.constant 8 : index
    %c0_56 = arith.constant 0 : index
    %57 = vector.load %arg13[%c0_55, %c8, %c0_56] : memref<2x64x16xf32, #tpu.memory_space<vmem>>, vector<2x1x16xf32>
    %58 = vector.shape_cast %57 : vector<2x1x16xf32> to vector<2x16xf32>
    %cst_57 = arith.constant dense<0.000000e+00> : vector<2x32xf32>
    %59 = tpu.matmul %58, %29, %cst_57 {dimension_numbers = #tpu.dot_dimension_numbers<[1], [0], [0], [1], [0, 0, 1, 1], [], []>} : vector<2x16xf32>, vector<16x32xf32>, vector<2x32xf32> -> vector<2x32xf32>
    %60 = arith.addf %56, %59 : vector<2x32xf32>
    %c0_58 = arith.constant 0 : index
    %c9 = arith.constant 9 : index
    %c0_59 = arith.constant 0 : index
    %61 = vector.load %arg13[%c0_58, %c9, %c0_59] : memref<2x64x16xf32, #tpu.memory_space<vmem>>, vector<2x1x16xf32>
    %62 = vector.shape_cast %61 : vector<2x1x16xf32> to vector<2x16xf32>
    %cst_60 = arith.constant dense<0.000000e+00> : vector<2x32xf32>
    %63 = tpu.matmul %62, %30, %cst_60 {dimension_numbers = #tpu.dot_dimension_numbers<[1], [0], [0], [1], [0, 0, 1, 1], [], []>} : vector<2x16xf32>, vector<16x32xf32>, vector<2x32xf32> -> vector<2x32xf32>
    %64 = arith.addf %60, %63 : vector<2x32xf32>
    %c0_61 = arith.constant 0 : index
    %c10 = arith.constant 10 : index
    %c0_62 = arith.constant 0 : index
    %65 = vector.load %arg13[%c0_61, %c10, %c0_62] : memref<2x64x16xf32, #tpu.memory_space<vmem>>, vector<2x1x16xf32>
    %66 = vector.shape_cast %65 : vector<2x1x16xf32> to vector<2x16xf32>
    %cst_63 = arith.constant dense<0.000000e+00> : vector<2x32xf32>
    %67 = tpu.matmul %66, %31, %cst_63 {dimension_numbers = #tpu.dot_dimension_numbers<[1], [0], [0], [1], [0, 0, 1, 1], [], []>} : vector<2x16xf32>, vector<16x32xf32>, vector<2x32xf32> -> vector<2x32xf32>
    %68 = arith.addf %64, %67 : vector<2x32xf32>
    %c0_64 = arith.constant 0 : index
    %c11 = arith.constant 11 : index
    %c0_65 = arith.constant 0 : index
    %69 = vector.load %arg13[%c0_64, %c11, %c0_65] : memref<2x64x16xf32, #tpu.memory_space<vmem>>, vector<2x1x16xf32>
    %70 = vector.shape_cast %69 : vector<2x1x16xf32> to vector<2x16xf32>
    %cst_66 = arith.constant dense<0.000000e+00> : vector<2x32xf32>
    %71 = tpu.matmul %70, %32, %cst_66 {dimension_numbers = #tpu.dot_dimension_numbers<[1], [0], [0], [1], [0, 0, 1, 1], [], []>} : vector<2x16xf32>, vector<16x32xf32>, vector<2x32xf32> -> vector<2x32xf32>
    %72 = arith.addf %68, %71 : vector<2x32xf32>
    %c0_67 = arith.constant 0 : index
    %c16_68 = arith.constant 16 : index
    %c0_69 = arith.constant 0 : index
    %73 = vector.load %arg13[%c0_67, %c16_68, %c0_69] : memref<2x64x16xf32, #tpu.memory_space<vmem>>, vector<2x1x16xf32>
    %74 = vector.shape_cast %73 : vector<2x1x16xf32> to vector<2x16xf32>
    %cst_70 = arith.constant dense<0.000000e+00> : vector<2x32xf32>
    %75 = tpu.matmul %74, %33, %cst_70 {dimension_numbers = #tpu.dot_dimension_numbers<[1], [0], [0], [1], [0, 0, 1, 1], [], []>} : vector<2x16xf32>, vector<16x32xf32>, vector<2x32xf32> -> vector<2x32xf32>
    %76 = arith.addf %72, %75 : vector<2x32xf32>
    %c0_71 = arith.constant 0 : index
    %c17 = arith.constant 17 : index
    %c0_72 = arith.constant 0 : index
    %77 = vector.load %arg13[%c0_71, %c17, %c0_72] : memref<2x64x16xf32, #tpu.memory_space<vmem>>, vector<2x1x16xf32>
    %78 = vector.shape_cast %77 : vector<2x1x16xf32> to vector<2x16xf32>
    %cst_73 = arith.constant dense<0.000000e+00> : vector<2x32xf32>
    %79 = tpu.matmul %78, %34, %cst_73 {dimension_numbers = #tpu.dot_dimension_numbers<[1], [0], [0], [1], [0, 0, 1, 1], [], []>} : vector<2x16xf32>, vector<16x32xf32>, vector<2x32xf32> -> vector<2x32xf32>
    %80 = arith.addf %76, %79 : vector<2x32xf32>
    %c0_74 = arith.constant 0 : index
    %c18 = arith.constant 18 : index
    %c0_75 = arith.constant 0 : index
    %81 = vector.load %arg13[%c0_74, %c18, %c0_75] : memref<2x64x16xf32, #tpu.memory_space<vmem>>, vector<2x1x16xf32>
    %82 = vector.shape_cast %81 : vector<2x1x16xf32> to vector<2x16xf32>
    %cst_76 = arith.constant dense<0.000000e+00> : vector<2x32xf32>
    %83 = tpu.matmul %82, %35, %cst_76 {dimension_numbers = #tpu.dot_dimension_numbers<[1], [0], [0], [1], [0, 0, 1, 1], [], []>} : vector<2x16xf32>, vector<16x32xf32>, vector<2x32xf32> -> vector<2x32xf32>
    %84 = arith.addf %80, %83 : vector<2x32xf32>
    %c0_77 = arith.constant 0 : index
    %c19 = arith.constant 19 : index
    %c0_78 = arith.constant 0 : index
    %85 = vector.load %arg13[%c0_77, %c19, %c0_78] : memref<2x64x16xf32, #tpu.memory_space<vmem>>, vector<2x1x16xf32>
    %86 = vector.shape_cast %85 : vector<2x1x16xf32> to vector<2x16xf32>
    %cst_79 = arith.constant dense<0.000000e+00> : vector<2x32xf32>
    %87 = tpu.matmul %86, %36, %cst_79 {dimension_numbers = #tpu.dot_dimension_numbers<[1], [0], [0], [1], [0, 0, 1, 1], [], []>} : vector<2x16xf32>, vector<16x32xf32>, vector<2x32xf32> -> vector<2x32xf32>
    %88 = arith.addf %84, %87 : vector<2x32xf32>
    %c0_80 = arith.constant 0 : index
    %c24 = arith.constant 24 : index
    %c0_81 = arith.constant 0 : index
    %89 = vector.load %arg13[%c0_80, %c24, %c0_81] : memref<2x64x16xf32, #tpu.memory_space<vmem>>, vector<2x1x16xf32>
    %90 = vector.shape_cast %89 : vector<2x1x16xf32> to vector<2x16xf32>
    %cst_82 = arith.constant dense<0.000000e+00> : vector<2x32xf32>
    %91 = tpu.matmul %90, %37, %cst_82 {dimension_numbers = #tpu.dot_dimension_numbers<[1], [0], [0], [1], [0, 0, 1, 1], [], []>} : vector<2x16xf32>, vector<16x32xf32>, vector<2x32xf32> -> vector<2x32xf32>
    %92 = arith.addf %88, %91 : vector<2x32xf32>
    %c0_83 = arith.constant 0 : index
    %c25 = arith.constant 25 : index
    %c0_84 = arith.constant 0 : index
    %93 = vector.load %arg13[%c0_83, %c25, %c0_84] : memref<2x64x16xf32, #tpu.memory_space<vmem>>, vector<2x1x16xf32>
    %94 = vector.shape_cast %93 : vector<2x1x16xf32> to vector<2x16xf32>
    %cst_85 = arith.constant dense<0.000000e+00> : vector<2x32xf32>
    %95 = tpu.matmul %94, %38, %cst_85 {dimension_numbers = #tpu.dot_dimension_numbers<[1], [0], [0], [1], [0, 0, 1, 1], [], []>} : vector<2x16xf32>, vector<16x32xf32>, vector<2x32xf32> -> vector<2x32xf32>
    %96 = arith.addf %92, %95 : vector<2x32xf32>
    %c0_86 = arith.constant 0 : index
    %c26 = arith.constant 26 : index
    %c0_87 = arith.constant 0 : index
    %97 = vector.load %arg13[%c0_86, %c26, %c0_87] : memref<2x64x16xf32, #tpu.memory_space<vmem>>, vector<2x1x16xf32>
    %98 = vector.shape_cast %97 : vector<2x1x16xf32> to vector<2x16xf32>
    %cst_88 = arith.constant dense<0.000000e+00> : vector<2x32xf32>
    %99 = tpu.matmul %98, %39, %cst_88 {dimension_numbers = #tpu.dot_dimension_numbers<[1], [0], [0], [1], [0, 0, 1, 1], [], []>} : vector<2x16xf32>, vector<16x32xf32>, vector<2x32xf32> -> vector<2x32xf32>
    %100 = arith.addf %96, %99 : vector<2x32xf32>
    %c0_89 = arith.constant 0 : index
    %c27 = arith.constant 27 : index
    %c0_90 = arith.constant 0 : index
    %101 = vector.load %arg13[%c0_89, %c27, %c0_90] : memref<2x64x16xf32, #tpu.memory_space<vmem>>, vector<2x1x16xf32>
    %102 = vector.shape_cast %101 : vector<2x1x16xf32> to vector<2x16xf32>
    %cst_91 = arith.constant dense<0.000000e+00> : vector<2x32xf32>
    %103 = tpu.matmul %102, %40, %cst_91 {dimension_numbers = #tpu.dot_dimension_numbers<[1], [0], [0], [1], [0, 0, 1, 1], [], []>} : vector<2x16xf32>, vector<16x32xf32>, vector<2x32xf32> -> vector<2x32xf32>
    %104 = arith.addf %100, %103 : vector<2x32xf32>
    %105 = vector.broadcast %41 : vector<1x32xf32> to vector<2x32xf32>
    %106 = arith.addf %104, %105 : vector<2x32xf32>
    %cst_92 = arith.constant 0.000000e+00 : f32
    %107 = vector.broadcast %cst_92 : f32 to vector<2x32xf32>
    %108 = arith.maximumf %106, %107 : vector<2x32xf32>
    %c0_93 = arith.constant 0 : index
    %c0_94 = arith.constant 0 : index
    %109 = vector.load %arg7[%c0_93, %c0_94] : memref<288x64xf32, #tpu.memory_space<vmem>>, vector<32x64xf32>
    %cst_95 = arith.constant dense<0.000000e+00> : vector<2x64xf32>
    %110 = tpu.matmul %108, %109, %cst_95 {dimension_numbers = #tpu.dot_dimension_numbers<[1], [0], [0], [1], [0, 0, 1, 1], [], []>} : vector<2x32xf32>, vector<32x64xf32>, vector<2x64xf32> -> vector<2x64xf32>
    %111 = arith.addf %24, %110 : vector<2x64xf32>
    %c0_96 = arith.constant 0 : index
    %c2_97 = arith.constant 2 : index
    %c0_98 = arith.constant 0 : index
    %112 = vector.load %arg13[%c0_96, %c2_97, %c0_98] : memref<2x64x16xf32, #tpu.memory_space<vmem>>, vector<2x1x16xf32>
    %113 = vector.shape_cast %112 : vector<2x1x16xf32> to vector<2x16xf32>
    %cst_99 = arith.constant dense<0.000000e+00> : vector<2x32xf32>
    %114 = tpu.matmul %113, %25, %cst_99 {dimension_numbers = #tpu.dot_dimension_numbers<[1], [0], [0], [1], [0, 0, 1, 1], [], []>} : vector<2x16xf32>, vector<16x32xf32>, vector<2x32xf32> -> vector<2x32xf32>
    %c0_100 = arith.constant 0 : index
    %c3_101 = arith.constant 3 : index
    %c0_102 = arith.constant 0 : index
    %115 = vector.load %arg13[%c0_100, %c3_101, %c0_102] : memref<2x64x16xf32, #tpu.memory_space<vmem>>, vector<2x1x16xf32>
    %116 = vector.shape_cast %115 : vector<2x1x16xf32> to vector<2x16xf32>
    %cst_103 = arith.constant dense<0.000000e+00> : vector<2x32xf32>
    %117 = tpu.matmul %116, %26, %cst_103 {dimension_numbers = #tpu.dot_dimension_numbers<[1], [0], [0], [1], [0, 0, 1, 1], [], []>} : vector<2x16xf32>, vector<16x32xf32>, vector<2x32xf32> -> vector<2x32xf32>
    %118 = arith.addf %114, %117 : vector<2x32xf32>
    %c0_104 = arith.constant 0 : index
    %c4 = arith.constant 4 : index
    %c0_105 = arith.constant 0 : index
    %119 = vector.load %arg13[%c0_104, %c4, %c0_105] : memref<2x64x16xf32, #tpu.memory_space<vmem>>, vector<2x1x16xf32>
    %120 = vector.shape_cast %119 : vector<2x1x16xf32> to vector<2x16xf32>
    %cst_106 = arith.constant dense<0.000000e+00> : vector<2x32xf32>
    %121 = tpu.matmul %120, %27, %cst_106 {dimension_numbers = #tpu.dot_dimension_numbers<[1], [0], [0], [1], [0, 0, 1, 1], [], []>} : vector<2x16xf32>, vector<16x32xf32>, vector<2x32xf32> -> vector<2x32xf32>
    %122 = arith.addf %118, %121 : vector<2x32xf32>
    %c0_107 = arith.constant 0 : index
    %c5 = arith.constant 5 : index
    %c0_108 = arith.constant 0 : index
    %123 = vector.load %arg13[%c0_107, %c5, %c0_108] : memref<2x64x16xf32, #tpu.memory_space<vmem>>, vector<2x1x16xf32>
    %124 = vector.shape_cast %123 : vector<2x1x16xf32> to vector<2x16xf32>
    %cst_109 = arith.constant dense<0.000000e+00> : vector<2x32xf32>
    %125 = tpu.matmul %124, %28, %cst_109 {dimension_numbers = #tpu.dot_dimension_numbers<[1], [0], [0], [1], [0, 0, 1, 1], [], []>} : vector<2x16xf32>, vector<16x32xf32>, vector<2x32xf32> -> vector<2x32xf32>
    %126 = arith.addf %122, %125 : vector<2x32xf32>
    %c0_110 = arith.constant 0 : index
    %c10_111 = arith.constant 10 : index
    %c0_112 = arith.constant 0 : index
    %127 = vector.load %arg13[%c0_110, %c10_111, %c0_112] : memref<2x64x16xf32, #tpu.memory_space<vmem>>, vector<2x1x16xf32>
    %128 = vector.shape_cast %127 : vector<2x1x16xf32> to vector<2x16xf32>
    %cst_113 = arith.constant dense<0.000000e+00> : vector<2x32xf32>
    %129 = tpu.matmul %128, %29, %cst_113 {dimension_numbers = #tpu.dot_dimension_numbers<[1], [0], [0], [1], [0, 0, 1, 1], [], []>} : vector<2x16xf32>, vector<16x32xf32>, vector<2x32xf32> -> vector<2x32xf32>
    %130 = arith.addf %126, %129 : vector<2x32xf32>
    %c0_114 = arith.constant 0 : index
    %c11_115 = arith.constant 11 : index
    %c0_116 = arith.constant 0 : index
    %131 = vector.load %arg13[%c0_114, %c11_115, %c0_116] : memref<2x64x16xf32, #tpu.memory_space<vmem>>, vector<2x1x16xf32>
    %132 = vector.shape_cast %131 : vector<2x1x16xf32> to vector<2x16xf32>
    %cst_117 = arith.constant dense<0.000000e+00> : vector<2x32xf32>
    %133 = tpu.matmul %132, %30, %cst_117 {dimension_numbers = #tpu.dot_dimension_numbers<[1], [0], [0], [1], [0, 0, 1, 1], [], []>} : vector<2x16xf32>, vector<16x32xf32>, vector<2x32xf32> -> vector<2x32xf32>
    %134 = arith.addf %130, %133 : vector<2x32xf32>
    %c0_118 = arith.constant 0 : index
    %c12 = arith.constant 12 : index
    %c0_119 = arith.constant 0 : index
    %135 = vector.load %arg13[%c0_118, %c12, %c0_119] : memref<2x64x16xf32, #tpu.memory_space<vmem>>, vector<2x1x16xf32>
    %136 = vector.shape_cast %135 : vector<2x1x16xf32> to vector<2x16xf32>
    %cst_120 = arith.constant dense<0.000000e+00> : vector<2x32xf32>
    %137 = tpu.matmul %136, %31, %cst_120 {dimension_numbers = #tpu.dot_dimension_numbers<[1], [0], [0], [1], [0, 0, 1, 1], [], []>} : vector<2x16xf32>, vector<16x32xf32>, vector<2x32xf32> -> vector<2x32xf32>
    %138 = arith.addf %134, %137 : vector<2x32xf32>
    %c0_121 = arith.constant 0 : index
    %c13 = arith.constant 13 : index
    %c0_122 = arith.constant 0 : index
    %139 = vector.load %arg13[%c0_121, %c13, %c0_122] : memref<2x64x16xf32, #tpu.memory_space<vmem>>, vector<2x1x16xf32>
    %140 = vector.shape_cast %139 : vector<2x1x16xf32> to vector<2x16xf32>
    %cst_123 = arith.constant dense<0.000000e+00> : vector<2x32xf32>
    %141 = tpu.matmul %140, %32, %cst_123 {dimension_numbers = #tpu.dot_dimension_numbers<[1], [0], [0], [1], [0, 0, 1, 1], [], []>} : vector<2x16xf32>, vector<16x32xf32>, vector<2x32xf32> -> vector<2x32xf32>
    %142 = arith.addf %138, %141 : vector<2x32xf32>
    %c0_124 = arith.constant 0 : index
    %c18_125 = arith.constant 18 : index
    %c0_126 = arith.constant 0 : index
    %143 = vector.load %arg13[%c0_124, %c18_125, %c0_126] : memref<2x64x16xf32, #tpu.memory_space<vmem>>, vector<2x1x16xf32>
    %144 = vector.shape_cast %143 : vector<2x1x16xf32> to vector<2x16xf32>
    %cst_127 = arith.constant dense<0.000000e+00> : vector<2x32xf32>
    %145 = tpu.matmul %144, %33, %cst_127 {dimension_numbers = #tpu.dot_dimension_numbers<[1], [0], [0], [1], [0, 0, 1, 1], [], []>} : vector<2x16xf32>, vector<16x32xf32>, vector<2x32xf32> -> vector<2x32xf32>
    %146 = arith.addf %142, %145 : vector<2x32xf32>
    %c0_128 = arith.constant 0 : index
    %c19_129 = arith.constant 19 : index
    %c0_130 = arith.constant 0 : index
    %147 = vector.load %arg13[%c0_128, %c19_129, %c0_130] : memref<2x64x16xf32, #tpu.memory_space<vmem>>, vector<2x1x16xf32>
    %148 = vector.shape_cast %147 : vector<2x1x16xf32> to vector<2x16xf32>
    %cst_131 = arith.constant dense<0.000000e+00> : vector<2x32xf32>
    %149 = tpu.matmul %148, %34, %cst_131 {dimension_numbers = #tpu.dot_dimension_numbers<[1], [0], [0], [1], [0, 0, 1, 1], [], []>} : vector<2x16xf32>, vector<16x32xf32>, vector<2x32xf32> -> vector<2x32xf32>
    %150 = arith.addf %146, %149 : vector<2x32xf32>
    %c0_132 = arith.constant 0 : index
    %c20 = arith.constant 20 : index
    %c0_133 = arith.constant 0 : index
    %151 = vector.load %arg13[%c0_132, %c20, %c0_133] : memref<2x64x16xf32, #tpu.memory_space<vmem>>, vector<2x1x16xf32>
    %152 = vector.shape_cast %151 : vector<2x1x16xf32> to vector<2x16xf32>
    %cst_134 = arith.constant dense<0.000000e+00> : vector<2x32xf32>
    %153 = tpu.matmul %152, %35, %cst_134 {dimension_numbers = #tpu.dot_dimension_numbers<[1], [0], [0], [1], [0, 0, 1, 1], [], []>} : vector<2x16xf32>, vector<16x32xf32>, vector<2x32xf32> -> vector<2x32xf32>
    %154 = arith.addf %150, %153 : vector<2x32xf32>
    %c0_135 = arith.constant 0 : index
    %c21 = arith.constant 21 : index
    %c0_136 = arith.constant 0 : index
    %155 = vector.load %arg13[%c0_135, %c21, %c0_136] : memref<2x64x16xf32, #tpu.memory_space<vmem>>, vector<2x1x16xf32>
    %156 = vector.shape_cast %155 : vector<2x1x16xf32> to vector<2x16xf32>
    %cst_137 = arith.constant dense<0.000000e+00> : vector<2x32xf32>
    %157 = tpu.matmul %156, %36, %cst_137 {dimension_numbers = #tpu.dot_dimension_numbers<[1], [0], [0], [1], [0, 0, 1, 1], [], []>} : vector<2x16xf32>, vector<16x32xf32>, vector<2x32xf32> -> vector<2x32xf32>
    %158 = arith.addf %154, %157 : vector<2x32xf32>
    %c0_138 = arith.constant 0 : index
    %c26_139 = arith.constant 26 : index
    %c0_140 = arith.constant 0 : index
    %159 = vector.load %arg13[%c0_138, %c26_139, %c0_140] : memref<2x64x16xf32, #tpu.memory_space<vmem>>, vector<2x1x16xf32>
    %160 = vector.shape_cast %159 : vector<2x1x16xf32> to vector<2x16xf32>
    %cst_141 = arith.constant dense<0.000000e+00> : vector<2x32xf32>
    %161 = tpu.matmul %160, %37, %cst_141 {dimension_numbers = #tpu.dot_dimension_numbers<[1], [0], [0], [1], [0, 0, 1, 1], [], []>} : vector<2x16xf32>, vector<16x32xf32>, vector<2x32xf32> -> vector<2x32xf32>
    %162 = arith.addf %158, %161 : vector<2x32xf32>
    %c0_142 = arith.constant 0 : index
    %c27_143 = arith.constant 27 : index
    %c0_144 = arith.constant 0 : index
    %163 = vector.load %arg13[%c0_142, %c27_143, %c0_144] : memref<2x64x16xf32, #tpu.memory_space<vmem>>, vector<2x1x16xf32>
    %164 = vector.shape_cast %163 : vector<2x1x16xf32> to vector<2x16xf32>
    %cst_145 = arith.constant dense<0.000000e+00> : vector<2x32xf32>
    %165 = tpu.matmul %164, %38, %cst_145 {dimension_numbers = #tpu.dot_dimension_numbers<[1], [0], [0], [1], [0, 0, 1, 1], [], []>} : vector<2x16xf32>, vector<16x32xf32>, vector<2x32xf32> -> vector<2x32xf32>
    %166 = arith.addf %162, %165 : vector<2x32xf32>
    %c0_146 = arith.constant 0 : index
    %c28 = arith.constant 28 : index
    %c0_147 = arith.constant 0 : index
    %167 = vector.load %arg13[%c0_146, %c28, %c0_147] : memref<2x64x16xf32, #tpu.memory_space<vmem>>, vector<2x1x16xf32>
    %168 = vector.shape_cast %167 : vector<2x1x16xf32> to vector<2x16xf32>
    %cst_148 = arith.constant dense<0.000000e+00> : vector<2x32xf32>
    %169 = tpu.matmul %168, %39, %cst_148 {dimension_numbers = #tpu.dot_dimension_numbers<[1], [0], [0], [1], [0, 0, 1, 1], [], []>} : vector<2x16xf32>, vector<16x32xf32>, vector<2x32xf32> -> vector<2x32xf32>
    %170 = arith.addf %166, %169 : vector<2x32xf32>
    %c0_149 = arith.constant 0 : index
    %c29 = arith.constant 29 : index
    %c0_150 = arith.constant 0 : index
    %171 = vector.load %arg13[%c0_149, %c29, %c0_150] : memref<2x64x16xf32, #tpu.memory_space<vmem>>, vector<2x1x16xf32>
    %172 = vector.shape_cast %171 : vector<2x1x16xf32> to vector<2x16xf32>
    %cst_151 = arith.constant dense<0.000000e+00> : vector<2x32xf32>
    %173 = tpu.matmul %172, %40, %cst_151 {dimension_numbers = #tpu.dot_dimension_numbers<[1], [0], [0], [1], [0, 0, 1, 1], [], []>} : vector<2x16xf32>, vector<16x32xf32>, vector<2x32xf32> -> vector<2x32xf32>
    %174 = arith.addf %170, %173 : vector<2x32xf32>
    %175 = vector.broadcast %41 : vector<1x32xf32> to vector<2x32xf32>
    %176 = arith.addf %174, %175 : vector<2x32xf32>
    %cst_152 = arith.constant 0.000000e+00 : f32
    %177 = vector.broadcast %cst_152 : f32 to vector<2x32xf32>
    %178 = arith.maximumf %176, %177 : vector<2x32xf32>
    %c32_153 = arith.constant 32 : index
    %c0_154 = arith.constant 0 : index
    %179 = vector.load %arg7[%c32_153, %c0_154] : memref<288x64xf32, #tpu.memory_space<vmem>>, vector<32x64xf32>
    %cst_155 = arith.constant dense<0.000000e+00> : vector<2x64xf32>
    %180 = tpu.matmul %178, %179, %cst_155 {dimension_numbers = #tpu.dot_dimension_numbers<[1], [0], [0], [1], [0, 0, 1, 1], [], []>} : vector<2x32xf32>, vector<32x64xf32>, vector<2x64xf32> -> vector<2x64xf32>
    %181 = arith.addf %111, %180 : vector<2x64xf32>
    %c0_156 = arith.constant 0 : index
    %c4_157 = arith.constant 4 : index
    %c0_158 = arith.constant 0 : index
    %182 = vector.load %arg13[%c0_156, %c4_157, %c0_158] : memref<2x64x16xf32, #tpu.memory_space<vmem>>, vector<2x1x16xf32>
    %183 = vector.shape_cast %182 : vector<2x1x16xf32> to vector<2x16xf32>
    %cst_159 = arith.constant dense<0.000000e+00> : vector<2x32xf32>
    %184 = tpu.matmul %183, %25, %cst_159 {dimension_numbers = #tpu.dot_dimension_numbers<[1], [0], [0], [1], [0, 0, 1, 1], [], []>} : vector<2x16xf32>, vector<16x32xf32>, vector<2x32xf32> -> vector<2x32xf32>
    %c0_160 = arith.constant 0 : index
    %c5_161 = arith.constant 5 : index
    %c0_162 = arith.constant 0 : index
    %185 = vector.load %arg13[%c0_160, %c5_161, %c0_162] : memref<2x64x16xf32, #tpu.memory_space<vmem>>, vector<2x1x16xf32>
    %186 = vector.shape_cast %185 : vector<2x1x16xf32> to vector<2x16xf32>
    %cst_163 = arith.constant dense<0.000000e+00> : vector<2x32xf32>
    %187 = tpu.matmul %186, %26, %cst_163 {dimension_numbers = #tpu.dot_dimension_numbers<[1], [0], [0], [1], [0, 0, 1, 1], [], []>} : vector<2x16xf32>, vector<16x32xf32>, vector<2x32xf32> -> vector<2x32xf32>
    %188 = arith.addf %184, %187 : vector<2x32xf32>
    %c0_164 = arith.constant 0 : index
    %c6 = arith.constant 6 : index
    %c0_165 = arith.constant 0 : index
    %189 = vector.load %arg13[%c0_164, %c6, %c0_165] : memref<2x64x16xf32, #tpu.memory_space<vmem>>, vector<2x1x16xf32>
    %190 = vector.shape_cast %189 : vector<2x1x16xf32> to vector<2x16xf32>
    %cst_166 = arith.constant dense<0.000000e+00> : vector<2x32xf32>
    %191 = tpu.matmul %190, %27, %cst_166 {dimension_numbers = #tpu.dot_dimension_numbers<[1], [0], [0], [1], [0, 0, 1, 1], [], []>} : vector<2x16xf32>, vector<16x32xf32>, vector<2x32xf32> -> vector<2x32xf32>
    %192 = arith.addf %188, %191 : vector<2x32xf32>
    %c0_167 = arith.constant 0 : index
    %c7 = arith.constant 7 : index
    %c0_168 = arith.constant 0 : index
    %193 = vector.load %arg13[%c0_167, %c7, %c0_168] : memref<2x64x16xf32, #tpu.memory_space<vmem>>, vector<2x1x16xf32>
    %194 = vector.shape_cast %193 : vector<2x1x16xf32> to vector<2x16xf32>
    %cst_169 = arith.constant dense<0.000000e+00> : vector<2x32xf32>
    %195 = tpu.matmul %194, %28, %cst_169 {dimension_numbers = #tpu.dot_dimension_numbers<[1], [0], [0], [1], [0, 0, 1, 1], [], []>} : vector<2x16xf32>, vector<16x32xf32>, vector<2x32xf32> -> vector<2x32xf32>
    %196 = arith.addf %192, %195 : vector<2x32xf32>
    %c0_170 = arith.constant 0 : index
    %c12_171 = arith.constant 12 : index
    %c0_172 = arith.constant 0 : index
    %197 = vector.load %arg13[%c0_170, %c12_171, %c0_172] : memref<2x64x16xf32, #tpu.memory_space<vmem>>, vector<2x1x16xf32>
    %198 = vector.shape_cast %197 : vector<2x1x16xf32> to vector<2x16xf32>
    %cst_173 = arith.constant dense<0.000000e+00> : vector<2x32xf32>
    %199 = tpu.matmul %198, %29, %cst_173 {dimension_numbers = #tpu.dot_dimension_numbers<[1], [0], [0], [1], [0, 0, 1, 1], [], []>} : vector<2x16xf32>, vector<16x32xf32>, vector<2x32xf32> -> vector<2x32xf32>
    %200 = arith.addf %196, %199 : vector<2x32xf32>
    %c0_174 = arith.constant 0 : index
    %c13_175 = arith.constant 13 : index
    %c0_176 = arith.constant 0 : index
    %201 = vector.load %arg13[%c0_174, %c13_175, %c0_176] : memref<2x64x16xf32, #tpu.memory_space<vmem>>, vector<2x1x16xf32>
    %202 = vector.shape_cast %201 : vector<2x1x16xf32> to vector<2x16xf32>
    %cst_177 = arith.constant dense<0.000000e+00> : vector<2x32xf32>
    %203 = tpu.matmul %202, %30, %cst_177 {dimension_numbers = #tpu.dot_dimension_numbers<[1], [0], [0], [1], [0, 0, 1, 1], [], []>} : vector<2x16xf32>, vector<16x32xf32>, vector<2x32xf32> -> vector<2x32xf32>
    %204 = arith.addf %200, %203 : vector<2x32xf32>
    %c0_178 = arith.constant 0 : index
    %c14 = arith.constant 14 : index
    %c0_179 = arith.constant 0 : index
    %205 = vector.load %arg13[%c0_178, %c14, %c0_179] : memref<2x64x16xf32, #tpu.memory_space<vmem>>, vector<2x1x16xf32>
    %206 = vector.shape_cast %205 : vector<2x1x16xf32> to vector<2x16xf32>
    %cst_180 = arith.constant dense<0.000000e+00> : vector<2x32xf32>
    %207 = tpu.matmul %206, %31, %cst_180 {dimension_numbers = #tpu.dot_dimension_numbers<[1], [0], [0], [1], [0, 0, 1, 1], [], []>} : vector<2x16xf32>, vector<16x32xf32>, vector<2x32xf32> -> vector<2x32xf32>
    %208 = arith.addf %204, %207 : vector<2x32xf32>
    %c0_181 = arith.constant 0 : index
    %c15 = arith.constant 15 : index
    %c0_182 = arith.constant 0 : index
    %209 = vector.load %arg13[%c0_181, %c15, %c0_182] : memref<2x64x16xf32, #tpu.memory_space<vmem>>, vector<2x1x16xf32>
    %210 = vector.shape_cast %209 : vector<2x1x16xf32> to vector<2x16xf32>
    %cst_183 = arith.constant dense<0.000000e+00> : vector<2x32xf32>
    %211 = tpu.matmul %210, %32, %cst_183 {dimension_numbers = #tpu.dot_dimension_numbers<[1], [0], [0], [1], [0, 0, 1, 1], [], []>} : vector<2x16xf32>, vector<16x32xf32>, vector<2x32xf32> -> vector<2x32xf32>
    %212 = arith.addf %208, %211 : vector<2x32xf32>
    %c0_184 = arith.constant 0 : index
    %c20_185 = arith.constant 20 : index
    %c0_186 = arith.constant 0 : index
    %213 = vector.load %arg13[%c0_184, %c20_185, %c0_186] : memref<2x64x16xf32, #tpu.memory_space<vmem>>, vector<2x1x16xf32>
    %214 = vector.shape_cast %213 : vector<2x1x16xf32> to vector<2x16xf32>
    %cst_187 = arith.constant dense<0.000000e+00> : vector<2x32xf32>
    %215 = tpu.matmul %214, %33, %cst_187 {dimension_numbers = #tpu.dot_dimension_numbers<[1], [0], [0], [1], [0, 0, 1, 1], [], []>} : vector<2x16xf32>, vector<16x32xf32>, vector<2x32xf32> -> vector<2x32xf32>
    %216 = arith.addf %212, %215 : vector<2x32xf32>
    %c0_188 = arith.constant 0 : index
    %c21_189 = arith.constant 21 : index
    %c0_190 = arith.constant 0 : index
    %217 = vector.load %arg13[%c0_188, %c21_189, %c0_190] : memref<2x64x16xf32, #tpu.memory_space<vmem>>, vector<2x1x16xf32>
    %218 = vector.shape_cast %217 : vector<2x1x16xf32> to vector<2x16xf32>
    %cst_191 = arith.constant dense<0.000000e+00> : vector<2x32xf32>
    %219 = tpu.matmul %218, %34, %cst_191 {dimension_numbers = #tpu.dot_dimension_numbers<[1], [0], [0], [1], [0, 0, 1, 1], [], []>} : vector<2x16xf32>, vector<16x32xf32>, vector<2x32xf32> -> vector<2x32xf32>
    %220 = arith.addf %216, %219 : vector<2x32xf32>
    %c0_192 = arith.constant 0 : index
    %c22 = arith.constant 22 : index
    %c0_193 = arith.constant 0 : index
    %221 = vector.load %arg13[%c0_192, %c22, %c0_193] : memref<2x64x16xf32, #tpu.memory_space<vmem>>, vector<2x1x16xf32>
    %222 = vector.shape_cast %221 : vector<2x1x16xf32> to vector<2x16xf32>
    %cst_194 = arith.constant dense<0.000000e+00> : vector<2x32xf32>
    %223 = tpu.matmul %222, %35, %cst_194 {dimension_numbers = #tpu.dot_dimension_numbers<[1], [0], [0], [1], [0, 0, 1, 1], [], []>} : vector<2x16xf32>, vector<16x32xf32>, vector<2x32xf32> -> vector<2x32xf32>
    %224 = arith.addf %220, %223 : vector<2x32xf32>
    %c0_195 = arith.constant 0 : index
    %c23 = arith.constant 23 : index
    %c0_196 = arith.constant 0 : index
    %225 = vector.load %arg13[%c0_195, %c23, %c0_196] : memref<2x64x16xf32, #tpu.memory_space<vmem>>, vector<2x1x16xf32>
    %226 = vector.shape_cast %225 : vector<2x1x16xf32> to vector<2x16xf32>
    %cst_197 = arith.constant dense<0.000000e+00> : vector<2x32xf32>
    %227 = tpu.matmul %226, %36, %cst_197 {dimension_numbers = #tpu.dot_dimension_numbers<[1], [0], [0], [1], [0, 0, 1, 1], [], []>} : vector<2x16xf32>, vector<16x32xf32>, vector<2x32xf32> -> vector<2x32xf32>
    %228 = arith.addf %224, %227 : vector<2x32xf32>
    %c0_198 = arith.constant 0 : index
    %c28_199 = arith.constant 28 : index
    %c0_200 = arith.constant 0 : index
    %229 = vector.load %arg13[%c0_198, %c28_199, %c0_200] : memref<2x64x16xf32, #tpu.memory_space<vmem>>, vector<2x1x16xf32>
    %230 = vector.shape_cast %229 : vector<2x1x16xf32> to vector<2x16xf32>
    %cst_201 = arith.constant dense<0.000000e+00> : vector<2x32xf32>
    %231 = tpu.matmul %230, %37, %cst_201 {dimension_numbers = #tpu.dot_dimension_numbers<[1], [0], [0], [1], [0, 0, 1, 1], [], []>} : vector<2x16xf32>, vector<16x32xf32>, vector<2x32xf32> -> vector<2x32xf32>
    %232 = arith.addf %228, %231 : vector<2x32xf32>
    %c0_202 = arith.constant 0 : index
    %c29_203 = arith.constant 29 : index
    %c0_204 = arith.constant 0 : index
    %233 = vector.load %arg13[%c0_202, %c29_203, %c0_204] : memref<2x64x16xf32, #tpu.memory_space<vmem>>, vector<2x1x16xf32>
    %234 = vector.shape_cast %233 : vector<2x1x16xf32> to vector<2x16xf32>
    %cst_205 = arith.constant dense<0.000000e+00> : vector<2x32xf32>
    %235 = tpu.matmul %234, %38, %cst_205 {dimension_numbers = #tpu.dot_dimension_numbers<[1], [0], [0], [1], [0, 0, 1, 1], [], []>} : vector<2x16xf32>, vector<16x32xf32>, vector<2x32xf32> -> vector<2x32xf32>
    %236 = arith.addf %232, %235 : vector<2x32xf32>
    %c0_206 = arith.constant 0 : index
    %c30 = arith.constant 30 : index
    %c0_207 = arith.constant 0 : index
    %237 = vector.load %arg13[%c0_206, %c30, %c0_207] : memref<2x64x16xf32, #tpu.memory_space<vmem>>, vector<2x1x16xf32>
    %238 = vector.shape_cast %237 : vector<2x1x16xf32> to vector<2x16xf32>
    %cst_208 = arith.constant dense<0.000000e+00> : vector<2x32xf32>
    %239 = tpu.matmul %238, %39, %cst_208 {dimension_numbers = #tpu.dot_dimension_numbers<[1], [0], [0], [1], [0, 0, 1, 1], [], []>} : vector<2x16xf32>, vector<16x32xf32>, vector<2x32xf32> -> vector<2x32xf32>
    %240 = arith.addf %236, %239 : vector<2x32xf32>
    %c0_209 = arith.constant 0 : index
    %c31 = arith.constant 31 : index
    %c0_210 = arith.constant 0 : index
    %241 = vector.load %arg13[%c0_209, %c31, %c0_210] : memref<2x64x16xf32, #tpu.memory_space<vmem>>, vector<2x1x16xf32>
    %242 = vector.shape_cast %241 : vector<2x1x16xf32> to vector<2x16xf32>
    %cst_211 = arith.constant dense<0.000000e+00> : vector<2x32xf32>
    %243 = tpu.matmul %242, %40, %cst_211 {dimension_numbers = #tpu.dot_dimension_numbers<[1], [0], [0], [1], [0, 0, 1, 1], [], []>} : vector<2x16xf32>, vector<16x32xf32>, vector<2x32xf32> -> vector<2x32xf32>
    %244 = arith.addf %240, %243 : vector<2x32xf32>
    %245 = vector.broadcast %41 : vector<1x32xf32> to vector<2x32xf32>
    %246 = arith.addf %244, %245 : vector<2x32xf32>
    %cst_212 = arith.constant 0.000000e+00 : f32
    %247 = vector.broadcast %cst_212 : f32 to vector<2x32xf32>
    %248 = arith.maximumf %246, %247 : vector<2x32xf32>
    %c64_213 = arith.constant 64 : index
    %c0_214 = arith.constant 0 : index
    %249 = vector.load %arg7[%c64_213, %c0_214] : memref<288x64xf32, #tpu.memory_space<vmem>>, vector<32x64xf32>
    %cst_215 = arith.constant dense<0.000000e+00> : vector<2x64xf32>
    %250 = tpu.matmul %248, %249, %cst_215 {dimension_numbers = #tpu.dot_dimension_numbers<[1], [0], [0], [1], [0, 0, 1, 1], [], []>} : vector<2x32xf32>, vector<32x64xf32>, vector<2x64xf32> -> vector<2x64xf32>
    %251 = arith.addf %181, %250 : vector<2x64xf32>
    %c0_216 = arith.constant 0 : index
    %c16_217 = arith.constant 16 : index
    %c0_218 = arith.constant 0 : index
    %252 = vector.load %arg13[%c0_216, %c16_217, %c0_218] : memref<2x64x16xf32, #tpu.memory_space<vmem>>, vector<2x1x16xf32>
    %253 = vector.shape_cast %252 : vector<2x1x16xf32> to vector<2x16xf32>
    %cst_219 = arith.constant dense<0.000000e+00> : vector<2x32xf32>
    %254 = tpu.matmul %253, %25, %cst_219 {dimension_numbers = #tpu.dot_dimension_numbers<[1], [0], [0], [1], [0, 0, 1, 1], [], []>} : vector<2x16xf32>, vector<16x32xf32>, vector<2x32xf32> -> vector<2x32xf32>
    %c0_220 = arith.constant 0 : index
    %c17_221 = arith.constant 17 : index
    %c0_222 = arith.constant 0 : index
    %255 = vector.load %arg13[%c0_220, %c17_221, %c0_222] : memref<2x64x16xf32, #tpu.memory_space<vmem>>, vector<2x1x16xf32>
    %256 = vector.shape_cast %255 : vector<2x1x16xf32> to vector<2x16xf32>
    %cst_223 = arith.constant dense<0.000000e+00> : vector<2x32xf32>
    %257 = tpu.matmul %256, %26, %cst_223 {dimension_numbers = #tpu.dot_dimension_numbers<[1], [0], [0], [1], [0, 0, 1, 1], [], []>} : vector<2x16xf32>, vector<16x32xf32>, vector<2x32xf32> -> vector<2x32xf32>
    %258 = arith.addf %254, %257 : vector<2x32xf32>
    %c0_224 = arith.constant 0 : index
    %c18_225 = arith.constant 18 : index
    %c0_226 = arith.constant 0 : index
    %259 = vector.load %arg13[%c0_224, %c18_225, %c0_226] : memref<2x64x16xf32, #tpu.memory_space<vmem>>, vector<2x1x16xf32>
    %260 = vector.shape_cast %259 : vector<2x1x16xf32> to vector<2x16xf32>
    %cst_227 = arith.constant dense<0.000000e+00> : vector<2x32xf32>
    %261 = tpu.matmul %260, %27, %cst_227 {dimension_numbers = #tpu.dot_dimension_numbers<[1], [0], [0], [1], [0, 0, 1, 1], [], []>} : vector<2x16xf32>, vector<16x32xf32>, vector<2x32xf32> -> vector<2x32xf32>
    %262 = arith.addf %258, %261 : vector<2x32xf32>
    %c0_228 = arith.constant 0 : index
    %c19_229 = arith.constant 19 : index
    %c0_230 = arith.constant 0 : index
    %263 = vector.load %arg13[%c0_228, %c19_229, %c0_230] : memref<2x64x16xf32, #tpu.memory_space<vmem>>, vector<2x1x16xf32>
    %264 = vector.shape_cast %263 : vector<2x1x16xf32> to vector<2x16xf32>
    %cst_231 = arith.constant dense<0.000000e+00> : vector<2x32xf32>
    %265 = tpu.matmul %264, %28, %cst_231 {dimension_numbers = #tpu.dot_dimension_numbers<[1], [0], [0], [1], [0, 0, 1, 1], [], []>} : vector<2x16xf32>, vector<16x32xf32>, vector<2x32xf32> -> vector<2x32xf32>
    %266 = arith.addf %262, %265 : vector<2x32xf32>
    %c0_232 = arith.constant 0 : index
    %c24_233 = arith.constant 24 : index
    %c0_234 = arith.constant 0 : index
    %267 = vector.load %arg13[%c0_232, %c24_233, %c0_234] : memref<2x64x16xf32, #tpu.memory_space<vmem>>, vector<2x1x16xf32>
    %268 = vector.shape_cast %267 : vector<2x1x16xf32> to vector<2x16xf32>
    %cst_235 = arith.constant dense<0.000000e+00> : vector<2x32xf32>
    %269 = tpu.matmul %268, %29, %cst_235 {dimension_numbers = #tpu.dot_dimension_numbers<[1], [0], [0], [1], [0, 0, 1, 1], [], []>} : vector<2x16xf32>, vector<16x32xf32>, vector<2x32xf32> -> vector<2x32xf32>
    %270 = arith.addf %266, %269 : vector<2x32xf32>
    %c0_236 = arith.constant 0 : index
    %c25_237 = arith.constant 25 : index
    %c0_238 = arith.constant 0 : index
    %271 = vector.load %arg13[%c0_236, %c25_237, %c0_238] : memref<2x64x16xf32, #tpu.memory_space<vmem>>, vector<2x1x16xf32>
    %272 = vector.shape_cast %271 : vector<2x1x16xf32> to vector<2x16xf32>
    %cst_239 = arith.constant dense<0.000000e+00> : vector<2x32xf32>
    %273 = tpu.matmul %272, %30, %cst_239 {dimension_numbers = #tpu.dot_dimension_numbers<[1], [0], [0], [1], [0, 0, 1, 1], [], []>} : vector<2x16xf32>, vector<16x32xf32>, vector<2x32xf32> -> vector<2x32xf32>
    %274 = arith.addf %270, %273 : vector<2x32xf32>
    %c0_240 = arith.constant 0 : index
    %c26_241 = arith.constant 26 : index
    %c0_242 = arith.constant 0 : index
    %275 = vector.load %arg13[%c0_240, %c26_241, %c0_242] : memref<2x64x16xf32, #tpu.memory_space<vmem>>, vector<2x1x16xf32>
    %276 = vector.shape_cast %275 : vector<2x1x16xf32> to vector<2x16xf32>
    %cst_243 = arith.constant dense<0.000000e+00> : vector<2x32xf32>
    %277 = tpu.matmul %276, %31, %cst_243 {dimension_numbers = #tpu.dot_dimension_numbers<[1], [0], [0], [1], [0, 0, 1, 1], [], []>} : vector<2x16xf32>, vector<16x32xf32>, vector<2x32xf32> -> vector<2x32xf32>
    %278 = arith.addf %274, %277 : vector<2x32xf32>
    %c0_244 = arith.constant 0 : index
    %c27_245 = arith.constant 27 : index
    %c0_246 = arith.constant 0 : index
    %279 = vector.load %arg13[%c0_244, %c27_245, %c0_246] : memref<2x64x16xf32, #tpu.memory_space<vmem>>, vector<2x1x16xf32>
    %280 = vector.shape_cast %279 : vector<2x1x16xf32> to vector<2x16xf32>
    %cst_247 = arith.constant dense<0.000000e+00> : vector<2x32xf32>
    %281 = tpu.matmul %280, %32, %cst_247 {dimension_numbers = #tpu.dot_dimension_numbers<[1], [0], [0], [1], [0, 0, 1, 1], [], []>} : vector<2x16xf32>, vector<16x32xf32>, vector<2x32xf32> -> vector<2x32xf32>
    %282 = arith.addf %278, %281 : vector<2x32xf32>
    %c0_248 = arith.constant 0 : index
    %c32_249 = arith.constant 32 : index
    %c0_250 = arith.constant 0 : index
    %283 = vector.load %arg13[%c0_248, %c32_249, %c0_250] : memref<2x64x16xf32, #tpu.memory_space<vmem>>, vector<2x1x16xf32>
    %284 = vector.shape_cast %283 : vector<2x1x16xf32> to vector<2x16xf32>
    %cst_251 = arith.constant dense<0.000000e+00> : vector<2x32xf32>
    %285 = tpu.matmul %284, %33, %cst_251 {dimension_numbers = #tpu.dot_dimension_numbers<[1], [0], [0], [1], [0, 0, 1, 1], [], []>} : vector<2x16xf32>, vector<16x32xf32>, vector<2x32xf32> -> vector<2x32xf32>
    %286 = arith.addf %282, %285 : vector<2x32xf32>
    %c0_252 = arith.constant 0 : index
    %c33 = arith.constant 33 : index
    %c0_253 = arith.constant 0 : index
    %287 = vector.load %arg13[%c0_252, %c33, %c0_253] : memref<2x64x16xf32, #tpu.memory_space<vmem>>, vector<2x1x16xf32>
    %288 = vector.shape_cast %287 : vector<2x1x16xf32> to vector<2x16xf32>
    %cst_254 = arith.constant dense<0.000000e+00> : vector<2x32xf32>
    %289 = tpu.matmul %288, %34, %cst_254 {dimension_numbers = #tpu.dot_dimension_numbers<[1], [0], [0], [1], [0, 0, 1, 1], [], []>} : vector<2x16xf32>, vector<16x32xf32>, vector<2x32xf32> -> vector<2x32xf32>
    %290 = arith.addf %286, %289 : vector<2x32xf32>
    %c0_255 = arith.constant 0 : index
    %c34 = arith.constant 34 : index
    %c0_256 = arith.constant 0 : index
    %291 = vector.load %arg13[%c0_255, %c34, %c0_256] : memref<2x64x16xf32, #tpu.memory_space<vmem>>, vector<2x1x16xf32>
    %292 = vector.shape_cast %291 : vector<2x1x16xf32> to vector<2x16xf32>
    %cst_257 = arith.constant dense<0.000000e+00> : vector<2x32xf32>
    %293 = tpu.matmul %292, %35, %cst_257 {dimension_numbers = #tpu.dot_dimension_numbers<[1], [0], [0], [1], [0, 0, 1, 1], [], []>} : vector<2x16xf32>, vector<16x32xf32>, vector<2x32xf32> -> vector<2x32xf32>
    %294 = arith.addf %290, %293 : vector<2x32xf32>
    %c0_258 = arith.constant 0 : index
    %c35 = arith.constant 35 : index
    %c0_259 = arith.constant 0 : index
    %295 = vector.load %arg13[%c0_258, %c35, %c0_259] : memref<2x64x16xf32, #tpu.memory_space<vmem>>, vector<2x1x16xf32>
    %296 = vector.shape_cast %295 : vector<2x1x16xf32> to vector<2x16xf32>
    %cst_260 = arith.constant dense<0.000000e+00> : vector<2x32xf32>
    %297 = tpu.matmul %296, %36, %cst_260 {dimension_numbers = #tpu.dot_dimension_numbers<[1], [0], [0], [1], [0, 0, 1, 1], [], []>} : vector<2x16xf32>, vector<16x32xf32>, vector<2x32xf32> -> vector<2x32xf32>
    %298 = arith.addf %294, %297 : vector<2x32xf32>
    %c0_261 = arith.constant 0 : index
    %c40 = arith.constant 40 : index
    %c0_262 = arith.constant 0 : index
    %299 = vector.load %arg13[%c0_261, %c40, %c0_262] : memref<2x64x16xf32, #tpu.memory_space<vmem>>, vector<2x1x16xf32>
    %300 = vector.shape_cast %299 : vector<2x1x16xf32> to vector<2x16xf32>
    %cst_263 = arith.constant dense<0.000000e+00> : vector<2x32xf32>
    %301 = tpu.matmul %300, %37, %cst_263 {dimension_numbers = #tpu.dot_dimension_numbers<[1], [0], [0], [1], [0, 0, 1, 1], [], []>} : vector<2x16xf32>, vector<16x32xf32>, vector<2x32xf32> -> vector<2x32xf32>
    %302 = arith.addf %298, %301 : vector<2x32xf32>
    %c0_264 = arith.constant 0 : index
    %c41 = arith.constant 41 : index
    %c0_265 = arith.constant 0 : index
    %303 = vector.load %arg13[%c0_264, %c41, %c0_265] : memref<2x64x16xf32, #tpu.memory_space<vmem>>, vector<2x1x16xf32>
    %304 = vector.shape_cast %303 : vector<2x1x16xf32> to vector<2x16xf32>
    %cst_266 = arith.constant dense<0.000000e+00> : vector<2x32xf32>
    %305 = tpu.matmul %304, %38, %cst_266 {dimension_numbers = #tpu.dot_dimension_numbers<[1], [0], [0], [1], [0, 0, 1, 1], [], []>} : vector<2x16xf32>, vector<16x32xf32>, vector<2x32xf32> -> vector<2x32xf32>
    %306 = arith.addf %302, %305 : vector<2x32xf32>
    %c0_267 = arith.constant 0 : index
    %c42 = arith.constant 42 : index
    %c0_268 = arith.constant 0 : index
    %307 = vector.load %arg13[%c0_267, %c42, %c0_268] : memref<2x64x16xf32, #tpu.memory_space<vmem>>, vector<2x1x16xf32>
    %308 = vector.shape_cast %307 : vector<2x1x16xf32> to vector<2x16xf32>
    %cst_269 = arith.constant dense<0.000000e+00> : vector<2x32xf32>
    %309 = tpu.matmul %308, %39, %cst_269 {dimension_numbers = #tpu.dot_dimension_numbers<[1], [0], [0], [1], [0, 0, 1, 1], [], []>} : vector<2x16xf32>, vector<16x32xf32>, vector<2x32xf32> -> vector<2x32xf32>
    %310 = arith.addf %306, %309 : vector<2x32xf32>
    %c0_270 = arith.constant 0 : index
    %c43 = arith.constant 43 : index
    %c0_271 = arith.constant 0 : index
    %311 = vector.load %arg13[%c0_270, %c43, %c0_271] : memref<2x64x16xf32, #tpu.memory_space<vmem>>, vector<2x1x16xf32>
    %312 = vector.shape_cast %311 : vector<2x1x16xf32> to vector<2x16xf32>
    %cst_272 = arith.constant dense<0.000000e+00> : vector<2x32xf32>
    %313 = tpu.matmul %312, %40, %cst_272 {dimension_numbers = #tpu.dot_dimension_numbers<[1], [0], [0], [1], [0, 0, 1, 1], [], []>} : vector<2x16xf32>, vector<16x32xf32>, vector<2x32xf32> -> vector<2x32xf32>
    %314 = arith.addf %310, %313 : vector<2x32xf32>
    %315 = vector.broadcast %41 : vector<1x32xf32> to vector<2x32xf32>
    %316 = arith.addf %314, %315 : vector<2x32xf32>
    %cst_273 = arith.constant 0.000000e+00 : f32
    %317 = vector.broadcast %cst_273 : f32 to vector<2x32xf32>
    %318 = arith.maximumf %316, %317 : vector<2x32xf32>
    %c96_274 = arith.constant 96 : index
    %c0_275 = arith.constant 0 : index
    %319 = vector.load %arg7[%c96_274, %c0_275] : memref<288x64xf32, #tpu.memory_space<vmem>>, vector<32x64xf32>
    %cst_276 = arith.constant dense<0.000000e+00> : vector<2x64xf32>
    %320 = tpu.matmul %318, %319, %cst_276 {dimension_numbers = #tpu.dot_dimension_numbers<[1], [0], [0], [1], [0, 0, 1, 1], [], []>} : vector<2x32xf32>, vector<32x64xf32>, vector<2x64xf32> -> vector<2x64xf32>
    %321 = arith.addf %251, %320 : vector<2x64xf32>
    %c0_277 = arith.constant 0 : index
    %c18_278 = arith.constant 18 : index
    %c0_279 = arith.constant 0 : index
    %322 = vector.load %arg13[%c0_277, %c18_278, %c0_279] : memref<2x64x16xf32, #tpu.memory_space<vmem>>, vector<2x1x16xf32>
    %323 = vector.shape_cast %322 : vector<2x1x16xf32> to vector<2x16xf32>
    %cst_280 = arith.constant dense<0.000000e+00> : vector<2x32xf32>
    %324 = tpu.matmul %323, %25, %cst_280 {dimension_numbers = #tpu.dot_dimension_numbers<[1], [0], [0], [1], [0, 0, 1, 1], [], []>} : vector<2x16xf32>, vector<16x32xf32>, vector<2x32xf32> -> vector<2x32xf32>
    %c0_281 = arith.constant 0 : index
    %c19_282 = arith.constant 19 : index
    %c0_283 = arith.constant 0 : index
    %325 = vector.load %arg13[%c0_281, %c19_282, %c0_283] : memref<2x64x16xf32, #tpu.memory_space<vmem>>, vector<2x1x16xf32>
    %326 = vector.shape_cast %325 : vector<2x1x16xf32> to vector<2x16xf32>
    %cst_284 = arith.constant dense<0.000000e+00> : vector<2x32xf32>
    %327 = tpu.matmul %326, %26, %cst_284 {dimension_numbers = #tpu.dot_dimension_numbers<[1], [0], [0], [1], [0, 0, 1, 1], [], []>} : vector<2x16xf32>, vector<16x32xf32>, vector<2x32xf32> -> vector<2x32xf32>
    %328 = arith.addf %324, %327 : vector<2x32xf32>
    %c0_285 = arith.constant 0 : index
    %c20_286 = arith.constant 20 : index
    %c0_287 = arith.constant 0 : index
    %329 = vector.load %arg13[%c0_285, %c20_286, %c0_287] : memref<2x64x16xf32, #tpu.memory_space<vmem>>, vector<2x1x16xf32>
    %330 = vector.shape_cast %329 : vector<2x1x16xf32> to vector<2x16xf32>
    %cst_288 = arith.constant dense<0.000000e+00> : vector<2x32xf32>
    %331 = tpu.matmul %330, %27, %cst_288 {dimension_numbers = #tpu.dot_dimension_numbers<[1], [0], [0], [1], [0, 0, 1, 1], [], []>} : vector<2x16xf32>, vector<16x32xf32>, vector<2x32xf32> -> vector<2x32xf32>
    %332 = arith.addf %328, %331 : vector<2x32xf32>
    %c0_289 = arith.constant 0 : index
    %c21_290 = arith.constant 21 : index
    %c0_291 = arith.constant 0 : index
    %333 = vector.load %arg13[%c0_289, %c21_290, %c0_291] : memref<2x64x16xf32, #tpu.memory_space<vmem>>, vector<2x1x16xf32>
    %334 = vector.shape_cast %333 : vector<2x1x16xf32> to vector<2x16xf32>
    %cst_292 = arith.constant dense<0.000000e+00> : vector<2x32xf32>
    %335 = tpu.matmul %334, %28, %cst_292 {dimension_numbers = #tpu.dot_dimension_numbers<[1], [0], [0], [1], [0, 0, 1, 1], [], []>} : vector<2x16xf32>, vector<16x32xf32>, vector<2x32xf32> -> vector<2x32xf32>
    %336 = arith.addf %332, %335 : vector<2x32xf32>
    %c0_293 = arith.constant 0 : index
    %c26_294 = arith.constant 26 : index
    %c0_295 = arith.constant 0 : index
    %337 = vector.load %arg13[%c0_293, %c26_294, %c0_295] : memref<2x64x16xf32, #tpu.memory_space<vmem>>, vector<2x1x16xf32>
    %338 = vector.shape_cast %337 : vector<2x1x16xf32> to vector<2x16xf32>
    %cst_296 = arith.constant dense<0.000000e+00> : vector<2x32xf32>
    %339 = tpu.matmul %338, %29, %cst_296 {dimension_numbers = #tpu.dot_dimension_numbers<[1], [0], [0], [1], [0, 0, 1, 1], [], []>} : vector<2x16xf32>, vector<16x32xf32>, vector<2x32xf32> -> vector<2x32xf32>
    %340 = arith.addf %336, %339 : vector<2x32xf32>
    %c0_297 = arith.constant 0 : index
    %c27_298 = arith.constant 27 : index
    %c0_299 = arith.constant 0 : index
    %341 = vector.load %arg13[%c0_297, %c27_298, %c0_299] : memref<2x64x16xf32, #tpu.memory_space<vmem>>, vector<2x1x16xf32>
    %342 = vector.shape_cast %341 : vector<2x1x16xf32> to vector<2x16xf32>
    %cst_300 = arith.constant dense<0.000000e+00> : vector<2x32xf32>
    %343 = tpu.matmul %342, %30, %cst_300 {dimension_numbers = #tpu.dot_dimension_numbers<[1], [0], [0], [1], [0, 0, 1, 1], [], []>} : vector<2x16xf32>, vector<16x32xf32>, vector<2x32xf32> -> vector<2x32xf32>
    %344 = arith.addf %340, %343 : vector<2x32xf32>
    %c0_301 = arith.constant 0 : index
    %c28_302 = arith.constant 28 : index
    %c0_303 = arith.constant 0 : index
    %345 = vector.load %arg13[%c0_301, %c28_302, %c0_303] : memref<2x64x16xf32, #tpu.memory_space<vmem>>, vector<2x1x16xf32>
    %346 = vector.shape_cast %345 : vector<2x1x16xf32> to vector<2x16xf32>
    %cst_304 = arith.constant dense<0.000000e+00> : vector<2x32xf32>
    %347 = tpu.matmul %346, %31, %cst_304 {dimension_numbers = #tpu.dot_dimension_numbers<[1], [0], [0], [1], [0, 0, 1, 1], [], []>} : vector<2x16xf32>, vector<16x32xf32>, vector<2x32xf32> -> vector<2x32xf32>
    %348 = arith.addf %344, %347 : vector<2x32xf32>
    %c0_305 = arith.constant 0 : index
    %c29_306 = arith.constant 29 : index
    %c0_307 = arith.constant 0 : index
    %349 = vector.load %arg13[%c0_305, %c29_306, %c0_307] : memref<2x64x16xf32, #tpu.memory_space<vmem>>, vector<2x1x16xf32>
    %350 = vector.shape_cast %349 : vector<2x1x16xf32> to vector<2x16xf32>
    %cst_308 = arith.constant dense<0.000000e+00> : vector<2x32xf32>
    %351 = tpu.matmul %350, %32, %cst_308 {dimension_numbers = #tpu.dot_dimension_numbers<[1], [0], [0], [1], [0, 0, 1, 1], [], []>} : vector<2x16xf32>, vector<16x32xf32>, vector<2x32xf32> -> vector<2x32xf32>
    %352 = arith.addf %348, %351 : vector<2x32xf32>
    %c0_309 = arith.constant 0 : index
    %c34_310 = arith.constant 34 : index
    %c0_311 = arith.constant 0 : index
    %353 = vector.load %arg13[%c0_309, %c34_310, %c0_311] : memref<2x64x16xf32, #tpu.memory_space<vmem>>, vector<2x1x16xf32>
    %354 = vector.shape_cast %353 : vector<2x1x16xf32> to vector<2x16xf32>
    %cst_312 = arith.constant dense<0.000000e+00> : vector<2x32xf32>
    %355 = tpu.matmul %354, %33, %cst_312 {dimension_numbers = #tpu.dot_dimension_numbers<[1], [0], [0], [1], [0, 0, 1, 1], [], []>} : vector<2x16xf32>, vector<16x32xf32>, vector<2x32xf32> -> vector<2x32xf32>
    %356 = arith.addf %352, %355 : vector<2x32xf32>
    %c0_313 = arith.constant 0 : index
    %c35_314 = arith.constant 35 : index
    %c0_315 = arith.constant 0 : index
    %357 = vector.load %arg13[%c0_313, %c35_314, %c0_315] : memref<2x64x16xf32, #tpu.memory_space<vmem>>, vector<2x1x16xf32>
    %358 = vector.shape_cast %357 : vector<2x1x16xf32> to vector<2x16xf32>
    %cst_316 = arith.constant dense<0.000000e+00> : vector<2x32xf32>
    %359 = tpu.matmul %358, %34, %cst_316 {dimension_numbers = #tpu.dot_dimension_numbers<[1], [0], [0], [1], [0, 0, 1, 1], [], []>} : vector<2x16xf32>, vector<16x32xf32>, vector<2x32xf32> -> vector<2x32xf32>
    %360 = arith.addf %356, %359 : vector<2x32xf32>
    %c0_317 = arith.constant 0 : index
    %c36 = arith.constant 36 : index
    %c0_318 = arith.constant 0 : index
    %361 = vector.load %arg13[%c0_317, %c36, %c0_318] : memref<2x64x16xf32, #tpu.memory_space<vmem>>, vector<2x1x16xf32>
    %362 = vector.shape_cast %361 : vector<2x1x16xf32> to vector<2x16xf32>
    %cst_319 = arith.constant dense<0.000000e+00> : vector<2x32xf32>
    %363 = tpu.matmul %362, %35, %cst_319 {dimension_numbers = #tpu.dot_dimension_numbers<[1], [0], [0], [1], [0, 0, 1, 1], [], []>} : vector<2x16xf32>, vector<16x32xf32>, vector<2x32xf32> -> vector<2x32xf32>
    %364 = arith.addf %360, %363 : vector<2x32xf32>
    %c0_320 = arith.constant 0 : index
    %c37 = arith.constant 37 : index
    %c0_321 = arith.constant 0 : index
    %365 = vector.load %arg13[%c0_320, %c37, %c0_321] : memref<2x64x16xf32, #tpu.memory_space<vmem>>, vector<2x1x16xf32>
    %366 = vector.shape_cast %365 : vector<2x1x16xf32> to vector<2x16xf32>
    %cst_322 = arith.constant dense<0.000000e+00> : vector<2x32xf32>
    %367 = tpu.matmul %366, %36, %cst_322 {dimension_numbers = #tpu.dot_dimension_numbers<[1], [0], [0], [1], [0, 0, 1, 1], [], []>} : vector<2x16xf32>, vector<16x32xf32>, vector<2x32xf32> -> vector<2x32xf32>
    %368 = arith.addf %364, %367 : vector<2x32xf32>
    %c0_323 = arith.constant 0 : index
    %c42_324 = arith.constant 42 : index
    %c0_325 = arith.constant 0 : index
    %369 = vector.load %arg13[%c0_323, %c42_324, %c0_325] : memref<2x64x16xf32, #tpu.memory_space<vmem>>, vector<2x1x16xf32>
    %370 = vector.shape_cast %369 : vector<2x1x16xf32> to vector<2x16xf32>
    %cst_326 = arith.constant dense<0.000000e+00> : vector<2x32xf32>
    %371 = tpu.matmul %370, %37, %cst_326 {dimension_numbers = #tpu.dot_dimension_numbers<[1], [0], [0], [1], [0, 0, 1, 1], [], []>} : vector<2x16xf32>, vector<16x32xf32>, vector<2x32xf32> -> vector<2x32xf32>
    %372 = arith.addf %368, %371 : vector<2x32xf32>
    %c0_327 = arith.constant 0 : index
    %c43_328 = arith.constant 43 : index
    %c0_329 = arith.constant 0 : index
    %373 = vector.load %arg13[%c0_327, %c43_328, %c0_329] : memref<2x64x16xf32, #tpu.memory_space<vmem>>, vector<2x1x16xf32>
    %374 = vector.shape_cast %373 : vector<2x1x16xf32> to vector<2x16xf32>
    %cst_330 = arith.constant dense<0.000000e+00> : vector<2x32xf32>
    %375 = tpu.matmul %374, %38, %cst_330 {dimension_numbers = #tpu.dot_dimension_numbers<[1], [0], [0], [1], [0, 0, 1, 1], [], []>} : vector<2x16xf32>, vector<16x32xf32>, vector<2x32xf32> -> vector<2x32xf32>
    %376 = arith.addf %372, %375 : vector<2x32xf32>
    %c0_331 = arith.constant 0 : index
    %c44 = arith.constant 44 : index
    %c0_332 = arith.constant 0 : index
    %377 = vector.load %arg13[%c0_331, %c44, %c0_332] : memref<2x64x16xf32, #tpu.memory_space<vmem>>, vector<2x1x16xf32>
    %378 = vector.shape_cast %377 : vector<2x1x16xf32> to vector<2x16xf32>
    %cst_333 = arith.constant dense<0.000000e+00> : vector<2x32xf32>
    %379 = tpu.matmul %378, %39, %cst_333 {dimension_numbers = #tpu.dot_dimension_numbers<[1], [0], [0], [1], [0, 0, 1, 1], [], []>} : vector<2x16xf32>, vector<16x32xf32>, vector<2x32xf32> -> vector<2x32xf32>
    %380 = arith.addf %376, %379 : vector<2x32xf32>
    %c0_334 = arith.constant 0 : index
    %c45 = arith.constant 45 : index
    %c0_335 = arith.constant 0 : index
    %381 = vector.load %arg13[%c0_334, %c45, %c0_335] : memref<2x64x16xf32, #tpu.memory_space<vmem>>, vector<2x1x16xf32>
    %382 = vector.shape_cast %381 : vector<2x1x16xf32> to vector<2x16xf32>
    %cst_336 = arith.constant dense<0.000000e+00> : vector<2x32xf32>
    %383 = tpu.matmul %382, %40, %cst_336 {dimension_numbers = #tpu.dot_dimension_numbers<[1], [0], [0], [1], [0, 0, 1, 1], [], []>} : vector<2x16xf32>, vector<16x32xf32>, vector<2x32xf32> -> vector<2x32xf32>
    %384 = arith.addf %380, %383 : vector<2x32xf32>
    %385 = vector.broadcast %41 : vector<1x32xf32> to vector<2x32xf32>
    %386 = arith.addf %384, %385 : vector<2x32xf32>
    %cst_337 = arith.constant 0.000000e+00 : f32
    %387 = vector.broadcast %cst_337 : f32 to vector<2x32xf32>
    %388 = arith.maximumf %386, %387 : vector<2x32xf32>
    %c128_338 = arith.constant 128 : index
    %c0_339 = arith.constant 0 : index
    %389 = vector.load %arg7[%c128_338, %c0_339] : memref<288x64xf32, #tpu.memory_space<vmem>>, vector<32x64xf32>
    %cst_340 = arith.constant dense<0.000000e+00> : vector<2x64xf32>
    %390 = tpu.matmul %388, %389, %cst_340 {dimension_numbers = #tpu.dot_dimension_numbers<[1], [0], [0], [1], [0, 0, 1, 1], [], []>} : vector<2x32xf32>, vector<32x64xf32>, vector<2x64xf32> -> vector<2x64xf32>
    %391 = arith.addf %321, %390 : vector<2x64xf32>
    %c0_341 = arith.constant 0 : index
    %c20_342 = arith.constant 20 : index
    %c0_343 = arith.constant 0 : index
    %392 = vector.load %arg13[%c0_341, %c20_342, %c0_343] : memref<2x64x16xf32, #tpu.memory_space<vmem>>, vector<2x1x16xf32>
    %393 = vector.shape_cast %392 : vector<2x1x16xf32> to vector<2x16xf32>
    %cst_344 = arith.constant dense<0.000000e+00> : vector<2x32xf32>
    %394 = tpu.matmul %393, %25, %cst_344 {dimension_numbers = #tpu.dot_dimension_numbers<[1], [0], [0], [1], [0, 0, 1, 1], [], []>} : vector<2x16xf32>, vector<16x32xf32>, vector<2x32xf32> -> vector<2x32xf32>
    %c0_345 = arith.constant 0 : index
    %c21_346 = arith.constant 21 : index
    %c0_347 = arith.constant 0 : index
    %395 = vector.load %arg13[%c0_345, %c21_346, %c0_347] : memref<2x64x16xf32, #tpu.memory_space<vmem>>, vector<2x1x16xf32>
    %396 = vector.shape_cast %395 : vector<2x1x16xf32> to vector<2x16xf32>
    %cst_348 = arith.constant dense<0.000000e+00> : vector<2x32xf32>
    %397 = tpu.matmul %396, %26, %cst_348 {dimension_numbers = #tpu.dot_dimension_numbers<[1], [0], [0], [1], [0, 0, 1, 1], [], []>} : vector<2x16xf32>, vector<16x32xf32>, vector<2x32xf32> -> vector<2x32xf32>
    %398 = arith.addf %394, %397 : vector<2x32xf32>
    %c0_349 = arith.constant 0 : index
    %c22_350 = arith.constant 22 : index
    %c0_351 = arith.constant 0 : index
    %399 = vector.load %arg13[%c0_349, %c22_350, %c0_351] : memref<2x64x16xf32, #tpu.memory_space<vmem>>, vector<2x1x16xf32>
    %400 = vector.shape_cast %399 : vector<2x1x16xf32> to vector<2x16xf32>
    %cst_352 = arith.constant dense<0.000000e+00> : vector<2x32xf32>
    %401 = tpu.matmul %400, %27, %cst_352 {dimension_numbers = #tpu.dot_dimension_numbers<[1], [0], [0], [1], [0, 0, 1, 1], [], []>} : vector<2x16xf32>, vector<16x32xf32>, vector<2x32xf32> -> vector<2x32xf32>
    %402 = arith.addf %398, %401 : vector<2x32xf32>
    %c0_353 = arith.constant 0 : index
    %c23_354 = arith.constant 23 : index
    %c0_355 = arith.constant 0 : index
    %403 = vector.load %arg13[%c0_353, %c23_354, %c0_355] : memref<2x64x16xf32, #tpu.memory_space<vmem>>, vector<2x1x16xf32>
    %404 = vector.shape_cast %403 : vector<2x1x16xf32> to vector<2x16xf32>
    %cst_356 = arith.constant dense<0.000000e+00> : vector<2x32xf32>
    %405 = tpu.matmul %404, %28, %cst_356 {dimension_numbers = #tpu.dot_dimension_numbers<[1], [0], [0], [1], [0, 0, 1, 1], [], []>} : vector<2x16xf32>, vector<16x32xf32>, vector<2x32xf32> -> vector<2x32xf32>
    %406 = arith.addf %402, %405 : vector<2x32xf32>
    %c0_357 = arith.constant 0 : index
    %c28_358 = arith.constant 28 : index
    %c0_359 = arith.constant 0 : index
    %407 = vector.load %arg13[%c0_357, %c28_358, %c0_359] : memref<2x64x16xf32, #tpu.memory_space<vmem>>, vector<2x1x16xf32>
    %408 = vector.shape_cast %407 : vector<2x1x16xf32> to vector<2x16xf32>
    %cst_360 = arith.constant dense<0.000000e+00> : vector<2x32xf32>
    %409 = tpu.matmul %408, %29, %cst_360 {dimension_numbers = #tpu.dot_dimension_numbers<[1], [0], [0], [1], [0, 0, 1, 1], [], []>} : vector<2x16xf32>, vector<16x32xf32>, vector<2x32xf32> -> vector<2x32xf32>
    %410 = arith.addf %406, %409 : vector<2x32xf32>
    %c0_361 = arith.constant 0 : index
    %c29_362 = arith.constant 29 : index
    %c0_363 = arith.constant 0 : index
    %411 = vector.load %arg13[%c0_361, %c29_362, %c0_363] : memref<2x64x16xf32, #tpu.memory_space<vmem>>, vector<2x1x16xf32>
    %412 = vector.shape_cast %411 : vector<2x1x16xf32> to vector<2x16xf32>
    %cst_364 = arith.constant dense<0.000000e+00> : vector<2x32xf32>
    %413 = tpu.matmul %412, %30, %cst_364 {dimension_numbers = #tpu.dot_dimension_numbers<[1], [0], [0], [1], [0, 0, 1, 1], [], []>} : vector<2x16xf32>, vector<16x32xf32>, vector<2x32xf32> -> vector<2x32xf32>
    %414 = arith.addf %410, %413 : vector<2x32xf32>
    %c0_365 = arith.constant 0 : index
    %c30_366 = arith.constant 30 : index
    %c0_367 = arith.constant 0 : index
    %415 = vector.load %arg13[%c0_365, %c30_366, %c0_367] : memref<2x64x16xf32, #tpu.memory_space<vmem>>, vector<2x1x16xf32>
    %416 = vector.shape_cast %415 : vector<2x1x16xf32> to vector<2x16xf32>
    %cst_368 = arith.constant dense<0.000000e+00> : vector<2x32xf32>
    %417 = tpu.matmul %416, %31, %cst_368 {dimension_numbers = #tpu.dot_dimension_numbers<[1], [0], [0], [1], [0, 0, 1, 1], [], []>} : vector<2x16xf32>, vector<16x32xf32>, vector<2x32xf32> -> vector<2x32xf32>
    %418 = arith.addf %414, %417 : vector<2x32xf32>
    %c0_369 = arith.constant 0 : index
    %c31_370 = arith.constant 31 : index
    %c0_371 = arith.constant 0 : index
    %419 = vector.load %arg13[%c0_369, %c31_370, %c0_371] : memref<2x64x16xf32, #tpu.memory_space<vmem>>, vector<2x1x16xf32>
    %420 = vector.shape_cast %419 : vector<2x1x16xf32> to vector<2x16xf32>
    %cst_372 = arith.constant dense<0.000000e+00> : vector<2x32xf32>
    %421 = tpu.matmul %420, %32, %cst_372 {dimension_numbers = #tpu.dot_dimension_numbers<[1], [0], [0], [1], [0, 0, 1, 1], [], []>} : vector<2x16xf32>, vector<16x32xf32>, vector<2x32xf32> -> vector<2x32xf32>
    %422 = arith.addf %418, %421 : vector<2x32xf32>
    %c0_373 = arith.constant 0 : index
    %c36_374 = arith.constant 36 : index
    %c0_375 = arith.constant 0 : index
    %423 = vector.load %arg13[%c0_373, %c36_374, %c0_375] : memref<2x64x16xf32, #tpu.memory_space<vmem>>, vector<2x1x16xf32>
    %424 = vector.shape_cast %423 : vector<2x1x16xf32> to vector<2x16xf32>
    %cst_376 = arith.constant dense<0.000000e+00> : vector<2x32xf32>
    %425 = tpu.matmul %424, %33, %cst_376 {dimension_numbers = #tpu.dot_dimension_numbers<[1], [0], [0], [1], [0, 0, 1, 1], [], []>} : vector<2x16xf32>, vector<16x32xf32>, vector<2x32xf32> -> vector<2x32xf32>
    %426 = arith.addf %422, %425 : vector<2x32xf32>
    %c0_377 = arith.constant 0 : index
    %c37_378 = arith.constant 37 : index
    %c0_379 = arith.constant 0 : index
    %427 = vector.load %arg13[%c0_377, %c37_378, %c0_379] : memref<2x64x16xf32, #tpu.memory_space<vmem>>, vector<2x1x16xf32>
    %428 = vector.shape_cast %427 : vector<2x1x16xf32> to vector<2x16xf32>
    %cst_380 = arith.constant dense<0.000000e+00> : vector<2x32xf32>
    %429 = tpu.matmul %428, %34, %cst_380 {dimension_numbers = #tpu.dot_dimension_numbers<[1], [0], [0], [1], [0, 0, 1, 1], [], []>} : vector<2x16xf32>, vector<16x32xf32>, vector<2x32xf32> -> vector<2x32xf32>
    %430 = arith.addf %426, %429 : vector<2x32xf32>
    %c0_381 = arith.constant 0 : index
    %c38 = arith.constant 38 : index
    %c0_382 = arith.constant 0 : index
    %431 = vector.load %arg13[%c0_381, %c38, %c0_382] : memref<2x64x16xf32, #tpu.memory_space<vmem>>, vector<2x1x16xf32>
    %432 = vector.shape_cast %431 : vector<2x1x16xf32> to vector<2x16xf32>
    %cst_383 = arith.constant dense<0.000000e+00> : vector<2x32xf32>
    %433 = tpu.matmul %432, %35, %cst_383 {dimension_numbers = #tpu.dot_dimension_numbers<[1], [0], [0], [1], [0, 0, 1, 1], [], []>} : vector<2x16xf32>, vector<16x32xf32>, vector<2x32xf32> -> vector<2x32xf32>
    %434 = arith.addf %430, %433 : vector<2x32xf32>
    %c0_384 = arith.constant 0 : index
    %c39 = arith.constant 39 : index
    %c0_385 = arith.constant 0 : index
    %435 = vector.load %arg13[%c0_384, %c39, %c0_385] : memref<2x64x16xf32, #tpu.memory_space<vmem>>, vector<2x1x16xf32>
    %436 = vector.shape_cast %435 : vector<2x1x16xf32> to vector<2x16xf32>
    %cst_386 = arith.constant dense<0.000000e+00> : vector<2x32xf32>
    %437 = tpu.matmul %436, %36, %cst_386 {dimension_numbers = #tpu.dot_dimension_numbers<[1], [0], [0], [1], [0, 0, 1, 1], [], []>} : vector<2x16xf32>, vector<16x32xf32>, vector<2x32xf32> -> vector<2x32xf32>
    %438 = arith.addf %434, %437 : vector<2x32xf32>
    %c0_387 = arith.constant 0 : index
    %c44_388 = arith.constant 44 : index
    %c0_389 = arith.constant 0 : index
    %439 = vector.load %arg13[%c0_387, %c44_388, %c0_389] : memref<2x64x16xf32, #tpu.memory_space<vmem>>, vector<2x1x16xf32>
    %440 = vector.shape_cast %439 : vector<2x1x16xf32> to vector<2x16xf32>
    %cst_390 = arith.constant dense<0.000000e+00> : vector<2x32xf32>
    %441 = tpu.matmul %440, %37, %cst_390 {dimension_numbers = #tpu.dot_dimension_numbers<[1], [0], [0], [1], [0, 0, 1, 1], [], []>} : vector<2x16xf32>, vector<16x32xf32>, vector<2x32xf32> -> vector<2x32xf32>
    %442 = arith.addf %438, %441 : vector<2x32xf32>
    %c0_391 = arith.constant 0 : index
    %c45_392 = arith.constant 45 : index
    %c0_393 = arith.constant 0 : index
    %443 = vector.load %arg13[%c0_391, %c45_392, %c0_393] : memref<2x64x16xf32, #tpu.memory_space<vmem>>, vector<2x1x16xf32>
    %444 = vector.shape_cast %443 : vector<2x1x16xf32> to vector<2x16xf32>
    %cst_394 = arith.constant dense<0.000000e+00> : vector<2x32xf32>
    %445 = tpu.matmul %444, %38, %cst_394 {dimension_numbers = #tpu.dot_dimension_numbers<[1], [0], [0], [1], [0, 0, 1, 1], [], []>} : vector<2x16xf32>, vector<16x32xf32>, vector<2x32xf32> -> vector<2x32xf32>
    %446 = arith.addf %442, %445 : vector<2x32xf32>
    %c0_395 = arith.constant 0 : index
    %c46 = arith.constant 46 : index
    %c0_396 = arith.constant 0 : index
    %447 = vector.load %arg13[%c0_395, %c46, %c0_396] : memref<2x64x16xf32, #tpu.memory_space<vmem>>, vector<2x1x16xf32>
    %448 = vector.shape_cast %447 : vector<2x1x16xf32> to vector<2x16xf32>
    %cst_397 = arith.constant dense<0.000000e+00> : vector<2x32xf32>
    %449 = tpu.matmul %448, %39, %cst_397 {dimension_numbers = #tpu.dot_dimension_numbers<[1], [0], [0], [1], [0, 0, 1, 1], [], []>} : vector<2x16xf32>, vector<16x32xf32>, vector<2x32xf32> -> vector<2x32xf32>
    %450 = arith.addf %446, %449 : vector<2x32xf32>
    %c0_398 = arith.constant 0 : index
    %c47 = arith.constant 47 : index
    %c0_399 = arith.constant 0 : index
    %451 = vector.load %arg13[%c0_398, %c47, %c0_399] : memref<2x64x16xf32, #tpu.memory_space<vmem>>, vector<2x1x16xf32>
    %452 = vector.shape_cast %451 : vector<2x1x16xf32> to vector<2x16xf32>
    %cst_400 = arith.constant dense<0.000000e+00> : vector<2x32xf32>
    %453 = tpu.matmul %452, %40, %cst_400 {dimension_numbers = #tpu.dot_dimension_numbers<[1], [0], [0], [1], [0, 0, 1, 1], [], []>} : vector<2x16xf32>, vector<16x32xf32>, vector<2x32xf32> -> vector<2x32xf32>
    %454 = arith.addf %450, %453 : vector<2x32xf32>
    %455 = vector.broadcast %41 : vector<1x32xf32> to vector<2x32xf32>
    %456 = arith.addf %454, %455 : vector<2x32xf32>
    %cst_401 = arith.constant 0.000000e+00 : f32
    %457 = vector.broadcast %cst_401 : f32 to vector<2x32xf32>
    %458 = arith.maximumf %456, %457 : vector<2x32xf32>
    %c160_402 = arith.constant 160 : index
    %c0_403 = arith.constant 0 : index
    %459 = vector.load %arg7[%c160_402, %c0_403] : memref<288x64xf32, #tpu.memory_space<vmem>>, vector<32x64xf32>
    %cst_404 = arith.constant dense<0.000000e+00> : vector<2x64xf32>
    %460 = tpu.matmul %458, %459, %cst_404 {dimension_numbers = #tpu.dot_dimension_numbers<[1], [0], [0], [1], [0, 0, 1, 1], [], []>} : vector<2x32xf32>, vector<32x64xf32>, vector<2x64xf32> -> vector<2x64xf32>
    %461 = arith.addf %391, %460 : vector<2x64xf32>
    %c0_405 = arith.constant 0 : index
    %c32_406 = arith.constant 32 : index
    %c0_407 = arith.constant 0 : index
    %462 = vector.load %arg13[%c0_405, %c32_406, %c0_407] : memref<2x64x16xf32, #tpu.memory_space<vmem>>, vector<2x1x16xf32>
    %463 = vector.shape_cast %462 : vector<2x1x16xf32> to vector<2x16xf32>
    %cst_408 = arith.constant dense<0.000000e+00> : vector<2x32xf32>
    %464 = tpu.matmul %463, %25, %cst_408 {dimension_numbers = #tpu.dot_dimension_numbers<[1], [0], [0], [1], [0, 0, 1, 1], [], []>} : vector<2x16xf32>, vector<16x32xf32>, vector<2x32xf32> -> vector<2x32xf32>
    %c0_409 = arith.constant 0 : index
    %c33_410 = arith.constant 33 : index
    %c0_411 = arith.constant 0 : index
    %465 = vector.load %arg13[%c0_409, %c33_410, %c0_411] : memref<2x64x16xf32, #tpu.memory_space<vmem>>, vector<2x1x16xf32>
    %466 = vector.shape_cast %465 : vector<2x1x16xf32> to vector<2x16xf32>
    %cst_412 = arith.constant dense<0.000000e+00> : vector<2x32xf32>
    %467 = tpu.matmul %466, %26, %cst_412 {dimension_numbers = #tpu.dot_dimension_numbers<[1], [0], [0], [1], [0, 0, 1, 1], [], []>} : vector<2x16xf32>, vector<16x32xf32>, vector<2x32xf32> -> vector<2x32xf32>
    %468 = arith.addf %464, %467 : vector<2x32xf32>
    %c0_413 = arith.constant 0 : index
    %c34_414 = arith.constant 34 : index
    %c0_415 = arith.constant 0 : index
    %469 = vector.load %arg13[%c0_413, %c34_414, %c0_415] : memref<2x64x16xf32, #tpu.memory_space<vmem>>, vector<2x1x16xf32>
    %470 = vector.shape_cast %469 : vector<2x1x16xf32> to vector<2x16xf32>
    %cst_416 = arith.constant dense<0.000000e+00> : vector<2x32xf32>
    %471 = tpu.matmul %470, %27, %cst_416 {dimension_numbers = #tpu.dot_dimension_numbers<[1], [0], [0], [1], [0, 0, 1, 1], [], []>} : vector<2x16xf32>, vector<16x32xf32>, vector<2x32xf32> -> vector<2x32xf32>
    %472 = arith.addf %468, %471 : vector<2x32xf32>
    %c0_417 = arith.constant 0 : index
    %c35_418 = arith.constant 35 : index
    %c0_419 = arith.constant 0 : index
    %473 = vector.load %arg13[%c0_417, %c35_418, %c0_419] : memref<2x64x16xf32, #tpu.memory_space<vmem>>, vector<2x1x16xf32>
    %474 = vector.shape_cast %473 : vector<2x1x16xf32> to vector<2x16xf32>
    %cst_420 = arith.constant dense<0.000000e+00> : vector<2x32xf32>
    %475 = tpu.matmul %474, %28, %cst_420 {dimension_numbers = #tpu.dot_dimension_numbers<[1], [0], [0], [1], [0, 0, 1, 1], [], []>} : vector<2x16xf32>, vector<16x32xf32>, vector<2x32xf32> -> vector<2x32xf32>
    %476 = arith.addf %472, %475 : vector<2x32xf32>
    %c0_421 = arith.constant 0 : index
    %c40_422 = arith.constant 40 : index
    %c0_423 = arith.constant 0 : index
    %477 = vector.load %arg13[%c0_421, %c40_422, %c0_423] : memref<2x64x16xf32, #tpu.memory_space<vmem>>, vector<2x1x16xf32>
    %478 = vector.shape_cast %477 : vector<2x1x16xf32> to vector<2x16xf32>
    %cst_424 = arith.constant dense<0.000000e+00> : vector<2x32xf32>
    %479 = tpu.matmul %478, %29, %cst_424 {dimension_numbers = #tpu.dot_dimension_numbers<[1], [0], [0], [1], [0, 0, 1, 1], [], []>} : vector<2x16xf32>, vector<16x32xf32>, vector<2x32xf32> -> vector<2x32xf32>
    %480 = arith.addf %476, %479 : vector<2x32xf32>
    %c0_425 = arith.constant 0 : index
    %c41_426 = arith.constant 41 : index
    %c0_427 = arith.constant 0 : index
    %481 = vector.load %arg13[%c0_425, %c41_426, %c0_427] : memref<2x64x16xf32, #tpu.memory_space<vmem>>, vector<2x1x16xf32>
    %482 = vector.shape_cast %481 : vector<2x1x16xf32> to vector<2x16xf32>
    %cst_428 = arith.constant dense<0.000000e+00> : vector<2x32xf32>
    %483 = tpu.matmul %482, %30, %cst_428 {dimension_numbers = #tpu.dot_dimension_numbers<[1], [0], [0], [1], [0, 0, 1, 1], [], []>} : vector<2x16xf32>, vector<16x32xf32>, vector<2x32xf32> -> vector<2x32xf32>
    %484 = arith.addf %480, %483 : vector<2x32xf32>
    %c0_429 = arith.constant 0 : index
    %c42_430 = arith.constant 42 : index
    %c0_431 = arith.constant 0 : index
    %485 = vector.load %arg13[%c0_429, %c42_430, %c0_431] : memref<2x64x16xf32, #tpu.memory_space<vmem>>, vector<2x1x16xf32>
    %486 = vector.shape_cast %485 : vector<2x1x16xf32> to vector<2x16xf32>
    %cst_432 = arith.constant dense<0.000000e+00> : vector<2x32xf32>
    %487 = tpu.matmul %486, %31, %cst_432 {dimension_numbers = #tpu.dot_dimension_numbers<[1], [0], [0], [1], [0, 0, 1, 1], [], []>} : vector<2x16xf32>, vector<16x32xf32>, vector<2x32xf32> -> vector<2x32xf32>
    %488 = arith.addf %484, %487 : vector<2x32xf32>
    %c0_433 = arith.constant 0 : index
    %c43_434 = arith.constant 43 : index
    %c0_435 = arith.constant 0 : index
    %489 = vector.load %arg13[%c0_433, %c43_434, %c0_435] : memref<2x64x16xf32, #tpu.memory_space<vmem>>, vector<2x1x16xf32>
    %490 = vector.shape_cast %489 : vector<2x1x16xf32> to vector<2x16xf32>
    %cst_436 = arith.constant dense<0.000000e+00> : vector<2x32xf32>
    %491 = tpu.matmul %490, %32, %cst_436 {dimension_numbers = #tpu.dot_dimension_numbers<[1], [0], [0], [1], [0, 0, 1, 1], [], []>} : vector<2x16xf32>, vector<16x32xf32>, vector<2x32xf32> -> vector<2x32xf32>
    %492 = arith.addf %488, %491 : vector<2x32xf32>
    %c0_437 = arith.constant 0 : index
    %c48_438 = arith.constant 48 : index
    %c0_439 = arith.constant 0 : index
    %493 = vector.load %arg13[%c0_437, %c48_438, %c0_439] : memref<2x64x16xf32, #tpu.memory_space<vmem>>, vector<2x1x16xf32>
    %494 = vector.shape_cast %493 : vector<2x1x16xf32> to vector<2x16xf32>
    %cst_440 = arith.constant dense<0.000000e+00> : vector<2x32xf32>
    %495 = tpu.matmul %494, %33, %cst_440 {dimension_numbers = #tpu.dot_dimension_numbers<[1], [0], [0], [1], [0, 0, 1, 1], [], []>} : vector<2x16xf32>, vector<16x32xf32>, vector<2x32xf32> -> vector<2x32xf32>
    %496 = arith.addf %492, %495 : vector<2x32xf32>
    %c0_441 = arith.constant 0 : index
    %c49 = arith.constant 49 : index
    %c0_442 = arith.constant 0 : index
    %497 = vector.load %arg13[%c0_441, %c49, %c0_442] : memref<2x64x16xf32, #tpu.memory_space<vmem>>, vector<2x1x16xf32>
    %498 = vector.shape_cast %497 : vector<2x1x16xf32> to vector<2x16xf32>
    %cst_443 = arith.constant dense<0.000000e+00> : vector<2x32xf32>
    %499 = tpu.matmul %498, %34, %cst_443 {dimension_numbers = #tpu.dot_dimension_numbers<[1], [0], [0], [1], [0, 0, 1, 1], [], []>} : vector<2x16xf32>, vector<16x32xf32>, vector<2x32xf32> -> vector<2x32xf32>
    %500 = arith.addf %496, %499 : vector<2x32xf32>
    %c0_444 = arith.constant 0 : index
    %c50 = arith.constant 50 : index
    %c0_445 = arith.constant 0 : index
    %501 = vector.load %arg13[%c0_444, %c50, %c0_445] : memref<2x64x16xf32, #tpu.memory_space<vmem>>, vector<2x1x16xf32>
    %502 = vector.shape_cast %501 : vector<2x1x16xf32> to vector<2x16xf32>
    %cst_446 = arith.constant dense<0.000000e+00> : vector<2x32xf32>
    %503 = tpu.matmul %502, %35, %cst_446 {dimension_numbers = #tpu.dot_dimension_numbers<[1], [0], [0], [1], [0, 0, 1, 1], [], []>} : vector<2x16xf32>, vector<16x32xf32>, vector<2x32xf32> -> vector<2x32xf32>
    %504 = arith.addf %500, %503 : vector<2x32xf32>
    %c0_447 = arith.constant 0 : index
    %c51 = arith.constant 51 : index
    %c0_448 = arith.constant 0 : index
    %505 = vector.load %arg13[%c0_447, %c51, %c0_448] : memref<2x64x16xf32, #tpu.memory_space<vmem>>, vector<2x1x16xf32>
    %506 = vector.shape_cast %505 : vector<2x1x16xf32> to vector<2x16xf32>
    %cst_449 = arith.constant dense<0.000000e+00> : vector<2x32xf32>
    %507 = tpu.matmul %506, %36, %cst_449 {dimension_numbers = #tpu.dot_dimension_numbers<[1], [0], [0], [1], [0, 0, 1, 1], [], []>} : vector<2x16xf32>, vector<16x32xf32>, vector<2x32xf32> -> vector<2x32xf32>
    %508 = arith.addf %504, %507 : vector<2x32xf32>
    %c0_450 = arith.constant 0 : index
    %c56 = arith.constant 56 : index
    %c0_451 = arith.constant 0 : index
    %509 = vector.load %arg13[%c0_450, %c56, %c0_451] : memref<2x64x16xf32, #tpu.memory_space<vmem>>, vector<2x1x16xf32>
    %510 = vector.shape_cast %509 : vector<2x1x16xf32> to vector<2x16xf32>
    %cst_452 = arith.constant dense<0.000000e+00> : vector<2x32xf32>
    %511 = tpu.matmul %510, %37, %cst_452 {dimension_numbers = #tpu.dot_dimension_numbers<[1], [0], [0], [1], [0, 0, 1, 1], [], []>} : vector<2x16xf32>, vector<16x32xf32>, vector<2x32xf32> -> vector<2x32xf32>
    %512 = arith.addf %508, %511 : vector<2x32xf32>
    %c0_453 = arith.constant 0 : index
    %c57 = arith.constant 57 : index
    %c0_454 = arith.constant 0 : index
    %513 = vector.load %arg13[%c0_453, %c57, %c0_454] : memref<2x64x16xf32, #tpu.memory_space<vmem>>, vector<2x1x16xf32>
    %514 = vector.shape_cast %513 : vector<2x1x16xf32> to vector<2x16xf32>
    %cst_455 = arith.constant dense<0.000000e+00> : vector<2x32xf32>
    %515 = tpu.matmul %514, %38, %cst_455 {dimension_numbers = #tpu.dot_dimension_numbers<[1], [0], [0], [1], [0, 0, 1, 1], [], []>} : vector<2x16xf32>, vector<16x32xf32>, vector<2x32xf32> -> vector<2x32xf32>
    %516 = arith.addf %512, %515 : vector<2x32xf32>
    %c0_456 = arith.constant 0 : index
    %c58 = arith.constant 58 : index
    %c0_457 = arith.constant 0 : index
    %517 = vector.load %arg13[%c0_456, %c58, %c0_457] : memref<2x64x16xf32, #tpu.memory_space<vmem>>, vector<2x1x16xf32>
    %518 = vector.shape_cast %517 : vector<2x1x16xf32> to vector<2x16xf32>
    %cst_458 = arith.constant dense<0.000000e+00> : vector<2x32xf32>
    %519 = tpu.matmul %518, %39, %cst_458 {dimension_numbers = #tpu.dot_dimension_numbers<[1], [0], [0], [1], [0, 0, 1, 1], [], []>} : vector<2x16xf32>, vector<16x32xf32>, vector<2x32xf32> -> vector<2x32xf32>
    %520 = arith.addf %516, %519 : vector<2x32xf32>
    %c0_459 = arith.constant 0 : index
    %c59 = arith.constant 59 : index
    %c0_460 = arith.constant 0 : index
    %521 = vector.load %arg13[%c0_459, %c59, %c0_460] : memref<2x64x16xf32, #tpu.memory_space<vmem>>, vector<2x1x16xf32>
    %522 = vector.shape_cast %521 : vector<2x1x16xf32> to vector<2x16xf32>
    %cst_461 = arith.constant dense<0.000000e+00> : vector<2x32xf32>
    %523 = tpu.matmul %522, %40, %cst_461 {dimension_numbers = #tpu.dot_dimension_numbers<[1], [0], [0], [1], [0, 0, 1, 1], [], []>} : vector<2x16xf32>, vector<16x32xf32>, vector<2x32xf32> -> vector<2x32xf32>
    %524 = arith.addf %520, %523 : vector<2x32xf32>
    %525 = vector.broadcast %41 : vector<1x32xf32> to vector<2x32xf32>
    %526 = arith.addf %524, %525 : vector<2x32xf32>
    %cst_462 = arith.constant 0.000000e+00 : f32
    %527 = vector.broadcast %cst_462 : f32 to vector<2x32xf32>
    %528 = arith.maximumf %526, %527 : vector<2x32xf32>
    %c192_463 = arith.constant 192 : index
    %c0_464 = arith.constant 0 : index
    %529 = vector.load %arg7[%c192_463, %c0_464] : memref<288x64xf32, #tpu.memory_space<vmem>>, vector<32x64xf32>
    %cst_465 = arith.constant dense<0.000000e+00> : vector<2x64xf32>
    %530 = tpu.matmul %528, %529, %cst_465 {dimension_numbers = #tpu.dot_dimension_numbers<[1], [0], [0], [1], [0, 0, 1, 1], [], []>} : vector<2x32xf32>, vector<32x64xf32>, vector<2x64xf32> -> vector<2x64xf32>
    %531 = arith.addf %461, %530 : vector<2x64xf32>
    %c0_466 = arith.constant 0 : index
    %c34_467 = arith.constant 34 : index
    %c0_468 = arith.constant 0 : index
    %532 = vector.load %arg13[%c0_466, %c34_467, %c0_468] : memref<2x64x16xf32, #tpu.memory_space<vmem>>, vector<2x1x16xf32>
    %533 = vector.shape_cast %532 : vector<2x1x16xf32> to vector<2x16xf32>
    %cst_469 = arith.constant dense<0.000000e+00> : vector<2x32xf32>
    %534 = tpu.matmul %533, %25, %cst_469 {dimension_numbers = #tpu.dot_dimension_numbers<[1], [0], [0], [1], [0, 0, 1, 1], [], []>} : vector<2x16xf32>, vector<16x32xf32>, vector<2x32xf32> -> vector<2x32xf32>
    %c0_470 = arith.constant 0 : index
    %c35_471 = arith.constant 35 : index
    %c0_472 = arith.constant 0 : index
    %535 = vector.load %arg13[%c0_470, %c35_471, %c0_472] : memref<2x64x16xf32, #tpu.memory_space<vmem>>, vector<2x1x16xf32>
    %536 = vector.shape_cast %535 : vector<2x1x16xf32> to vector<2x16xf32>
    %cst_473 = arith.constant dense<0.000000e+00> : vector<2x32xf32>
    %537 = tpu.matmul %536, %26, %cst_473 {dimension_numbers = #tpu.dot_dimension_numbers<[1], [0], [0], [1], [0, 0, 1, 1], [], []>} : vector<2x16xf32>, vector<16x32xf32>, vector<2x32xf32> -> vector<2x32xf32>
    %538 = arith.addf %534, %537 : vector<2x32xf32>
    %c0_474 = arith.constant 0 : index
    %c36_475 = arith.constant 36 : index
    %c0_476 = arith.constant 0 : index
    %539 = vector.load %arg13[%c0_474, %c36_475, %c0_476] : memref<2x64x16xf32, #tpu.memory_space<vmem>>, vector<2x1x16xf32>
    %540 = vector.shape_cast %539 : vector<2x1x16xf32> to vector<2x16xf32>
    %cst_477 = arith.constant dense<0.000000e+00> : vector<2x32xf32>
    %541 = tpu.matmul %540, %27, %cst_477 {dimension_numbers = #tpu.dot_dimension_numbers<[1], [0], [0], [1], [0, 0, 1, 1], [], []>} : vector<2x16xf32>, vector<16x32xf32>, vector<2x32xf32> -> vector<2x32xf32>
    %542 = arith.addf %538, %541 : vector<2x32xf32>
    %c0_478 = arith.constant 0 : index
    %c37_479 = arith.constant 37 : index
    %c0_480 = arith.constant 0 : index
    %543 = vector.load %arg13[%c0_478, %c37_479, %c0_480] : memref<2x64x16xf32, #tpu.memory_space<vmem>>, vector<2x1x16xf32>
    %544 = vector.shape_cast %543 : vector<2x1x16xf32> to vector<2x16xf32>
    %cst_481 = arith.constant dense<0.000000e+00> : vector<2x32xf32>
    %545 = tpu.matmul %544, %28, %cst_481 {dimension_numbers = #tpu.dot_dimension_numbers<[1], [0], [0], [1], [0, 0, 1, 1], [], []>} : vector<2x16xf32>, vector<16x32xf32>, vector<2x32xf32> -> vector<2x32xf32>
    %546 = arith.addf %542, %545 : vector<2x32xf32>
    %c0_482 = arith.constant 0 : index
    %c42_483 = arith.constant 42 : index
    %c0_484 = arith.constant 0 : index
    %547 = vector.load %arg13[%c0_482, %c42_483, %c0_484] : memref<2x64x16xf32, #tpu.memory_space<vmem>>, vector<2x1x16xf32>
    %548 = vector.shape_cast %547 : vector<2x1x16xf32> to vector<2x16xf32>
    %cst_485 = arith.constant dense<0.000000e+00> : vector<2x32xf32>
    %549 = tpu.matmul %548, %29, %cst_485 {dimension_numbers = #tpu.dot_dimension_numbers<[1], [0], [0], [1], [0, 0, 1, 1], [], []>} : vector<2x16xf32>, vector<16x32xf32>, vector<2x32xf32> -> vector<2x32xf32>
    %550 = arith.addf %546, %549 : vector<2x32xf32>
    %c0_486 = arith.constant 0 : index
    %c43_487 = arith.constant 43 : index
    %c0_488 = arith.constant 0 : index
    %551 = vector.load %arg13[%c0_486, %c43_487, %c0_488] : memref<2x64x16xf32, #tpu.memory_space<vmem>>, vector<2x1x16xf32>
    %552 = vector.shape_cast %551 : vector<2x1x16xf32> to vector<2x16xf32>
    %cst_489 = arith.constant dense<0.000000e+00> : vector<2x32xf32>
    %553 = tpu.matmul %552, %30, %cst_489 {dimension_numbers = #tpu.dot_dimension_numbers<[1], [0], [0], [1], [0, 0, 1, 1], [], []>} : vector<2x16xf32>, vector<16x32xf32>, vector<2x32xf32> -> vector<2x32xf32>
    %554 = arith.addf %550, %553 : vector<2x32xf32>
    %c0_490 = arith.constant 0 : index
    %c44_491 = arith.constant 44 : index
    %c0_492 = arith.constant 0 : index
    %555 = vector.load %arg13[%c0_490, %c44_491, %c0_492] : memref<2x64x16xf32, #tpu.memory_space<vmem>>, vector<2x1x16xf32>
    %556 = vector.shape_cast %555 : vector<2x1x16xf32> to vector<2x16xf32>
    %cst_493 = arith.constant dense<0.000000e+00> : vector<2x32xf32>
    %557 = tpu.matmul %556, %31, %cst_493 {dimension_numbers = #tpu.dot_dimension_numbers<[1], [0], [0], [1], [0, 0, 1, 1], [], []>} : vector<2x16xf32>, vector<16x32xf32>, vector<2x32xf32> -> vector<2x32xf32>
    %558 = arith.addf %554, %557 : vector<2x32xf32>
    %c0_494 = arith.constant 0 : index
    %c45_495 = arith.constant 45 : index
    %c0_496 = arith.constant 0 : index
    %559 = vector.load %arg13[%c0_494, %c45_495, %c0_496] : memref<2x64x16xf32, #tpu.memory_space<vmem>>, vector<2x1x16xf32>
    %560 = vector.shape_cast %559 : vector<2x1x16xf32> to vector<2x16xf32>
    %cst_497 = arith.constant dense<0.000000e+00> : vector<2x32xf32>
    %561 = tpu.matmul %560, %32, %cst_497 {dimension_numbers = #tpu.dot_dimension_numbers<[1], [0], [0], [1], [0, 0, 1, 1], [], []>} : vector<2x16xf32>, vector<16x32xf32>, vector<2x32xf32> -> vector<2x32xf32>
    %562 = arith.addf %558, %561 : vector<2x32xf32>
    %c0_498 = arith.constant 0 : index
    %c50_499 = arith.constant 50 : index
    %c0_500 = arith.constant 0 : index
    %563 = vector.load %arg13[%c0_498, %c50_499, %c0_500] : memref<2x64x16xf32, #tpu.memory_space<vmem>>, vector<2x1x16xf32>
    %564 = vector.shape_cast %563 : vector<2x1x16xf32> to vector<2x16xf32>
    %cst_501 = arith.constant dense<0.000000e+00> : vector<2x32xf32>
    %565 = tpu.matmul %564, %33, %cst_501 {dimension_numbers = #tpu.dot_dimension_numbers<[1], [0], [0], [1], [0, 0, 1, 1], [], []>} : vector<2x16xf32>, vector<16x32xf32>, vector<2x32xf32> -> vector<2x32xf32>
    %566 = arith.addf %562, %565 : vector<2x32xf32>
    %c0_502 = arith.constant 0 : index
    %c51_503 = arith.constant 51 : index
    %c0_504 = arith.constant 0 : index
    %567 = vector.load %arg13[%c0_502, %c51_503, %c0_504] : memref<2x64x16xf32, #tpu.memory_space<vmem>>, vector<2x1x16xf32>
    %568 = vector.shape_cast %567 : vector<2x1x16xf32> to vector<2x16xf32>
    %cst_505 = arith.constant dense<0.000000e+00> : vector<2x32xf32>
    %569 = tpu.matmul %568, %34, %cst_505 {dimension_numbers = #tpu.dot_dimension_numbers<[1], [0], [0], [1], [0, 0, 1, 1], [], []>} : vector<2x16xf32>, vector<16x32xf32>, vector<2x32xf32> -> vector<2x32xf32>
    %570 = arith.addf %566, %569 : vector<2x32xf32>
    %c0_506 = arith.constant 0 : index
    %c52 = arith.constant 52 : index
    %c0_507 = arith.constant 0 : index
    %571 = vector.load %arg13[%c0_506, %c52, %c0_507] : memref<2x64x16xf32, #tpu.memory_space<vmem>>, vector<2x1x16xf32>
    %572 = vector.shape_cast %571 : vector<2x1x16xf32> to vector<2x16xf32>
    %cst_508 = arith.constant dense<0.000000e+00> : vector<2x32xf32>
    %573 = tpu.matmul %572, %35, %cst_508 {dimension_numbers = #tpu.dot_dimension_numbers<[1], [0], [0], [1], [0, 0, 1, 1], [], []>} : vector<2x16xf32>, vector<16x32xf32>, vector<2x32xf32> -> vector<2x32xf32>
    %574 = arith.addf %570, %573 : vector<2x32xf32>
    %c0_509 = arith.constant 0 : index
    %c53 = arith.constant 53 : index
    %c0_510 = arith.constant 0 : index
    %575 = vector.load %arg13[%c0_509, %c53, %c0_510] : memref<2x64x16xf32, #tpu.memory_space<vmem>>, vector<2x1x16xf32>
    %576 = vector.shape_cast %575 : vector<2x1x16xf32> to vector<2x16xf32>
    %cst_511 = arith.constant dense<0.000000e+00> : vector<2x32xf32>
    %577 = tpu.matmul %576, %36, %cst_511 {dimension_numbers = #tpu.dot_dimension_numbers<[1], [0], [0], [1], [0, 0, 1, 1], [], []>} : vector<2x16xf32>, vector<16x32xf32>, vector<2x32xf32> -> vector<2x32xf32>
    %578 = arith.addf %574, %577 : vector<2x32xf32>
    %c0_512 = arith.constant 0 : index
    %c58_513 = arith.constant 58 : index
    %c0_514 = arith.constant 0 : index
    %579 = vector.load %arg13[%c0_512, %c58_513, %c0_514] : memref<2x64x16xf32, #tpu.memory_space<vmem>>, vector<2x1x16xf32>
    %580 = vector.shape_cast %579 : vector<2x1x16xf32> to vector<2x16xf32>
    %cst_515 = arith.constant dense<0.000000e+00> : vector<2x32xf32>
    %581 = tpu.matmul %580, %37, %cst_515 {dimension_numbers = #tpu.dot_dimension_numbers<[1], [0], [0], [1], [0, 0, 1, 1], [], []>} : vector<2x16xf32>, vector<16x32xf32>, vector<2x32xf32> -> vector<2x32xf32>
    %582 = arith.addf %578, %581 : vector<2x32xf32>
    %c0_516 = arith.constant 0 : index
    %c59_517 = arith.constant 59 : index
    %c0_518 = arith.constant 0 : index
    %583 = vector.load %arg13[%c0_516, %c59_517, %c0_518] : memref<2x64x16xf32, #tpu.memory_space<vmem>>, vector<2x1x16xf32>
    %584 = vector.shape_cast %583 : vector<2x1x16xf32> to vector<2x16xf32>
    %cst_519 = arith.constant dense<0.000000e+00> : vector<2x32xf32>
    %585 = tpu.matmul %584, %38, %cst_519 {dimension_numbers = #tpu.dot_dimension_numbers<[1], [0], [0], [1], [0, 0, 1, 1], [], []>} : vector<2x16xf32>, vector<16x32xf32>, vector<2x32xf32> -> vector<2x32xf32>
    %586 = arith.addf %582, %585 : vector<2x32xf32>
    %c0_520 = arith.constant 0 : index
    %c60 = arith.constant 60 : index
    %c0_521 = arith.constant 0 : index
    %587 = vector.load %arg13[%c0_520, %c60, %c0_521] : memref<2x64x16xf32, #tpu.memory_space<vmem>>, vector<2x1x16xf32>
    %588 = vector.shape_cast %587 : vector<2x1x16xf32> to vector<2x16xf32>
    %cst_522 = arith.constant dense<0.000000e+00> : vector<2x32xf32>
    %589 = tpu.matmul %588, %39, %cst_522 {dimension_numbers = #tpu.dot_dimension_numbers<[1], [0], [0], [1], [0, 0, 1, 1], [], []>} : vector<2x16xf32>, vector<16x32xf32>, vector<2x32xf32> -> vector<2x32xf32>
    %590 = arith.addf %586, %589 : vector<2x32xf32>
    %c0_523 = arith.constant 0 : index
    %c61 = arith.constant 61 : index
    %c0_524 = arith.constant 0 : index
    %591 = vector.load %arg13[%c0_523, %c61, %c0_524] : memref<2x64x16xf32, #tpu.memory_space<vmem>>, vector<2x1x16xf32>
    %592 = vector.shape_cast %591 : vector<2x1x16xf32> to vector<2x16xf32>
    %cst_525 = arith.constant dense<0.000000e+00> : vector<2x32xf32>
    %593 = tpu.matmul %592, %40, %cst_525 {dimension_numbers = #tpu.dot_dimension_numbers<[1], [0], [0], [1], [0, 0, 1, 1], [], []>} : vector<2x16xf32>, vector<16x32xf32>, vector<2x32xf32> -> vector<2x32xf32>
    %594 = arith.addf %590, %593 : vector<2x32xf32>
    %595 = vector.broadcast %41 : vector<1x32xf32> to vector<2x32xf32>
    %596 = arith.addf %594, %595 : vector<2x32xf32>
    %cst_526 = arith.constant 0.000000e+00 : f32
    %597 = vector.broadcast %cst_526 : f32 to vector<2x32xf32>
    %598 = arith.maximumf %596, %597 : vector<2x32xf32>
    %c224_527 = arith.constant 224 : index
    %c0_528 = arith.constant 0 : index
    %599 = vector.load %arg7[%c224_527, %c0_528] : memref<288x64xf32, #tpu.memory_space<vmem>>, vector<32x64xf32>
    %cst_529 = arith.constant dense<0.000000e+00> : vector<2x64xf32>
    %600 = tpu.matmul %598, %599, %cst_529 {dimension_numbers = #tpu.dot_dimension_numbers<[1], [0], [0], [1], [0, 0, 1, 1], [], []>} : vector<2x32xf32>, vector<32x64xf32>, vector<2x64xf32> -> vector<2x64xf32>
    %601 = arith.addf %531, %600 : vector<2x64xf32>
    %c0_530 = arith.constant 0 : index
    %c36_531 = arith.constant 36 : index
    %c0_532 = arith.constant 0 : index
    %602 = vector.load %arg13[%c0_530, %c36_531, %c0_532] : memref<2x64x16xf32, #tpu.memory_space<vmem>>, vector<2x1x16xf32>
    %603 = vector.shape_cast %602 : vector<2x1x16xf32> to vector<2x16xf32>
    %cst_533 = arith.constant dense<0.000000e+00> : vector<2x32xf32>
    %604 = tpu.matmul %603, %25, %cst_533 {dimension_numbers = #tpu.dot_dimension_numbers<[1], [0], [0], [1], [0, 0, 1, 1], [], []>} : vector<2x16xf32>, vector<16x32xf32>, vector<2x32xf32> -> vector<2x32xf32>
    %c0_534 = arith.constant 0 : index
    %c37_535 = arith.constant 37 : index
    %c0_536 = arith.constant 0 : index
    %605 = vector.load %arg13[%c0_534, %c37_535, %c0_536] : memref<2x64x16xf32, #tpu.memory_space<vmem>>, vector<2x1x16xf32>
    %606 = vector.shape_cast %605 : vector<2x1x16xf32> to vector<2x16xf32>
    %cst_537 = arith.constant dense<0.000000e+00> : vector<2x32xf32>
    %607 = tpu.matmul %606, %26, %cst_537 {dimension_numbers = #tpu.dot_dimension_numbers<[1], [0], [0], [1], [0, 0, 1, 1], [], []>} : vector<2x16xf32>, vector<16x32xf32>, vector<2x32xf32> -> vector<2x32xf32>
    %608 = arith.addf %604, %607 : vector<2x32xf32>
    %c0_538 = arith.constant 0 : index
    %c38_539 = arith.constant 38 : index
    %c0_540 = arith.constant 0 : index
    %609 = vector.load %arg13[%c0_538, %c38_539, %c0_540] : memref<2x64x16xf32, #tpu.memory_space<vmem>>, vector<2x1x16xf32>
    %610 = vector.shape_cast %609 : vector<2x1x16xf32> to vector<2x16xf32>
    %cst_541 = arith.constant dense<0.000000e+00> : vector<2x32xf32>
    %611 = tpu.matmul %610, %27, %cst_541 {dimension_numbers = #tpu.dot_dimension_numbers<[1], [0], [0], [1], [0, 0, 1, 1], [], []>} : vector<2x16xf32>, vector<16x32xf32>, vector<2x32xf32> -> vector<2x32xf32>
    %612 = arith.addf %608, %611 : vector<2x32xf32>
    %c0_542 = arith.constant 0 : index
    %c39_543 = arith.constant 39 : index
    %c0_544 = arith.constant 0 : index
    %613 = vector.load %arg13[%c0_542, %c39_543, %c0_544] : memref<2x64x16xf32, #tpu.memory_space<vmem>>, vector<2x1x16xf32>
    %614 = vector.shape_cast %613 : vector<2x1x16xf32> to vector<2x16xf32>
    %cst_545 = arith.constant dense<0.000000e+00> : vector<2x32xf32>
    %615 = tpu.matmul %614, %28, %cst_545 {dimension_numbers = #tpu.dot_dimension_numbers<[1], [0], [0], [1], [0, 0, 1, 1], [], []>} : vector<2x16xf32>, vector<16x32xf32>, vector<2x32xf32> -> vector<2x32xf32>
    %616 = arith.addf %612, %615 : vector<2x32xf32>
    %c0_546 = arith.constant 0 : index
    %c44_547 = arith.constant 44 : index
    %c0_548 = arith.constant 0 : index
    %617 = vector.load %arg13[%c0_546, %c44_547, %c0_548] : memref<2x64x16xf32, #tpu.memory_space<vmem>>, vector<2x1x16xf32>
    %618 = vector.shape_cast %617 : vector<2x1x16xf32> to vector<2x16xf32>
    %cst_549 = arith.constant dense<0.000000e+00> : vector<2x32xf32>
    %619 = tpu.matmul %618, %29, %cst_549 {dimension_numbers = #tpu.dot_dimension_numbers<[1], [0], [0], [1], [0, 0, 1, 1], [], []>} : vector<2x16xf32>, vector<16x32xf32>, vector<2x32xf32> -> vector<2x32xf32>
    %620 = arith.addf %616, %619 : vector<2x32xf32>
    %c0_550 = arith.constant 0 : index
    %c45_551 = arith.constant 45 : index
    %c0_552 = arith.constant 0 : index
    %621 = vector.load %arg13[%c0_550, %c45_551, %c0_552] : memref<2x64x16xf32, #tpu.memory_space<vmem>>, vector<2x1x16xf32>
    %622 = vector.shape_cast %621 : vector<2x1x16xf32> to vector<2x16xf32>
    %cst_553 = arith.constant dense<0.000000e+00> : vector<2x32xf32>
    %623 = tpu.matmul %622, %30, %cst_553 {dimension_numbers = #tpu.dot_dimension_numbers<[1], [0], [0], [1], [0, 0, 1, 1], [], []>} : vector<2x16xf32>, vector<16x32xf32>, vector<2x32xf32> -> vector<2x32xf32>
    %624 = arith.addf %620, %623 : vector<2x32xf32>
    %c0_554 = arith.constant 0 : index
    %c46_555 = arith.constant 46 : index
    %c0_556 = arith.constant 0 : index
    %625 = vector.load %arg13[%c0_554, %c46_555, %c0_556] : memref<2x64x16xf32, #tpu.memory_space<vmem>>, vector<2x1x16xf32>
    %626 = vector.shape_cast %625 : vector<2x1x16xf32> to vector<2x16xf32>
    %cst_557 = arith.constant dense<0.000000e+00> : vector<2x32xf32>
    %627 = tpu.matmul %626, %31, %cst_557 {dimension_numbers = #tpu.dot_dimension_numbers<[1], [0], [0], [1], [0, 0, 1, 1], [], []>} : vector<2x16xf32>, vector<16x32xf32>, vector<2x32xf32> -> vector<2x32xf32>
    %628 = arith.addf %624, %627 : vector<2x32xf32>
    %c0_558 = arith.constant 0 : index
    %c47_559 = arith.constant 47 : index
    %c0_560 = arith.constant 0 : index
    %629 = vector.load %arg13[%c0_558, %c47_559, %c0_560] : memref<2x64x16xf32, #tpu.memory_space<vmem>>, vector<2x1x16xf32>
    %630 = vector.shape_cast %629 : vector<2x1x16xf32> to vector<2x16xf32>
    %cst_561 = arith.constant dense<0.000000e+00> : vector<2x32xf32>
    %631 = tpu.matmul %630, %32, %cst_561 {dimension_numbers = #tpu.dot_dimension_numbers<[1], [0], [0], [1], [0, 0, 1, 1], [], []>} : vector<2x16xf32>, vector<16x32xf32>, vector<2x32xf32> -> vector<2x32xf32>
    %632 = arith.addf %628, %631 : vector<2x32xf32>
    %c0_562 = arith.constant 0 : index
    %c52_563 = arith.constant 52 : index
    %c0_564 = arith.constant 0 : index
    %633 = vector.load %arg13[%c0_562, %c52_563, %c0_564] : memref<2x64x16xf32, #tpu.memory_space<vmem>>, vector<2x1x16xf32>
    %634 = vector.shape_cast %633 : vector<2x1x16xf32> to vector<2x16xf32>
    %cst_565 = arith.constant dense<0.000000e+00> : vector<2x32xf32>
    %635 = tpu.matmul %634, %33, %cst_565 {dimension_numbers = #tpu.dot_dimension_numbers<[1], [0], [0], [1], [0, 0, 1, 1], [], []>} : vector<2x16xf32>, vector<16x32xf32>, vector<2x32xf32> -> vector<2x32xf32>
    %636 = arith.addf %632, %635 : vector<2x32xf32>
    %c0_566 = arith.constant 0 : index
    %c53_567 = arith.constant 53 : index
    %c0_568 = arith.constant 0 : index
    %637 = vector.load %arg13[%c0_566, %c53_567, %c0_568] : memref<2x64x16xf32, #tpu.memory_space<vmem>>, vector<2x1x16xf32>
    %638 = vector.shape_cast %637 : vector<2x1x16xf32> to vector<2x16xf32>
    %cst_569 = arith.constant dense<0.000000e+00> : vector<2x32xf32>
    %639 = tpu.matmul %638, %34, %cst_569 {dimension_numbers = #tpu.dot_dimension_numbers<[1], [0], [0], [1], [0, 0, 1, 1], [], []>} : vector<2x16xf32>, vector<16x32xf32>, vector<2x32xf32> -> vector<2x32xf32>
    %640 = arith.addf %636, %639 : vector<2x32xf32>
    %c0_570 = arith.constant 0 : index
    %c54 = arith.constant 54 : index
    %c0_571 = arith.constant 0 : index
    %641 = vector.load %arg13[%c0_570, %c54, %c0_571] : memref<2x64x16xf32, #tpu.memory_space<vmem>>, vector<2x1x16xf32>
    %642 = vector.shape_cast %641 : vector<2x1x16xf32> to vector<2x16xf32>
    %cst_572 = arith.constant dense<0.000000e+00> : vector<2x32xf32>
    %643 = tpu.matmul %642, %35, %cst_572 {dimension_numbers = #tpu.dot_dimension_numbers<[1], [0], [0], [1], [0, 0, 1, 1], [], []>} : vector<2x16xf32>, vector<16x32xf32>, vector<2x32xf32> -> vector<2x32xf32>
    %644 = arith.addf %640, %643 : vector<2x32xf32>
    %c0_573 = arith.constant 0 : index
    %c55 = arith.constant 55 : index
    %c0_574 = arith.constant 0 : index
    %645 = vector.load %arg13[%c0_573, %c55, %c0_574] : memref<2x64x16xf32, #tpu.memory_space<vmem>>, vector<2x1x16xf32>
    %646 = vector.shape_cast %645 : vector<2x1x16xf32> to vector<2x16xf32>
    %cst_575 = arith.constant dense<0.000000e+00> : vector<2x32xf32>
    %647 = tpu.matmul %646, %36, %cst_575 {dimension_numbers = #tpu.dot_dimension_numbers<[1], [0], [0], [1], [0, 0, 1, 1], [], []>} : vector<2x16xf32>, vector<16x32xf32>, vector<2x32xf32> -> vector<2x32xf32>
    %648 = arith.addf %644, %647 : vector<2x32xf32>
    %c0_576 = arith.constant 0 : index
    %c60_577 = arith.constant 60 : index
    %c0_578 = arith.constant 0 : index
    %649 = vector.load %arg13[%c0_576, %c60_577, %c0_578] : memref<2x64x16xf32, #tpu.memory_space<vmem>>, vector<2x1x16xf32>
    %650 = vector.shape_cast %649 : vector<2x1x16xf32> to vector<2x16xf32>
    %cst_579 = arith.constant dense<0.000000e+00> : vector<2x32xf32>
    %651 = tpu.matmul %650, %37, %cst_579 {dimension_numbers = #tpu.dot_dimension_numbers<[1], [0], [0], [1], [0, 0, 1, 1], [], []>} : vector<2x16xf32>, vector<16x32xf32>, vector<2x32xf32> -> vector<2x32xf32>
    %652 = arith.addf %648, %651 : vector<2x32xf32>
    %c0_580 = arith.constant 0 : index
    %c61_581 = arith.constant 61 : index
    %c0_582 = arith.constant 0 : index
    %653 = vector.load %arg13[%c0_580, %c61_581, %c0_582] : memref<2x64x16xf32, #tpu.memory_space<vmem>>, vector<2x1x16xf32>
    %654 = vector.shape_cast %653 : vector<2x1x16xf32> to vector<2x16xf32>
    %cst_583 = arith.constant dense<0.000000e+00> : vector<2x32xf32>
    %655 = tpu.matmul %654, %38, %cst_583 {dimension_numbers = #tpu.dot_dimension_numbers<[1], [0], [0], [1], [0, 0, 1, 1], [], []>} : vector<2x16xf32>, vector<16x32xf32>, vector<2x32xf32> -> vector<2x32xf32>
    %656 = arith.addf %652, %655 : vector<2x32xf32>
    %c0_584 = arith.constant 0 : index
    %c62 = arith.constant 62 : index
    %c0_585 = arith.constant 0 : index
    %657 = vector.load %arg13[%c0_584, %c62, %c0_585] : memref<2x64x16xf32, #tpu.memory_space<vmem>>, vector<2x1x16xf32>
    %658 = vector.shape_cast %657 : vector<2x1x16xf32> to vector<2x16xf32>
    %cst_586 = arith.constant dense<0.000000e+00> : vector<2x32xf32>
    %659 = tpu.matmul %658, %39, %cst_586 {dimension_numbers = #tpu.dot_dimension_numbers<[1], [0], [0], [1], [0, 0, 1, 1], [], []>} : vector<2x16xf32>, vector<16x32xf32>, vector<2x32xf32> -> vector<2x32xf32>
    %660 = arith.addf %656, %659 : vector<2x32xf32>
    %c0_587 = arith.constant 0 : index
    %c63 = arith.constant 63 : index
    %c0_588 = arith.constant 0 : index
    %661 = vector.load %arg13[%c0_587, %c63, %c0_588] : memref<2x64x16xf32, #tpu.memory_space<vmem>>, vector<2x1x16xf32>
    %662 = vector.shape_cast %661 : vector<2x1x16xf32> to vector<2x16xf32>
    %cst_589 = arith.constant dense<0.000000e+00> : vector<2x32xf32>
    %663 = tpu.matmul %662, %40, %cst_589 {dimension_numbers = #tpu.dot_dimension_numbers<[1], [0], [0], [1], [0, 0, 1, 1], [], []>} : vector<2x16xf32>, vector<16x32xf32>, vector<2x32xf32> -> vector<2x32xf32>
    %664 = arith.addf %660, %663 : vector<2x32xf32>
    %665 = vector.broadcast %41 : vector<1x32xf32> to vector<2x32xf32>
    %666 = arith.addf %664, %665 : vector<2x32xf32>
    %cst_590 = arith.constant 0.000000e+00 : f32
    %667 = vector.broadcast %cst_590 : f32 to vector<2x32xf32>
    %668 = arith.maximumf %666, %667 : vector<2x32xf32>
    %c256 = arith.constant 256 : index
    %c0_591 = arith.constant 0 : index
    %669 = vector.load %arg7[%c256, %c0_591] : memref<288x64xf32, #tpu.memory_space<vmem>>, vector<32x64xf32>
    %cst_592 = arith.constant dense<0.000000e+00> : vector<2x64xf32>
    %670 = tpu.matmul %668, %669, %cst_592 {dimension_numbers = #tpu.dot_dimension_numbers<[1], [0], [0], [1], [0, 0, 1, 1], [], []>} : vector<2x32xf32>, vector<32x64xf32>, vector<2x64xf32> -> vector<2x64xf32>
    %671 = arith.addf %601, %670 : vector<2x64xf32>
    %c0_593 = arith.constant 0 : index
    %c0_594 = arith.constant 0 : index
    %672 = vector.load %arg9[%c0_593, %c0_594] : memref<1x64xf32, #tpu.memory_space<vmem>>, vector<1x64xf32>
    %673 = vector.broadcast %672 : vector<1x64xf32> to vector<2x64xf32>
    %674 = arith.addf %671, %673 : vector<2x64xf32>
    %cst_595 = arith.constant 0.000000e+00 : f32
    %675 = vector.broadcast %cst_595 : f32 to vector<2x64xf32>
    %676 = arith.maximumf %674, %675 : vector<2x64xf32>
    %c0_596 = arith.constant 0 : index
    %c0_597 = arith.constant 0 : index
    %677 = vector.load %arg10[%c0_596, %c0_597] : memref<1x64xf32, #tpu.memory_space<vmem>>, vector<1x64xf32>
    %678 = vector.broadcast %677 : vector<1x64xf32> to vector<2x64xf32>
    %679 = arith.mulf %676, %678 : vector<2x64xf32>
    %cst_598 = arith.constant dense<0.000000e+00> : vector<2xf32>
    %680 = vector.multi_reduction <add>, %679, %cst_598 [1] : vector<2x64xf32> to vector<2xf32>
    %681 = vector.shape_cast %680 : vector<2xf32> to vector<2x1xf32>
    %c0_599 = arith.constant 0 : index
    %c0_600 = arith.constant 0 : index
    %682 = vector.load %arg11[%c0_599, %c0_600] : memref<1x1xf32, #tpu.memory_space<vmem>>, vector<1x1xf32>
    %683 = vector.broadcast %682 : vector<1x1xf32> to vector<2x1xf32>
    %684 = arith.addf %681, %683 : vector<2x1xf32>
    %c0_601 = arith.constant 0 : index
    %c0_602 = arith.constant 0 : index
    %685 = vector.load %arg12[%c0_601, %c0_602] : memref<2x1xf32, #tpu.memory_space<vmem>>, vector<2x1xf32>
    tpu.vector_store %arg12[%c0_601, %c0_602], %684 {strides = array<i32>} : memref<2x1xf32, #tpu.memory_space<vmem>>, vector<2x1xf32>,
    return
  }
  func.func @transform_0(%arg0: i32) -> (i32, i32, i32) {
    %c0_i32 = arith.constant 0 : i32
    %c0_i32_0 = arith.constant 0 : i32
    %c0_i32_1 = arith.constant 0 : i32
    return %arg0, %c0_i32, %c0_i32_0 : i32, i32, i32
  }
  func.func @transform_1(%arg0: i32) -> (i32, i32) {
    %c0_i32 = arith.constant 0 : i32
    %c0_i32_0 = arith.constant 0 : i32
    return %arg0, %c0_i32 : i32, i32
  }
  func.func @transform_2(%arg0: i32) -> (i32, i32) {
    %c0_i32 = arith.constant 0 : i32
    %c0_i32_0 = arith.constant 0 : i32
    %c0_i32_1 = arith.constant 0 : i32
    return %c0_i32, %c0_i32_0 : i32, i32
  }
  func.func @transform_3(%arg0: i32) -> (i32, i32) {
    %c0_i32 = arith.constant 0 : i32
    %c0_i32_0 = arith.constant 0 : i32
    %c0_i32_1 = arith.constant 0 : i32
    return %c0_i32, %c0_i32_0 : i32, i32
  }
  func.func @transform_4(%arg0: i32) -> (i32, i32) {
    %c0_i32 = arith.constant 0 : i32
    %c0_i32_0 = arith.constant 0 : i32
    %c0_i32_1 = arith.constant 0 : i32
    return %c0_i32, %c0_i32_0 : i32, i32
  }
  func.func @transform_5(%arg0: i32) -> (i32, i32) {
    %c0_i32 = arith.constant 0 : i32
    %c0_i32_0 = arith.constant 0 : i32
    %c0_i32_1 = arith.constant 0 : i32
    return %c0_i32, %c0_i32_0 : i32, i32
  }
  func.func @transform_6(%arg0: i32) -> (i32, i32) {
    %c0_i32 = arith.constant 0 : i32
    %c0_i32_0 = arith.constant 0 : i32
    %c0_i32_1 = arith.constant 0 : i32
    return %c0_i32, %c0_i32_0 : i32, i32
  }
  func.func @transform_7(%arg0: i32) -> (i32, i32) {
    %c0_i32 = arith.constant 0 : i32
    %c0_i32_0 = arith.constant 0 : i32
    %c0_i32_1 = arith.constant 0 : i32
    return %c0_i32, %c0_i32_0 : i32, i32
  }
  func.func @transform_8(%arg0: i32) -> (i32, i32) {
    %c0_i32 = arith.constant 0 : i32
    %c0_i32_0 = arith.constant 0 : i32
    %c0_i32_1 = arith.constant 0 : i32
    return %c0_i32, %c0_i32_0 : i32, i32
  }
  func.func @transform_9(%arg0: i32) -> (i32, i32) {
    %c0_i32 = arith.constant 0 : i32
    %c0_i32_0 = arith.constant 0 : i32
    %c0_i32_1 = arith.constant 0 : i32
    return %c0_i32, %c0_i32_0 : i32, i32
  }
  func.func @transform_10(%arg0: i32) -> (i32, i32) {
    %c0_i32 = arith.constant 0 : i32
    %c0_i32_0 = arith.constant 0 : i32
    %c0_i32_1 = arith.constant 0 : i32
    return %c0_i32, %c0_i32_0 : i32, i32
  }
  func.func @transform_11(%arg0: i32) -> (i32, i32) {
    %c0_i32 = arith.constant 0 : i32
    %c0_i32_0 = arith.constant 0 : i32
    return %arg0, %c0_i32 : i32, i32
  }
}

</mosaic_0001>

<bundles_post_ra>
// kernel: critic_forward.1
= control target key start
LH: loop header
LB: loop body
LE: loop exit
PB: predicated region body
PF: predicated region fallthrough
CT: control target
= control target key end

     0   :  { %v16187_v0 = vmov 0.0|0.0   ;;  %vm87_vm0 = vcmask 523264   ;;  %vm14331_vm1 = vmmov 0   ;;  %vm225_vm2 = vcmask 130048   ;;  %s16175_s2 = inlined_call_operand.vmem [shape: f32[192,16], index: 2, kind: input, shape index: {}]   ;;  %s16176_s0 = inlined_call_operand.vmem [shape: f32[2,64,192], index: 0, kind: input, shape index: {}]   ;;  %s16177_s4 = inlined_call_operand.vmem [shape: f32[256,32], index: 4, kind: input, shape index: {}]   ;;  %s16178_s3 = inlined_call_operand.vmem [shape: f32[1,16], index: 3, kind: input, shape index: {}]   ;;  %s16179_s7 = inlined_call_operand.vmem [shape: f32[8,64], index: 7, kind: input, shape index: {}]   ;;  %s16180_s1 = inlined_call_operand.vmem [shape: f32[2,8], index: 1, kind: input, shape index: {}]   ;;  %s16181_s6 = inlined_call_operand.vmem [shape: f32[288,64], index: 6, kind: input, shape index: {}]   ;;  %s16182_s5 = inlined_call_operand.vmem [shape: f32[1,32], index: 5, kind: input, shape index: {}]   ;;  %s16183_s10 = inlined_call_operand.<no memory space> [shape: f32[1,1], index: 10, kind: input, shape index: {}]   ;;  %s16184_s8 = inlined_call_operand.vmem [shape: f32[1,64], index: 8, kind: input, shape index: {}]   ;;  %s16185_s9 = inlined_call_operand.vmem [shape: f32[1,64], index: 9, kind: input, shape index: {}]   ;;  %s16186_s11 = inlined_call_operand.vmem [shape: f32[2,1], index: 11, kind: output, shape index: {}]  }
   0x1   :  { %13804 = vmatprep.subr.bf16.mxu1 %v16187_v0  ;;  %13768 = vmatprep.subr.bf16.mxu0 %v16187_v0  ;;  %v40_v1 = vld [vmem:[%s16175_s2] sm:$0xff]  ;;  %v41_v2 = vld [vmem:[%s16175_s2 + $0x8] sm:$0xff]  ;;  %v42_v3 = vld [vmem:[%s16175_s2 + $0x10] sm:$0xff]  ;;  %vm439_vm3 = vcmask 1041409   ;;  %vm1781_vm4 = vcmask 64512   ;;  %vm1707_vm5 = vcmask 261120  }
   0x2   :  { %v13769_v4 = vpack.c.bf16 %v41_v2, %v40_v1  ;;  %v43_v5 = vld [vmem:[%s16175_s2 + $0x18] sm:$0xff]  ;;  %v44_v7 = vld [vmem:[%s16175_s2 + $0x20] sm:$0xff]  ;;  %v45_v8 = vld [vmem:[%s16175_s2 + $0x28] sm:$0xff]  ;;  %vm11968_vm6 = vcmask 517120   ;;  %vm11980_vm7 = vcmask 1024  }
   0x3   :  { %v13772_v6 = vpack.c.bf16 %v43_v5, %v42_v3  ;;  %v13775_v9 = vpack.c.bf16 %v45_v8, %v44_v7  ;;  %v46_v10 = vld [vmem:[%s16175_s2 + $0x30] sm:$0xff]  ;;  %v47_v11 = vld [vmem:[%s16175_s2 + $0x38] sm:$0xff]  ;;  %v11996_v12 = vld [vmem:[%s16176_s0 + $0x88] sm:$0xff] }
   0x4   :  { %13806 = vmatpush1.bf16.msra.mxu1 %v13769_v4  ;;  %13770 = vmatpush1.bf16.msra.mxu0 %v13769_v4  ;;  %v66_v13 = vld [vmem:[%s16176_s0 + $0x8] sm:$0xff]  ;;  %v13778_v14 = vpack.c.bf16 %v47_v11, %v46_v10  ;;  %v48_v15 = vld [vmem:[%s16175_s2 + $0x40] sm:$0xff]  ;;  %v50_v18 = vld [vmem:[%s16175_s2 + $0x50] sm:$0xff] }
   0x5   :  { %13807 = vmatprep.subr.bf16.mxu1 %v16187_v0  ;;  %13771 = vmatprep.subr.bf16.mxu0 %v16187_v0  ;;  %v49_v16 = vld [vmem:[%s16175_s2 + $0x48] sm:$0xff]  ;;  %v51_v19 = vld [vmem:[%s16175_s2 + $0x58] sm:$0xff]  ;;  %v52_v21 = vld [vmem:[%s16175_s2 + $0x60] sm:$0xff] }
   0x6   :  { %12011 = vmatprep.mubr.msk.f32.mxu1 %vm87_vm0, %v11996_v12  ;;  %11987 = vmatprep.mubr.msk.f32.mxu0 %vm87_vm0, %v66_v13  ;;  %v13781_v17 = vpack.c.bf16 %v49_v16, %v48_v15  ;;  %v13784_v20 = vpack.c.bf16 %v51_v19, %v50_v18  ;;  %v53_v22 = vld [vmem:[%s16175_s2 + $0x68] sm:$0xff]  ;;  %v54_v24 = vld [vmem:[%s16175_s2 + $0x70] sm:$0xff]  ;;  %v55_v25 = vld [vmem:[%s16175_s2 + $0x78] sm:$0xff]  ;;  %v16189_v12 = vmov 0.0  }
   0x7   :  { %v13787_v23 = vpack.c.bf16 %v53_v22, %v52_v21  ;;  %v13790_v26 = vpack.c.bf16 %v55_v25, %v54_v24  ;;  %v56_v27 = vld [vmem:[%s16175_s2 + $0x80] sm:$0xff]  ;;  %v57_v28 = vld [vmem:[%s16175_s2 + $0x88] sm:$0xff]  ;;  %v58_v30 = vld [vmem:[%s16175_s2 + $0x90] sm:$0xff] }
   0x8   :  { %13809 = vmatpush1.bf16.msra.mxu1 %v13772_v6  ;;  %13773 = vmatpush1.bf16.msra.mxu0 %v13772_v6  ;;  %v13793_v29 = vpack.c.bf16 %v57_v28, %v56_v27  ;;  %v59_v31 = vld [vmem:[%s16175_s2 + $0x98] sm:$0xff]  ;;  %v60_v33 = vld [vmem:[%s16175_s2 + $0xa0] sm:$0xff]  ;;  %v61_v34 = vld [vmem:[%s16175_s2 + $0xa8] sm:$0xff] }
   0x9   :  { %13810 = vmatprep.subr.bf16.mxu1 %v16187_v0  ;;  %13774 = vmatprep.subr.bf16.mxu0 %v16187_v0  ;;  %v13796_v32 = vpack.c.bf16 %v59_v31, %v58_v30  ;;  %v13799_v35 = vpack.c.bf16 %v61_v34, %v60_v33  ;;  %v62_v36 = vld [vmem:[%s16175_s2 + $0xb0] sm:$0xff]  ;;  %v63_v37 = vld [vmem:[%s16175_s2 + $0xb8] sm:$0xff]  ;;  %v399_v41 = vld [vmem:[%s16177_s4] sm:$0xff] }
   0xa   :  { %v13802_v38 = vpack.c.bf16 %v63_v37, %v62_v36  ;;  %v401_v39 = vld [vmem:[%s16177_s4 + $0x10] sm:$0xff]  ;;  %v402_v40 = vld [vmem:[%s16177_s4 + $0x18] sm:$0xff]  ;;  %v400_v42 = vld [vmem:[%s16177_s4 + $0x8] sm:$0xff] }
   0xb   :  { %v11995_v43 = vld [vmem:[%s16176_s0 + $0x80] sm:$0xff]  ;;  %v11998_v45 = vld [vmem:[%s16176_s0 + $0x98] sm:$0xff]  ;;  %v14522_v47 = vpack.c.bf16 %v402_v40, %v401_v39  ;;  %v14525_v48 = vpack.c.bf16 %v400_v42, %v399_v41  ;;  %v11997_v49 = vld [vmem:[%s16176_s0 + $0x90] sm:$0xff] }
   0xc   :  { %13812 = vmatpush1.bf16.msra.mxu1 %v13775_v9  ;;  %13776 = vmatpush1.bf16.msra.mxu0 %v13775_v9  ;;  %v65_v44 = vld [vmem:[%s16176_s0] sm:$0xff]  ;;  %v68_v46 = vld [vmem:[%s16176_s0 + $0x18] sm:$0xff]  ;;  %v67_v50 = vld [vmem:[%s16176_s0 + $0x10] sm:$0xff] }
   0xd   :  { %13813 = vmatprep.subr.bf16.mxu1 %v16187_v0  ;;  %13777 = vmatprep.subr.bf16.mxu0 %v16187_v0  ;;  %v12000_v51 = vld [vmem:[%s16176_s0 + $0xa8] sm:$0xff]  ;;  %v11999_v53 = vld [vmem:[%s16176_s0 + $0xa0] sm:$0xff]  ;;  %v12002_v55 = vld [vmem:[%s16176_s0 + $0xb8] sm:$0xff] }
   0xe   :  { %v70_v52 = vld [vmem:[%s16176_s0 + $0x28] sm:$0xff]  ;;  %v69_v54 = vld [vmem:[%s16176_s0 + $0x20] sm:$0xff]  ;;  %v72_v56 = vld [vmem:[%s16176_s0 + $0x38] sm:$0xff] }
   0xf   :  { %v12001_v57 = vld [vmem:[%s16176_s0 + $0xb0] sm:$0xff]  ;;  %v12004_v59 = vld [vmem:[%s16176_s0 + $0xc8] sm:$0xff]  ;;  %v12003_v61 = vld [vmem:[%s16176_s0 + $0xc0] sm:$0xff] }
  0x10   :  { %13815 = vmatpush1.bf16.msra.mxu1 %v13778_v14  ;;  %13779 = vmatpush1.bf16.msra.mxu0 %v13778_v14  ;;  %v71_v58 = vld [vmem:[%s16176_s0 + $0x30] sm:$0xff]  ;;  %v74_v60 = vld [vmem:[%s16176_s0 + $0x48] sm:$0xff]  ;;  %v73_v62 = vld [vmem:[%s16176_s0 + $0x40] sm:$0xff] }
  0x11   :  { %13816 = vmatprep.subr.bf16.mxu1 %v16187_v0  ;;  %13780 = vmatprep.subr.bf16.mxu0 %v16187_v0  ;;  %v12006_v63 = vld [vmem:[%s16176_s0 + $0xd8] sm:$0xff]  ;;  %v12005_v2 = vld [vmem:[%s16176_s0 + $0xd0] sm:$0xff]  ;;  %v12008_v4 = vld [vmem:[%s16176_s0 + $0xe8] sm:$0xff] }
  0x12   :  { %v76_v1 = vld [vmem:[%s16176_s0 + $0x58] sm:$0xff]  ;;  %v75_v3 = vld [vmem:[%s16176_s0 + $0x50] sm:$0xff]  ;;  %v78_v5 = vld [vmem:[%s16176_s0 + $0x68] sm:$0xff] }
  0x13   :  { %v12007_v6 = vld [vmem:[%s16176_s0 + $0xe0] sm:$0xff]  ;;  %v12010_v8 = vld [vmem:[%s16176_s0 + $0xf8] sm:$0xff]  ;;  %v12009_v10 = vld [vmem:[%s16176_s0 + $0xf0] sm:$0xff] }
  0x14   :  { %13818 = vmatpush1.bf16.msra.mxu1 %v13781_v17  ;;  %13782 = vmatpush1.bf16.msra.mxu0 %v13781_v17  ;;  %v77_v7 = vld [vmem:[%s16176_s0 + $0x60] sm:$0xff]  ;;  %v80_v9 = vld [vmem:[%s16176_s0 + $0x78] sm:$0xff]  ;;  %v79_v11 = vld [vmem:[%s16176_s0 + $0x70] sm:$0xff] }
  0x15   :  { %13819 = vmatprep.subr.bf16.mxu1 %v16187_v0  ;;  %13783 = vmatprep.subr.bf16.mxu0 %v16187_v0  ;;  %v14630_v13 = vld [vmem:[%s16178_s3] ss:$0 sm:$0xff]  ;;  %v404_v37 = vld [vmem:[%s16177_s4 + $0x28] sm:$0xff]  ;;  %v405_v40 = vld [vmem:[%s16177_s4 + $0x30] sm:$0xff] }
  0x16   :  { %v403_v36 = vld [vmem:[%s16177_s4 + $0x20] sm:$0xff]  ;;  %v406_v41 = vld [vmem:[%s16177_s4 + $0x38] sm:$0xff] }
  0x18   :  { %13821 = vmatpush1.bf16.msra.mxu1 %v13784_v20  ;;  %13785 = vmatpush1.bf16.msra.mxu0 %v13784_v20 }
  0x19   :  { %13822 = vmatprep.subr.bf16.mxu1 %v16187_v0  ;;  %13786 = vmatprep.subr.bf16.mxu0 %v16187_v0 }
  0x1c   :  { %13824 = vmatpush1.bf16.msra.mxu1 %v13787_v23  ;;  %13788 = vmatpush1.bf16.msra.mxu0 %v13787_v23 }
  0x1d   :  { %13825 = vmatprep.subr.bf16.mxu1 %v16187_v0  ;;  %13789 = vmatprep.subr.bf16.mxu0 %v16187_v0 }
  0x20   :  { %13827 = vmatpush1.bf16.msra.mxu1 %v13790_v26  ;;  %13791 = vmatpush1.bf16.msra.mxu0 %v13790_v26 }
  0x21   :  { %13828 = vmatprep.subr.bf16.mxu1 %v16187_v0  ;;  %13792 = vmatprep.subr.bf16.mxu0 %v16187_v0 }
  0x24   :  { %13830 = vmatpush1.bf16.msra.mxu1 %v13793_v29  ;;  %13794 = vmatpush1.bf16.msra.mxu0 %v13793_v29 }
  0x25   :  { %13831 = vmatprep.subr.bf16.mxu1 %v16187_v0  ;;  %13795 = vmatprep.subr.bf16.mxu0 %v16187_v0 }
  0x28   :  { %13833 = vmatpush1.bf16.msra.mxu1 %v13796_v32  ;;  %13797 = vmatpush1.bf16.msra.mxu0 %v13796_v32 }
  0x29   :  { %13834 = vmatprep.subr.bf16.mxu1 %v16187_v0  ;;  %13798 = vmatprep.subr.bf16.mxu0 %v16187_v0 }
  0x2c   :  { %13836 = vmatpush1.bf16.msra.mxu1 %v13799_v35  ;;  %13800 = vmatpush1.bf16.msra.mxu0 %v13799_v35 }
  0x2d   :  { %13837 = vmatprep.subr.bf16.mxu1 %v16187_v0  ;;  %13801 = vmatprep.subr.bf16.mxu0 %v16187_v0 }
  0x30   :  { %13839 = vmatpush1.bf16.msra.mxu1 %v13802_v38  ;;  %13803 = vmatpush1.bf16.msra.mxu0 %v13802_v38 }
  0x31   :  { %13840 = vmatprep.subr.bf16.mxu0 %v16187_v0  ;;  %13843 = vmatprep.subr.bf16.mxu1 %v16187_v0 }
  0x33   :  { %340 = vmatmul.mubr.f32.vlgmr.msra.gmra.mrb[0].mxu1 %v11995_v43  ;;  %177 = vmatmul.mubr.f32.vlgmr.msra.gmra.mrb[0].mxu0 %v65_v44 }
  0x34   :  { %12012 = vmatprep.mubr.msk.f32.mxu1 %vm87_vm0, %v11998_v45  ;;  %11988 = vmatprep.mubr.msk.f32.mxu0 %vm87_vm0, %v68_v46 }
  0x35   :  { %13842 = vmatpush3.bf16.msra.mxu0 %v14522_v47  ;;  %13845 = vmatpush3.bf16.msra.mxu1 %v14525_v48 }
  0x36   :  { %13846 = vmatprep.subr.bf16.mxu0 %v16187_v0  ;;  %13849 = vmatprep.subr.bf16.mxu1 %v16187_v0 }
  0x37   :  { %345 = vmatmul.mubr.f32.gmra.mrb[2].mxu1 %v11997_v49  ;;  %182 = vmatmul.mubr.f32.gmra.mrb[2].mxu0 %v67_v50  ;;  %v14655_v49 = vpack.c.bf16 %v404_v37, %v403_v36  ;;  %v415_v36 = vld [vmem:[%s16177_s4 + $0x80] sm:$0xff]  ;;  %v416_v37 = vld [vmem:[%s16177_s4 + $0x88] sm:$0xff] }
  0x38   :  { %12013 = vmatprep.mubr.msk.f32.mxu1 %vm87_vm0, %v12000_v51  ;;  %11989 = vmatprep.mubr.msk.f32.mxu0 %vm87_vm0, %v70_v52  ;;  %v14658_v52 = vpack.c.bf16 %v406_v41, %v405_v40  ;;  %v417_v41 = vld [vmem:[%s16177_s4 + $0x90] sm:$0xff] }
  0x3b   :  { %350 = vmatmul.mubr.f32.gmra.mrb[4].mxu1 %v11999_v53  ;;  %187 = vmatmul.mubr.f32.gmra.mrb[4].mxu0 %v69_v54  ;;  %v407_v54 = vld [vmem:[%s16177_s4 + $0x40] sm:$0xff] }
  0x3c   :  { %12014 = vmatprep.mubr.msk.f32.mxu1 %vm87_vm0, %v12002_v55  ;;  %11990 = vmatprep.mubr.msk.f32.mxu0 %vm87_vm0, %v72_v56  ;;  %v408_v55 = vld [vmem:[%s16177_s4 + $0x48] sm:$0xff] }
  0x3f   :  { %355 = vmatmul.mubr.f32.gmra.mrb[6].mxu1 %v12001_v57  ;;  %192 = vmatmul.mubr.f32.gmra.mrb[6].mxu0 %v71_v58 }
  0x40   :  { %12015 = vmatprep.mubr.msk.f32.mxu1 %vm87_vm0, %v12004_v59  ;;  %11991 = vmatprep.mubr.msk.f32.mxu0 %vm87_vm0, %v74_v60 }
  0x43   :  { %360 = vmatmul.mubr.f32.gmra.mrb[8].mxu1 %v12003_v61  ;;  %197 = vmatmul.mubr.f32.gmra.mrb[8].mxu0 %v73_v62  ;;  %v409_v61 = vld [vmem:[%s16177_s4 + $0x50] sm:$0xff]  ;;  %v410_v62 = vld [vmem:[%s16177_s4 + $0x58] sm:$0xff] }
  0x44   :  { %12016 = vmatprep.mubr.msk.f32.mxu1 %vm87_vm0, %v12006_v63  ;;  %11992 = vmatprep.mubr.msk.f32.mxu0 %vm87_vm0, %v76_v1 }
  0x47   :  { %365 = vmatmul.mubr.f32.gmra.mrb[10].mxu1 %v12005_v2  ;;  %202 = vmatmul.mubr.f32.gmra.mrb[10].mxu0 %v75_v3 }
  0x48   :  { %12017 = vmatprep.mubr.msk.f32.mxu1 %vm87_vm0, %v12008_v4  ;;  %11993 = vmatprep.mubr.msk.f32.mxu0 %vm87_vm0, %v78_v5 }
  0x4b   :  { %370 = vmatmul.mubr.f32.gmra.mrb[12].mxu1 %v12007_v6  ;;  %207 = vmatmul.mubr.f32.gmra.mrb[12].mxu0 %v77_v7 }
  0x4c   :  { %12018 = vmatprep.mubr.msk.f32.mxu1 %vm87_vm0, %v12010_v8  ;;  %11994 = vmatprep.mubr.msk.f32.mxu0 %vm87_vm0, %v80_v9  ;;  %v14679_v8 = vpack.c.bf16 %v408_v55, %v407_v54 }
  0x4f   :  { %375 = vmatmul.mubr.f32.gmra.mrb[14].mxu1 %v12009_v10  ;;  %212 = vmatmul.mubr.f32.gmra.mrb[14].mxu0 %v79_v11 }
  0x50   :  { %12660 = vmatprep.mubr.msk.f32.mxu0 %vm14331_vm1, %v16189_v12  ;;  %12667 = vmatprep.mubr.msk.f32.mxu1 %vm14331_vm1, %v16189_v12 }
 0x106   :  { %v341_v14 = vpop.f32.mrb[0].mxu1  ;;  %v178_v15 = vpop.f32.mrb[0].mxu0 }
 0x107   :  { %v342_v16 = vadd.f32 %v14630_v13, %v341_v14  ;;  %v179_v17 = vadd.f32 %v14630_v13, %v178_v15  ;;  %v343_v18 = vpop.f32.mrb[1].mxu1  ;;  %v180_v19 = vpop.f32.mrb[1].mxu0  ;;  %v14684_v14 = vpack.c.bf16 %v410_v62, %v409_v61  ;;  %v421_v62 = vld [vmem:[%s16177_s4 + $0xb0] sm:$0xff] }
 0x108   :  { %v412_v18 = vld [vmem:[%s16177_s4 + $0x68] sm:$0xff] }
 0x109   :  { %v380_v20 = vmax.f32 %v342_v16, 0.0  ;;  %v217_v21 = vmax.f32 %v179_v17, 0.0  ;;  %v411_v17 = vld [vmem:[%s16177_s4 + $0x60] sm:$0xff] }
 0x10a   :  { %v346_v22 = vpop.f32.mrb[2].mxu1  ;;  %v183_v23 = vpop.f32.mrb[2].mxu0 }
 0x10b   :  { %389 = vst.msk [vmem:[#allocation2 + $0x40] sm:$0xff] %vm225_vm2, %v380_v20  ;;  %226 = vst.msk [vmem:[#allocation2] sm:$0xff] %vm225_vm2, %v217_v21  ;;  %v347_v24 = vadd.f32 %v14630_v13, %v346_v22  ;;  %v348_v25 = vpop.f32.mrb[3].mxu1  ;;  %v184_v26 = vadd.f32 %v14630_v13, %v183_v23  ;;  %v185_v27 = vpop.f32.mrb[3].mxu0  ;;  %v413_v22 = vld [vmem:[%s16177_s4 + $0x70] sm:$0xff]  ;;  %v414_v23 = vld [vmem:[%s16177_s4 + $0x78] sm:$0xff] }
 0x10d   :  { %v381_v28 = vmax.f32 %v347_v24, 0.0  ;;  %v218_v29 = vmax.f32 %v184_v26, 0.0 }
 0x10e   :  { %v351_v30 = vpop.f32.mrb[4].mxu1  ;;  %v188_v31 = vpop.f32.mrb[4].mxu0 }
 0x10f   :  { %390 = vst.msk [vmem:[#allocation2 + $0x48] sm:$0xff] %vm225_vm2, %v381_v28  ;;  %227 = vst.msk [vmem:[#allocation2 + $0x8] sm:$0xff] %vm225_vm2, %v218_v29  ;;  %v352_v32 = vadd.f32 %v14630_v13, %v351_v30  ;;  %v353_v33 = vpop.f32.mrb[5].mxu1  ;;  %v189_v34 = vadd.f32 %v14630_v13, %v188_v31  ;;  %v190_v35 = vpop.f32.mrb[5].mxu0  ;;  %v14717_v30 = vpack.c.bf16 %v412_v18, %v411_v17  ;;  %v426_v17 = vld [vmem:[%s16177_s4 + $0xd8] sm:$0xff] }
 0x110   :  { %v14724_v35 = vpack.c.bf16 %v414_v23, %v413_v22 }
 0x111   :  { %v382_v38 = vmax.f32 %v352_v32, 0.0  ;;  %v219_v39 = vmax.f32 %v189_v34, 0.0 }
 0x112   :  { %v434_v42 = vld [vmem:[#allocation2 + $0x1] sm:$0x1]  ;;  %v432_v45 = vld [vmem:[#allocation2] sm:$0x1]  ;;  %v356_v50 = vpop.f32.mrb[6].mxu1  ;;  %v193_v63 = vpop.f32.mrb[6].mxu0 }
 0x113   :  { %v435_v43 = vld [vmem:[#allocation2 + $0x41] sm:$0x1]  ;;  %391 = vst.msk [vmem:[#allocation2 + $0x50] sm:$0xff] %vm225_vm2, %v382_v38  ;;  %v433_v46 = vld [vmem:[#allocation2 + $0x40] sm:$0x1]  ;;  %228 = vst.msk [vmem:[#allocation2 + $0x10] sm:$0xff] %vm225_vm2, %v219_v39  ;;  %v357_v56 = vadd.f32 %v14630_v13, %v356_v50  ;;  %v194_v6 = vadd.f32 %v14630_v13, %v193_v63 }
 0x114   :  { %v438_v44 = vrot.slane %v435_v43, 7  ;;  %v515_v51 = vrot.slane %v433_v46, 7  ;;  %v590_v53 = vld [vmem:[#allocation2 + $0x42] sm:$0x1]  ;;  %v358_v57 = vpop.f32.mrb[7].mxu1  ;;  %v195_v11 = vpop.f32.mrb[7].mxu0 }
 0x115   :  { %v593_v59 = vrot.slane %v590_v53, 7  ;;  %v669_v60 = vld [vmem:[#allocation2 + $0x43] sm:$0x1]  ;;  %v589_v2 = vld [vmem:[#allocation2 + $0x2] sm:$0x1]  ;;  %v383_v4 = vmax.f32 %v357_v56, 0.0  ;;  %v14746_v53 = vpack.c.bf16 %v416_v37, %v415_v36 }
 0x116   :  { %v440_v58 = vsel %vm439_vm3, %v438_v44, %v434_v42  ;;  %v516_v1 = vsel %vm439_vm3, %v515_v51, %v432_v45  ;;  %v672_v3 = vrot.slane %v669_v60, 7  ;;  %v748_v5 = vld [vmem:[#allocation2 + $0x48] sm:$0x1]  ;;  %v668_v7 = vld [vmem:[#allocation2 + $0x3] sm:$0x1]  ;;  %v220_v19 = vmax.f32 %v194_v6, 0.0 }
 0x117   :  { %12661 = vmatmul.mubr.msk.f32.vlgmr.msra.gmra.mrb[16].mxu0 %vm225_vm2, %v440_v58  ;;  %12668 = vmatmul.mubr.msk.f32.vlgmr.msra.gmra.mrb[16].mxu1 %vm225_vm2, %v516_v1  ;;  %v751_v9 = vrot.slane %v748_v5, 7  ;;  %v827_v10 = vld [vmem:[#allocation2 + $0x49] sm:$0x1]  ;;  %392 = vst.msk [vmem:[#allocation2 + $0x58] sm:$0xff] %vm225_vm2, %v383_v4  ;;  %v747_v15 = vld [vmem:[#allocation2 + $0x8] sm:$0x1]  ;;  %v14697_v20 = vsel %vm439_vm3, %v593_v59, %v589_v2 }
 0x118   :  { %13848 = vmatpush3.bf16.msra.mxu0 %v14655_v49  ;;  %13851 = vmatpush3.bf16.msra.mxu1 %v14658_v52  ;;  %v830_v16 = vrot.slane %v827_v10, 7  ;;  %v826_v21 = vld [vmem:[#allocation2 + $0x9] sm:$0x1]  ;;  %v361_v24 = vpop.f32.mrb[8].mxu1  ;;  %v14708_v25 = vsel %vm439_vm3, %v672_v3, %v668_v7  ;;  %229 = vst.msk [vmem:[#allocation2 + $0x18] sm:$0xff] %vm225_vm2, %v220_v19  ;;  %v198_v28 = vpop.f32.mrb[8].mxu0 }
 0x119   :  { %12674 = vmatprep.mubr.msk.f32.mxu0 %vm14331_vm1, %v16189_v12  ;;  %12681 = vmatprep.mubr.msk.f32.mxu1 %vm14331_vm1, %v16189_v12  ;;  %v906_v26 = vld [vmem:[#allocation2 + $0x4a] sm:$0x1]  ;;  %v362_v27 = vadd.f32 %v14630_v13, %v361_v24  ;;  %v752_v29 = vsel %vm439_vm3, %v751_v9, %v747_v15  ;;  %v985_v31 = vld [vmem:[#allocation2 + $0x4b] sm:$0x1]  ;;  %v199_v32 = vadd.f32 %v14630_v13, %v198_v28  ;;  %v200_v33 = vpop.f32.mrb[9].mxu0  ;;  %v418_v42 = vld [vmem:[%s16177_s4 + $0x98] sm:$0xff] }
 0x11a   :  { %13852 = vmatprep.subr.bf16.mxu0 %v16187_v0  ;;  %13855 = vmatprep.subr.bf16.mxu1 %v16187_v0  ;;  %v831_v34 = vsel %vm439_vm3, %v830_v16, %v826_v21  ;;  %v1064_v38 = vld [vmem:[#allocation2 + $0x50] sm:$0x1]  ;;  %v909_v40 = vrot.slane %v906_v26, 7  ;;  %v1143_v43 = vld [vmem:[#allocation2 + $0x51] sm:$0x1]  ;;  %v988_v46 = vrot.slane %v985_v31, 7  ;;  %v14752_v55 = vpack.c.bf16 %v418_v42, %v417_v41 }
 0x11b   :  { %12675 = vmatmul.mubr.msk.f32.vlgmr.msra.gmra.mrb[18].mxu0 %vm225_vm2, %v14697_v20  ;;  %12682 = vmatmul.mubr.msk.f32.vlgmr.msra.gmra.mrb[18].mxu1 %vm225_vm2, %v14708_v25  ;;  %v384_v39 = vmax.f32 %v362_v27, 0.0  ;;  %v221_v44 = vmax.f32 %v199_v32, 0.0  ;;  %v905_v45 = vld [vmem:[#allocation2 + $0xa] sm:$0x1]  ;;  %v363_v50 = vpop.f32.mrb[9].mxu1  ;;  %v1067_v54 = vrot.slane %v1064_v38, 7 }
 0x11c   :  { %13854 = vmatpush3.bf16.msra.mxu0 %v14679_v8  ;;  %13857 = vmatpush3.bf16.msra.mxu1 %v14684_v14  ;;  %v984_v51 = vld [vmem:[#allocation2 + $0xb] sm:$0x1]  ;;  %v1063_v56 = vld [vmem:[#allocation2 + $0x10] sm:$0x1]  ;;  %v1146_v57 = vrot.slane %v1143_v43, 7  ;;  %v419_v58 = vld [vmem:[%s16177_s4 + $0xa0] sm:$0xff]  ;;  %v14764_v60 = vsel %vm439_vm3, %v909_v40, %v905_v45 }
 0x11d   :  { %12688 = vmatprep.mubr.msk.f32.mxu0 %vm14331_vm1, %v16189_v12  ;;  %12695 = vmatprep.mubr.msk.f32.mxu1 %vm14331_vm1, %v16189_v12  ;;  %393 = vst.msk [vmem:[#allocation2 + $0x60] sm:$0xff] %vm225_vm2, %v384_v39  ;;  %230 = vst.msk [vmem:[#allocation2 + $0x20] sm:$0xff] %vm225_vm2, %v221_v44  ;;  %v420_v59 = vld [vmem:[%s16177_s4 + $0xa8] sm:$0xff]  ;;  %v1142_v61 = vld [vmem:[#allocation2 + $0x11] sm:$0x1]  ;;  %v14775_v1 = vsel %vm439_vm3, %v988_v46, %v984_v51  ;;  %v14782_v3 = vsel %vm439_vm3, %v1067_v54, %v1063_v56 }
 0x11e   :  { %13858 = vmatprep.subr.bf16.mxu0 %v16187_v0  ;;  %13861 = vmatprep.subr.bf16.mxu1 %v16187_v0  ;;  %v422_v63 = vld [vmem:[%s16177_s4 + $0xb8] sm:$0xff]  ;;  %v1222_v2 = vld [vmem:[#allocation2 + $0x52] sm:$0x1]  ;;  %v14784_v4 = vpack.c.bf16 %v420_v59, %v419_v58  ;;  %v1301_v5 = vld [vmem:[#allocation2 + $0x53] sm:$0x1]  ;;  %v14790_v6 = vsel %vm439_vm3, %v1146_v57, %v1142_v61 }
 0x11f   :  { %12689 = vmatmul.mubr.msk.f32.vlgmr.msra.gmra.mrb[20].mxu0 %vm225_vm2, %v752_v29  ;;  %12696 = vmatmul.mubr.msk.f32.vlgmr.msra.gmra.mrb[20].mxu1 %vm225_vm2, %v831_v34  ;;  %v14792_v7 = vpack.c.bf16 %v422_v63, %v421_v62  ;;  %v423_v9 = vld [vmem:[%s16177_s4 + $0xc0] sm:$0xff]  ;;  %v424_v10 = vld [vmem:[%s16177_s4 + $0xc8] sm:$0xff]  ;;  %v1380_v11 = vld [vmem:[#allocation2 + $0x58] sm:$0x1]  ;;  %v1225_v15 = vrot.slane %v1222_v2, 7  ;;  %v1304_v21 = vrot.slane %v1301_v5, 7 }
 0x120   :  { %13860 = vmatpush3.bf16.msra.mxu0 %v14717_v30  ;;  %13863 = vmatpush3.bf16.msra.mxu1 %v14724_v35  ;;  %v425_v16 = vld [vmem:[%s16177_s4 + $0xd0] sm:$0xff]  ;;  %v1459_v18 = vld [vmem:[#allocation2 + $0x59] sm:$0x1]  ;;  %v14815_v23 = vpack.c.bf16 %v424_v10, %v423_v9  ;;  %v1383_v24 = vrot.slane %v1380_v11, 7  ;;  %v1379_v27 = vld [vmem:[#allocation2 + $0x18] sm:$0x1] }
 0x121   :  { %12702 = vmatprep.mubr.msk.f32.mxu0 %vm14331_vm1, %v16189_v12  ;;  %12709 = vmatprep.mubr.msk.f32.mxu1 %vm14331_vm1, %v16189_v12  ;;  %v1221_v19 = vld [vmem:[#allocation2 + $0x12] sm:$0x1]  ;;  %v1300_v22 = vld [vmem:[#allocation2 + $0x13] sm:$0x1]  ;;  %v14820_v26 = vpack.c.bf16 %v426_v17, %v425_v16  ;;  %v1462_v28 = vrot.slane %v1459_v18, 7  ;;  %v427_v29 = vld [vmem:[%s16177_s4 + $0xe0] sm:$0xff] }
 0x122   :  { %13864 = vmatprep.subr.bf16.mxu0 %v16187_v0  ;;  %13867 = vmatprep.subr.bf16.mxu1 %v16187_v0  ;;  %v428_v31 = vld [vmem:[%s16177_s4 + $0xe8] sm:$0xff]  ;;  %v14832_v32 = vsel %vm439_vm3, %v1225_v15, %v1221_v19  ;;  %v1458_v33 = vld [vmem:[#allocation2 + $0x19] sm:$0x1]  ;;  %v429_v34 = vld [vmem:[%s16177_s4 + $0xf0] sm:$0xff]  ;;  %v14843_v37 = vsel %vm439_vm3, %v1304_v21, %v1300_v22  ;;  %v14850_v39 = vsel %vm439_vm3, %v1383_v24, %v1379_v27  ;;  %v366_v19 = vpop.f32.mrb[10].mxu1  ;;  %v203_v22 = vpop.f32.mrb[10].mxu0 }
 0x123   :  { %12703 = vmatmul.mubr.msk.f32.vlgmr.msra.gmra.mrb[22].mxu0 %vm225_vm2, %v14764_v60  ;;  %12710 = vmatmul.mubr.msk.f32.vlgmr.msra.gmra.mrb[22].mxu1 %vm225_vm2, %v14775_v1  ;;  %v430_v36 = vld [vmem:[%s16177_s4 + $0xf8] sm:$0xff]  ;;  %v14852_v40 = vpack.c.bf16 %v428_v31, %v427_v29  ;;  %v14858_v42 = vsel %vm439_vm3, %v1462_v28, %v1458_v33  ;;  %v398_v54 = vld [vmem:[%s16179_s7] sm:$0xff]  ;;  %v2296_v63 = vld [vmem:[#allocation2 + $0x4c] sm:$0x1]  ;;  %v367_v21 = vadd.f32 %v14630_v13, %v366_v19  ;;  %v368_v24 = vpop.f32.mrb[11].mxu1  ;;  %v205_v28 = vpop.f32.mrb[11].mxu0 }
 0x124   :  { %13866 = vmatpush3.bf16.msra.mxu0 %v14746_v53  ;;  %13869 = vmatpush3.bf16.msra.mxu1 %v14752_v55  ;;  %v1538_v38 = vld [vmem:[#allocation2 + $0x5a] sm:$0x1]  ;;  %v1617_v41 = vld [vmem:[#allocation2 + $0x5b] sm:$0x1]  ;;  %v14860_v43 = vpack.c.bf16 %v430_v36, %v429_v34  ;;  %v397_v57 = vld [vmem:[%s16180_s1] sm:$0x3]  ;;  %v204_v27 = vadd.f32 %v14630_v13, %v203_v22 }
 0x125   :  { %12716 = vmatprep.mubr.msk.f32.mxu0 %vm14331_vm1, %v16189_v12  ;;  %12723 = vmatprep.mubr.msk.f32.mxu1 %vm14331_vm1, %v16189_v12  ;;  %v1541_v44 = vrot.slane %v1538_v38, 7  ;;  %v1537_v45 = vld [vmem:[#allocation2 + $0x1a] sm:$0x1]  ;;  %v1620_v46 = vrot.slane %v1617_v41, 7  ;;  %v1616_v50 = vld [vmem:[#allocation2 + $0x1b] sm:$0x1] }
 0x126   :  { %13870 = vmatprep.subr.bf16.mxu0 %v16187_v0  ;;  %13873 = vmatprep.subr.bf16.mxu1 %v16187_v0  ;;  %v1996_v58 = vld [vmem:[#allocation2 + $0x44] sm:$0x1]  ;;  %v2295_v2 = vld [vmem:[#allocation2 + $0xc] sm:$0x1]  ;;  %v2596_v9 = vld [vmem:[#allocation2 + $0x54] sm:$0x1] }
 0x127   :  { %12717 = vmatmul.mubr.msk.f32.vlgmr.msra.gmra.mrb[24].mxu0 %vm225_vm2, %v14782_v3  ;;  %12724 = vmatmul.mubr.msk.f32.vlgmr.msra.gmra.mrb[24].mxu1 %vm225_vm2, %v14790_v6  ;;  %v14877_v51 = vsel %vm439_vm3, %v1541_v44, %v1537_v45  ;;  %v14886_v56 = vsel %vm439_vm3, %v1620_v46, %v1616_v50  ;;  %v1999_v59 = vrot.slane %v1996_v58, 7  ;;  %v1995_v61 = vld [vmem:[#allocation2 + $0x4] sm:$0x1]  ;;  %v2595_v10 = vld [vmem:[#allocation2 + $0x14] sm:$0x1]  ;;  %v385_v29 = vmax.f32 %v367_v21, 0.0 }
 0x128   :  { %13872 = vmatpush3.bf16.msra.mxu0 %v14784_v4  ;;  %13875 = vmatpush3.bf16.msra.mxu1 %v14792_v7  ;;  %v2896_v15 = vld [vmem:[#allocation2 + $0x5c] sm:$0x1]  ;;  %v222_v31 = vmax.f32 %v204_v27, 0.0  ;;  %v371_v33 = vpop.f32.mrb[12].mxu1  ;;  %v208_v36 = vpop.f32.mrb[12].mxu0 }
 0x129   :  { %12730 = vmatprep.mubr.msk.f32.mxu0 %vm14331_vm1, %v16189_v12  ;;  %12737 = vmatprep.mubr.msk.f32.mxu1 %vm14331_vm1, %v16189_v12  ;;  %v14910_v62 = vsel %vm439_vm3, %v1999_v59, %v1995_v61  ;;  %v2899_v16 = vrot.slane %v2896_v15, 7  ;;  %v2895_v17 = vld [vmem:[#allocation2 + $0x1c] sm:$0x1]  ;;  %394 = vst.msk [vmem:[#allocation2 + $0x68] sm:$0xff] %vm225_vm2, %v385_v29  ;;  %v372_v34 = vadd.f32 %v14630_v13, %v371_v33  ;;  %v373_v38 = vpop.f32.mrb[13].mxu1  ;;  %v210_v44 = vpop.f32.mrb[13].mxu0 }
 0x12a   :  { %13876 = vmatprep.subr.bf16.mxu0 %v16187_v0  ;;  %13879 = vmatprep.subr.bf16.mxu1 %v16187_v0  ;;  %231 = vst.msk [vmem:[#allocation2 + $0x28] sm:$0xff] %vm225_vm2, %v222_v31  ;;  %v209_v41 = vadd.f32 %v14630_v13, %v208_v36  ;;  %v376_v50 = vpop.f32.mrb[14].mxu1 }
 0x12b   :  { %12731 = vmatmul.mubr.msk.f32.vlgmr.msra.gmra.mrb[26].mxu0 %vm225_vm2, %v14832_v32  ;;  %12738 = vmatmul.mubr.msk.f32.vlgmr.msra.gmra.mrb[26].mxu1 %vm225_vm2, %v14843_v37  ;;  %v14955_v18 = vsel %vm439_vm3, %v2899_v16, %v2895_v17  ;;  %v386_v45 = vmax.f32 %v372_v34, 0.0  ;;  %v378_v58 = vpop.f32.mrb[15].mxu1 }
 0x12c   :  { %13878 = vmatpush3.bf16.msra.mxu0 %v14815_v23  ;;  %13881 = vmatpush3.bf16.msra.mxu1 %v14820_v26  ;;  %v223_v46 = vmax.f32 %v209_v41, 0.0 }
 0x12d   :  { %12744 = vmatprep.mubr.msk.f32.mxu0 %vm14331_vm1, %v16189_v12  ;;  %12751 = vmatprep.mubr.msk.f32.mxu1 %vm14331_vm1, %v16189_v12  ;;  %395 = vst.msk [vmem:[#allocation2 + $0x70] sm:$0xff] %vm225_vm2, %v386_v45 }
 0x12e   :  { %13882 = vmatprep.subr.bf16.mxu0 %v16187_v0  ;;  %13885 = vmatprep.subr.bf16.mxu1 %v16187_v0  ;;  %232 = vst.msk [vmem:[#allocation2 + $0x30] sm:$0xff] %vm225_vm2, %v223_v46 }
 0x12f   :  { %12745 = vmatmul.mubr.msk.f32.vlgmr.msra.gmra.mrb[28].mxu0 %vm225_vm2, %v14850_v39  ;;  %12752 = vmatmul.mubr.msk.f32.vlgmr.msra.gmra.mrb[28].mxu1 %vm225_vm2, %v14858_v42 }
 0x130   :  { %13884 = vmatpush3.bf16.msra.mxu0 %v14852_v40  ;;  %13887 = vmatpush3.bf16.msra.mxu1 %v14860_v43 }
 0x131   :  { %12758 = vmatprep.mubr.msk.f32.mxu0 %vm14331_vm1, %v16189_v12  ;;  %12765 = vmatprep.mubr.msk.f32.mxu1 %vm14331_vm1, %v16189_v12 }
 0x132   :  { %12779 = vmatprep.subr.mxu1 %v16189_v12  ;;  %13888 = vmatprep.subr.bf16.mxu0 %v16187_v0 }
 0x133   :  { %12759 = vmatmul.mubr.msk.f32.vlgmr.msra.gmra.mrb[30].mxu0 %vm225_vm2, %v14877_v51  ;;  %12766 = vmatmul.mubr.msk.f32.vlgmr.msra.gmra.mrb[30].mxu1 %vm225_vm2, %v14886_v56 }
 0x134   :  { %12776 = vmatprep.mubr.msk.f32.mxu0 %vm14331_vm1, %v16189_v12  ;;  %12780 = vmatpush3.msra.mxu1 %v398_v54  ;;  %v377_v54 = vadd.f32 %v14630_v13, %v376_v50 }
 0x135   :  { %12781 = vmatprep.mubr.msk.f32.mxu1 %vm14331_vm1, %v16189_v12  ;;  %13894 = vmatprep.subr.bf16.mxu1 %v16187_v0 }
 0x137   :  { %12782 = vmatmul.mubr.msk.f32.vlgmr.msra.gmra.mrb[32].mxu1 %vm1781_vm4, %v397_v57  ;;  %v213_v57 = vpop.f32.mrb[14].mxu0 }
 0x138   :  { %13896 = vmatpush3.bf16.msra.mxu1 %v14522_v47  ;;  %12788 = vmatprep.mubr.msk.f32.mxu1 %vm14331_vm1, %v16189_v12  ;;  %v214_v59 = vadd.f32 %v14630_v13, %v213_v57  ;;  %v215_v61 = vpop.f32.mrb[15].mxu0 }
 0x139   :  { %13900 = vmatprep.subr.bf16.mxu1 %v16187_v0 }
 0x13b   :  { %12789 = vmatmul.mubr.msk.f32.vlgmr.msra.gmra.mrb[34].mxu1 %vm225_vm2, %v14708_v25  ;;  %v2299_v25 = vrot.slane %v2296_v63, 7  ;;  %v387_v63 = vmax.f32 %v377_v54, 0.0 }
 0x13c   :  { %13902 = vmatpush3.bf16.msra.mxu1 %v14655_v49  ;;  %12802 = vmatprep.mubr.msk.f32.mxu1 %vm14331_vm1, %v16189_v12 }
 0x13d   :  { %13906 = vmatprep.subr.bf16.mxu1 %v16187_v0  ;;  %v14925_v5 = vsel %vm439_vm3, %v2299_v25, %v2295_v2  ;;  %v224_v25 = vmax.f32 %v214_v59, 0.0  ;;  %396 = vst.msk [vmem:[#allocation2 + $0x78] sm:$0xff] %vm225_vm2, %v387_v63  ;;  %v1703_v2 = vld [vmem:[%s16181_s6] sm:$0xff] }
 0x13f   :  { %12803 = vmatmul.mubr.msk.f32.vlgmr.msra.gmra.mrb[36].mxu1 %vm225_vm2, %v14910_v62  ;;  %233 = vst.msk [vmem:[#allocation2 + $0x38] sm:$0xff] %vm225_vm2, %v224_v25 }
 0x140   :  { %13908 = vmatpush3.bf16.msra.mxu1 %v14679_v8  ;;  %12816 = vmatprep.mubr.msk.f32.mxu1 %vm14331_vm1, %v16189_v12 }
 0x141   :  { %13912 = vmatprep.subr.bf16.mxu1 %v16187_v0 }
 0x143   :  { %12817 = vmatmul.mubr.msk.f32.vlgmr.msra.gmra.mrb[38].mxu1 %vm225_vm2, %v14764_v60  ;;  %v2599_v60 = vrot.slane %v2596_v9, 7  ;;  %v1704_v9 = vld [vmem:[%s16181_s6 + $0x8] sm:$0xff] }
 0x144   :  { %13914 = vmatpush3.bf16.msra.mxu1 %v14717_v30  ;;  %12830 = vmatprep.mubr.msk.f32.mxu1 %vm14331_vm1, %v16189_v12  ;;  %v13889_v13 = vpack.c.bf16 %v1704_v9, %v1703_v2 }
 0x145   :  { %13918 = vmatprep.subr.bf16.mxu1 %v16187_v0  ;;  %v14940_v11 = vsel %vm439_vm3, %v2599_v60, %v2595_v10  ;;  %v1705_v60 = vld [vmem:[%s16181_s6 + $0x10] sm:$0xff]  ;;  %v1706_v10 = vld [vmem:[%s16181_s6 + $0x18] sm:$0xff] }
 0x146   :  { %13890 = vmatpush3.bf16.msra.mxu0 %v13889_v13  ;;  %v13892_v15 = vpack.c.bf16 %v1706_v10, %v1705_v60 }
 0x147   :  { %12831 = vmatmul.mubr.msk.f32.vlgmr.msra.gmra.mrb[40].mxu1 %vm225_vm2, %v14925_v5  ;;  %13891 = vmatprep.subr.bf16.mxu0 %v16187_v0 }
 0x148   :  { %13920 = vmatpush3.bf16.msra.mxu1 %v14746_v53  ;;  %12844 = vmatprep.mubr.msk.f32.mxu1 %vm14331_vm1, %v16189_v12 }
 0x149   :  { %13924 = vmatprep.subr.bf16.mxu1 %v16187_v0 }
 0x14a   :  { %13893 = vmatpush3.bf16.msra.mxu0 %v13892_v15 }
 0x14b   :  { %12845 = vmatmul.mubr.msk.f32.vlgmr.msra.gmra.mrb[42].mxu1 %vm225_vm2, %v14832_v32  ;;  %13897 = vmatprep.subr.bf16.mxu0 %v16187_v0 }
 0x14c   :  { %13926 = vmatpush3.bf16.msra.mxu1 %v14784_v4  ;;  %12858 = vmatprep.mubr.msk.f32.mxu1 %vm14331_vm1, %v16189_v12 }
 0x14d   :  { %13930 = vmatprep.subr.bf16.mxu1 %v16187_v0 }
 0x14f   :  { %12859 = vmatmul.mubr.msk.f32.vlgmr.msra.gmra.mrb[44].mxu1 %vm225_vm2, %v14940_v11 }
 0x150   :  { %13932 = vmatpush3.bf16.msra.mxu1 %v14815_v23  ;;  %12872 = vmatprep.mubr.msk.f32.mxu1 %vm14331_vm1, %v16189_v12 }
 0x151   :  { %13936 = vmatprep.subr.bf16.mxu1 %v16187_v0 }
 0x153   :  { %12873 = vmatmul.mubr.msk.f32.vlgmr.msra.gmra.mrb[46].mxu1 %vm225_vm2, %v14877_v51 }
 0x154   :  { %13938 = vmatpush3.bf16.msra.mxu1 %v14852_v40  ;;  %12886 = vmatprep.mubr.msk.f32.mxu1 %vm14331_vm1, %v16189_v12 }
 0x155   :  { %13942 = vmatprep.subr.bf16.mxu1 %v16187_v0 }
 0x157   :  { %12887 = vmatmul.mubr.msk.f32.vlgmr.msra.gmra.mrb[48].mxu1 %vm225_vm2, %v14955_v18 }
 0x158   :  { %12904 = vmatprep.mubr.msk.f32.mxu1 %vm14331_vm1, %v16189_v12 }
 0x1ea   :  { %v509_v16 = vpop.f32.mrb[16].mxu0  ;;  %v585_v17 = vpop.f32.mrb[16].mxu1 }
 0x1eb   :  { %v12662_v19 = vpop.f32.mrb[17].mxu0  ;;  %v586_v21 = vadd.f32 %v585_v17, %v509_v16  ;;  %v12669_v22 = vpop.f32.mrb[17].mxu1 }
 0x1ee   :  { %v663_v24 = vpop.f32.mrb[18].mxu0  ;;  %v742_v28 = vpop.f32.mrb[18].mxu1 }
 0x1ef   :  { %v667_v27 = vadd.f32 %v663_v24, %v586_v21  ;;  %v12676_v29 = vpop.f32.mrb[19].mxu0  ;;  %v12683_v31 = vpop.f32.mrb[19].mxu1 }
 0x1f1   :  { %v746_v33 = vadd.f32 %v742_v28, %v667_v27 }
 0x1f2   :  { %v821_v34 = vpop.f32.mrb[20].mxu0  ;;  %v900_v38 = vpop.f32.mrb[20].mxu1 }
 0x1f3   :  { %v825_v36 = vadd.f32 %v821_v34, %v746_v33  ;;  %v12690_v41 = vpop.f32.mrb[21].mxu0  ;;  %v12697_v44 = vpop.f32.mrb[21].mxu1 }
 0x1f5   :  { %v904_v45 = vadd.f32 %v900_v38, %v825_v36  ;;  %v14990_v38 = vld [vmem:[%s16182_s5] ss:$0 sm:$0xff] }
 0x1f6   :  { %v979_v46 = vpop.f32.mrb[22].mxu0  ;;  %v1058_v54 = vpop.f32.mrb[22].mxu1 }
 0x1f7   :  { %v983_v50 = vadd.f32 %v979_v46, %v904_v45  ;;  %v12704_v57 = vpop.f32.mrb[23].mxu0  ;;  %v12711_v58 = vpop.f32.mrb[23].mxu1 }
 0x1f8   :  { %v2075_v58 = vld [vmem:[#allocation2 + $0x45] sm:$0x1] }
 0x1f9   :  { %v1062_v59 = vadd.f32 %v1058_v54, %v983_v50 }
 0x1fa   :  { %v1137_v61 = vpop.f32.mrb[24].mxu0  ;;  %v1216_v25 = vpop.f32.mrb[24].mxu1 }
 0x1fb   :  { %v1141_v63 = vadd.f32 %v1137_v61, %v1062_v59  ;;  %v12718_v2 = vpop.f32.mrb[25].mxu0  ;;  %v12725_v9 = vpop.f32.mrb[25].mxu1  ;;  %v2078_v61 = vrot.slane %v2075_v58, 7  ;;  %v3353_v58 = vld [vmem:[#allocation2 + $0x47] sm:$0x1] }
 0x1fd   :  { %v1220_v60 = vadd.f32 %v1216_v25, %v1141_v63  ;;  %v2074_v25 = vld [vmem:[#allocation2 + $0x5] sm:$0x1] }
 0x1fe   :  { %v1295_v13 = vpop.f32.mrb[26].mxu0  ;;  %v1374_v15 = vpop.f32.mrb[26].mxu1  ;;  %v2079_v9 = vsel %vm439_vm3, %v2078_v61, %v2074_v25  ;;  %v3352_v61 = vld [vmem:[#allocation2 + $0x7] sm:$0x1] }
 0x1ff   :  { %v1299_v10 = vadd.f32 %v1295_v13, %v1220_v60  ;;  %v12732_v16 = vpop.f32.mrb[27].mxu0  ;;  %v12739_v17 = vpop.f32.mrb[27].mxu1  ;;  %v2375_v13 = vld [vmem:[#allocation2 + $0x4d] sm:$0x1] }
 0x200   :  { %v2374_v16 = vld [vmem:[#allocation2 + $0xd] sm:$0x1] }
 0x201   :  { %v1378_v19 = vadd.f32 %v1374_v15, %v1299_v10 }
 0x202   :  { %v1453_v21 = vpop.f32.mrb[28].mxu0  ;;  %v1532_v24 = vpop.f32.mrb[28].mxu1 }
 0x203   :  { %v1457_v22 = vadd.f32 %v1453_v21, %v1378_v19  ;;  %v12746_v27 = vpop.f32.mrb[29].mxu0  ;;  %v12753_v28 = vpop.f32.mrb[29].mxu1 }
 0x204   :  { %v2674_v28 = vld [vmem:[#allocation2 + $0x15] sm:$0x1] }
 0x205   :  { %v1536_v29 = vadd.f32 %v1532_v24, %v1457_v22  ;;  %v2675_v22 = vld [vmem:[#allocation2 + $0x55] sm:$0x1] }
 0x206   :  { %v1611_v31 = vpop.f32.mrb[30].mxu0  ;;  %v1690_v34 = vpop.f32.mrb[30].mxu1 }
 0x207   :  { %v1615_v33 = vadd.f32 %v1611_v31, %v1536_v29  ;;  %v12760_v36 = vpop.f32.mrb[31].mxu0  ;;  %v12767_v41 = vpop.f32.mrb[31].mxu1 }
 0x209   :  { %v1694_v44 = vadd.f32 %v1690_v34, %v1615_v33  ;;  %v2975_v34 = vld [vmem:[#allocation2 + $0x5d] sm:$0x1] }
 0x20a   :  { %v14993_v46 = vpop.f32.mrb[32].mxu1  ;;  %v2978_v41 = vrot.slane %v2975_v34, 7 }
 0x20b   :  { %v1701_v45 = vadd.f32 %v14990_v38, %v1694_v44  ;;  %v12783_v50 = vpop.f32.mrb[33].mxu1 }
 0x20d   :  { %v1702_v54 = vmax.f32 %v1701_v45, 0.0  ;;  %v2974_v45 = vld [vmem:[#allocation2 + $0x1d] sm:$0x1] }
 0x20e   :  { %v14995_v57 = vpop.f32.mrb[34].mxu1 }
 0x20f   :  { %12777 = vmatmul.mubr.msk.f32.vlgmr.msra.gmra.mrb[32].mxu0 %vm1707_vm5, %v1702_v54  ;;  %v12790_v59 = vpop.f32.mrb[35].mxu1  ;;  %v15062_v54 = vsel %vm439_vm3, %v2978_v41, %v2974_v45  ;;  %v5373_v41 = vld [vmem:[#allocation2 + $0x69] sm:$0x1] }
 0x210   :  { %13899 = vmatpush3.bf16.msra.mxu0 %v14525_v48  ;;  %12795 = vmatprep.mubr.msk.f32.mxu0 %vm14331_vm1, %v16189_v12  ;;  %v3356_v59 = vrot.slane %v3353_v58, 7  ;;  %v5372_v58 = vld [vmem:[#allocation2 + $0x29] sm:$0x1] }
 0x211   :  { %13903 = vmatprep.subr.bf16.mxu0 %v16187_v0 }
 0x212   :  { %v15002_v63 = vpop.f32.mrb[36].mxu1  ;;  %v3357_v25 = vsel %vm439_vm3, %v3356_v59, %v3352_v61  ;;  %v5531_v59 = vld [vmem:[#allocation2 + $0x6b] sm:$0x1] }
 0x213   :  { %12796 = vmatmul.mubr.msk.f32.vlgmr.msra.gmra.mrb[34].mxu0 %vm225_vm2, %v14697_v20  ;;  %v12804_v2 = vpop.f32.mrb[37].mxu1  ;;  %v2378_v20 = vrot.slane %v2375_v13, 7 }
 0x214   :  { %13905 = vmatpush3.bf16.msra.mxu0 %v14658_v52  ;;  %12809 = vmatprep.mubr.msk.f32.mxu0 %vm14331_vm1, %v16189_v12  ;;  %v3653_v2 = vld [vmem:[#allocation2 + $0x4f] sm:$0x1] }
 0x215   :  { %13909 = vmatprep.subr.bf16.mxu0 %v16187_v0  ;;  %v2379_v19 = vsel %vm439_vm3, %v2378_v20, %v2374_v16  ;;  %v3952_v16 = vld [vmem:[#allocation2 + $0x17] sm:$0x1] }
 0x216   :  { %v15011_v60 = vpop.f32.mrb[38].mxu1 }
 0x217   :  { %12810 = vmatmul.mubr.msk.f32.vlgmr.msra.gmra.mrb[36].mxu0 %vm225_vm2, %v2079_v9  ;;  %v12818_v10 = vpop.f32.mrb[39].mxu1 }
 0x218   :  { %13911 = vmatpush3.bf16.msra.mxu0 %v14684_v14  ;;  %12823 = vmatprep.mubr.msk.f32.mxu0 %vm14331_vm1, %v16189_v12  ;;  %v3953_v10 = vld [vmem:[#allocation2 + $0x57] sm:$0x1] }
 0x219   :  { %13915 = vmatprep.subr.bf16.mxu0 %v16187_v0  ;;  %v3956_v20 = vrot.slane %v3953_v10, 7  ;;  %v3057_v10 = vld [vmem:[%s16181_s6 + $0x30] sm:$0xff] }
 0x21a   :  { %v15018_v15 = vpop.f32.mrb[40].mxu1 }
 0x21b   :  { %12824 = vmatmul.mubr.msk.f32.vlgmr.msra.gmra.mrb[38].mxu0 %vm225_vm2, %v14775_v1  ;;  %v12832_v17 = vpop.f32.mrb[41].mxu1  ;;  %v2678_v1 = vrot.slane %v2675_v22, 7 }
 0x21c   :  { %13917 = vmatpush3.bf16.msra.mxu0 %v14724_v35  ;;  %12837 = vmatprep.mubr.msk.f32.mxu0 %vm14331_vm1, %v16189_v12  ;;  %v15105_v17 = vsel %vm439_vm3, %v3956_v20, %v3952_v16  ;;  %v3058_v20 = vld [vmem:[%s16181_s6 + $0x38] sm:$0xff] }
 0x21d   :  { %13921 = vmatprep.subr.bf16.mxu0 %v16187_v0  ;;  %v15043_v31 = vsel %vm439_vm3, %v2678_v1, %v2674_v28  ;;  %v5056_v28 = vld [vmem:[#allocation2 + $0x21] sm:$0x1]  ;;  %v13946_v16 = vpack.c.bf16 %v3058_v20, %v3057_v10  ;;  %v8984_v20 = vld [vmem:[#allocation2 + $0x33] sm:$0x1] }
 0x21e   :  { %v15027_v21 = vpop.f32.mrb[42].mxu1 }
 0x21f   :  { %12838 = vmatmul.mubr.msk.f32.vlgmr.msra.gmra.mrb[40].mxu0 %vm225_vm2, %v2379_v19  ;;  %v12846_v24 = vpop.f32.mrb[43].mxu1 }
 0x220   :  { %13923 = vmatpush3.bf16.msra.mxu0 %v14752_v55  ;;  %12851 = vmatprep.mubr.msk.f32.mxu0 %vm14331_vm1, %v16189_v12  ;;  %v4252_v24 = vld [vmem:[#allocation2 + $0x1f] sm:$0x1] }
 0x221   :  { %13927 = vmatprep.subr.bf16.mxu0 %v16187_v0 }
 0x222   :  { %v15034_v27 = vpop.f32.mrb[44].mxu1 }
 0x223   :  { %12852 = vmatmul.mubr.msk.f32.vlgmr.msra.gmra.mrb[42].mxu0 %vm225_vm2, %v14843_v37  ;;  %v12860_v29 = vpop.f32.mrb[45].mxu1 }
 0x224   :  { %13929 = vmatpush3.bf16.msra.mxu0 %v14792_v7  ;;  %12865 = vmatprep.mubr.msk.f32.mxu0 %vm14331_vm1, %v16189_v12  ;;  %v5215_v29 = vld [vmem:[#allocation2 + $0x63] sm:$0x1] }
 0x225   :  { %13933 = vmatprep.subr.bf16.mxu0 %v16187_v0  ;;  %v5218_v34 = vrot.slane %v5215_v29, 7 }
 0x226   :  { %v15045_v33 = vpop.f32.mrb[46].mxu1 }
 0x227   :  { %12866 = vmatmul.mubr.msk.f32.vlgmr.msra.gmra.mrb[44].mxu0 %vm225_vm2, %v15043_v31  ;;  %v12874_v36 = vpop.f32.mrb[47].mxu1 }
 0x228   :  { %13935 = vmatpush3.bf16.msra.mxu0 %v14820_v26  ;;  %12879 = vmatprep.mubr.msk.f32.mxu0 %vm14331_vm1, %v16189_v12  ;;  %v5214_v36 = vld [vmem:[#allocation2 + $0x23] sm:$0x1] }
 0x229   :  { %13939 = vmatprep.subr.bf16.mxu0 %v16187_v0  ;;  %v15168_v45 = vsel %vm439_vm3, %v5218_v34, %v5214_v36  ;;  %v8023_v34 = vld [vmem:[#allocation2 + $0x6f] sm:$0x1] }
 0x22a   :  { %v15053_v44 = vpop.f32.mrb[48].mxu1  ;;  %v8026_v36 = vrot.slane %v8023_v34, 7 }
 0x22b   :  { %12880 = vmatmul.mubr.msk.f32.vlgmr.msra.gmra.mrb[46].mxu0 %vm225_vm2, %v14886_v56  ;;  %v12888_v50 = vpop.f32.mrb[49].mxu1 }
 0x22c   :  { %13941 = vmatpush3.bf16.msra.mxu0 %v14860_v43  ;;  %12893 = vmatprep.mubr.msk.f32.mxu0 %vm14331_vm1, %v16189_v12  ;;  %v5376_v50 = vrot.slane %v5373_v41, 7  ;;  %v8022_v41 = vld [vmem:[#allocation2 + $0x2f] sm:$0x1] }
 0x22d   :  { %13948 = vmatprep.subr.bf16.mxu0 %v16187_v0 }
 0x22e   :  { %v15177_v61 = vsel %vm439_vm3, %v5376_v50, %v5372_v58  ;;  %v15320_v50 = vsel %vm439_vm3, %v8026_v36, %v8022_v41  ;;  %v4978_v58 = vld [vmem:[#allocation2 + $0x60] sm:$0x1]  ;;  %v5136_v41 = vld [vmem:[#allocation2 + $0x62] sm:$0x1] }
 0x22f   :  { %12894 = vmatmul.mubr.msk.f32.vlgmr.msra.gmra.mrb[48].mxu0 %vm225_vm2, %v15062_v54 }
 0x230   :  { %13950 = vmatpush3.bf16.msra.mxu0 %v14522_v47  ;;  %12911 = vmatprep.mubr.msk.f32.mxu0 %vm14331_vm1, %v16189_v12 }
 0x231   :  { %13951 = vmatprep.subr.bf16.mxu0 %v16187_v0 }
 0x233   :  { %12912 = vmatmul.mubr.msk.f32.vlgmr.msra.gmra.mrb[50].mxu0 %vm225_vm2, %v2079_v9  ;;  %v3652_v9 = vld [vmem:[#allocation2 + $0xf] sm:$0x1] }
 0x234   :  { %13953 = vmatpush3.bf16.msra.mxu0 %v14525_v48  ;;  %12918 = vmatprep.mubr.msk.f32.mxu0 %vm14331_vm1, %v16189_v12 }
 0x235   :  { %13957 = vmatprep.subr.bf16.mxu0 %v16187_v0 }
 0x237   :  { %12919 = vmatmul.mubr.msk.f32.vlgmr.msra.gmra.mrb[52].mxu0 %vm225_vm2, %v14910_v62  ;;  %v3656_v62 = vrot.slane %v3653_v2, 7  ;;  %v5530_v2 = vld [vmem:[#allocation2 + $0x2b] sm:$0x1] }
 0x238   :  { %13959 = vmatpush3.bf16.msra.mxu0 %v14658_v52  ;;  %12932 = vmatprep.mubr.msk.f32.mxu0 %vm14331_vm1, %v16189_v12 }
 0x239   :  { %13963 = vmatprep.subr.bf16.mxu0 %v16187_v0  ;;  %v3657_v13 = vsel %vm439_vm3, %v3656_v62, %v3652_v9  ;;  %v3055_v9 = vld [vmem:[%s16181_s6 + $0x20] sm:$0xff] }
 0x23b   :  { %12933 = vmatmul.mubr.msk.f32.vlgmr.msra.gmra.mrb[54].mxu0 %vm225_vm2, %v3357_v25  ;;  %v5534_v25 = vrot.slane %v5531_v59, 7  ;;  %v4981_v59 = vrot.slane %v4978_v58, 7 }
 0x23c   :  { %13965 = vmatpush3.bf16.msra.mxu0 %v14684_v14  ;;  %12946 = vmatprep.mubr.msk.f32.mxu0 %vm14331_vm1, %v16189_v12 }
 0x23d   :  { %13969 = vmatprep.subr.bf16.mxu0 %v16187_v0  ;;  %v15186_v62 = vsel %vm439_vm3, %v5534_v25, %v5530_v2  ;;  %v4977_v25 = vld [vmem:[#allocation2 + $0x20] sm:$0x1] }
 0x23e   :  { %v15335_v2 = vsel %vm439_vm3, %v4981_v59, %v4977_v25  ;;  %v5139_v59 = vrot.slane %v5136_v41, 7 }
 0x23f   :  { %12947 = vmatmul.mubr.msk.f32.vlgmr.msra.gmra.mrb[56].mxu0 %vm225_vm2, %v2379_v19  ;;  %v4253_v19 = vld [vmem:[#allocation2 + $0x5f] sm:$0x1] }
 0x240   :  { %13971 = vmatpush3.bf16.msra.mxu0 %v14724_v35  ;;  %12960 = vmatprep.mubr.msk.f32.mxu0 %vm14331_vm1, %v16189_v12  ;;  %v4256_v22 = vrot.slane %v4253_v19, 7 }
 0x241   :  { %13975 = vmatprep.subr.bf16.mxu0 %v16187_v0 }
 0x242   :  { %v15120_v1 = vsel %vm439_vm3, %v4256_v22, %v4252_v24  ;;  %v6476_v22 = vld [vmem:[#allocation2 + $0x25] sm:$0x1] }
 0x243   :  { %12961 = vmatmul.mubr.msk.f32.vlgmr.msra.gmra.mrb[58].mxu0 %vm225_vm2, %v3657_v13 }
 0x244   :  { %13977 = vmatpush3.bf16.msra.mxu0 %v14752_v55  ;;  %12974 = vmatprep.mubr.msk.f32.mxu0 %vm14331_vm1, %v16189_v12 }
 0x245   :  { %13981 = vmatprep.subr.bf16.mxu0 %v16187_v0 }
 0x247   :  { %12975 = vmatmul.mubr.msk.f32.vlgmr.msra.gmra.mrb[60].mxu0 %vm225_vm2, %v15043_v31 }
 0x248   :  { %13983 = vmatpush3.bf16.msra.mxu0 %v14792_v7  ;;  %12988 = vmatprep.mubr.msk.f32.mxu0 %vm14331_vm1, %v16189_v12 }
 0x249   :  { %13987 = vmatprep.subr.bf16.mxu0 %v16187_v0 }
 0x24b   :  { %12989 = vmatmul.mubr.msk.f32.vlgmr.msra.gmra.mrb[62].mxu0 %vm225_vm2, %v15105_v17 }
 0x24c   :  { %13989 = vmatpush3.bf16.msra.mxu0 %v14820_v26  ;;  %13002 = vmatprep.mubr.msk.f32.mxu0 %vm14331_vm1, %v16189_v12 }
 0x24d   :  { %13993 = vmatprep.subr.bf16.mxu0 %v16187_v0 }
 0x24f   :  { %13003 = vmatmul.mubr.msk.f32.vlgmr.msra.gmra.mrb[64].mxu0 %vm225_vm2, %v15062_v54 }
 0x250   :  { %13995 = vmatpush3.bf16.msra.mxu0 %v14860_v43  ;;  %13016 = vmatprep.mubr.msk.f32.mxu0 %vm14331_vm1, %v16189_v12 }
 0x251   :  { %14002 = vmatprep.subr.bf16.mxu0 %v16187_v0 }
 0x253   :  { %13017 = vmatmul.mubr.msk.f32.vlgmr.msra.gmra.mrb[66].mxu0 %vm225_vm2, %v15120_v1 }
 0x254   :  { %14004 = vmatpush3.bf16.msra.mxu0 %v14522_v47  ;;  %13034 = vmatprep.mubr.msk.f32.mxu0 %vm14331_vm1, %v16189_v12 }
 0x255   :  { %14005 = vmatprep.subr.bf16.mxu0 %v16187_v0 }
 0x257   :  { %13035 = vmatmul.mubr.msk.f32.vlgmr.msra.gmra.mrb[68].mxu0 %vm225_vm2, %v14790_v6 }
 0x258   :  { %14007 = vmatpush3.bf16.msra.mxu0 %v14525_v48  ;;  %13041 = vmatprep.mubr.msk.f32.mxu0 %vm14331_vm1, %v16189_v12 }
 0x259   :  { %14011 = vmatprep.subr.bf16.mxu0 %v16187_v0 }
 0x25b   :  { %13042 = vmatmul.mubr.msk.f32.vlgmr.msra.gmra.mrb[70].mxu0 %vm225_vm2, %v14782_v3  ;;  %v5057_v3 = vld [vmem:[#allocation2 + $0x61] sm:$0x1] }
 0x25c   :  { %14013 = vmatpush3.bf16.msra.mxu0 %v14658_v52  ;;  %13055 = vmatprep.mubr.msk.f32.mxu0 %vm14331_vm1, %v16189_v12  ;;  %v5060_v6 = vrot.slane %v5057_v3, 7  ;;  %v6777_v3 = vld [vmem:[#allocation2 + $0x6d] sm:$0x1] }
 0x25d   :  { %14017 = vmatprep.subr.bf16.mxu0 %v16187_v0 }
 0x25f   :  { %13056 = vmatmul.mubr.msk.f32.vlgmr.msra.gmra.mrb[72].mxu0 %vm225_vm2, %v14843_v37 }
 0x260   :  { %14019 = vmatpush3.bf16.msra.mxu0 %v14684_v14  ;;  %13069 = vmatprep.mubr.msk.f32.mxu0 %vm14331_vm1, %v16189_v12 }
 0x261   :  { %14023 = vmatprep.subr.bf16.mxu0 %v16187_v0 }
 0x263   :  { %13070 = vmatmul.mubr.msk.f32.vlgmr.msra.gmra.mrb[74].mxu0 %vm225_vm2, %v14858_v42  ;;  %v15159_v42 = vsel %vm439_vm3, %v5060_v6, %v5056_v28  ;;  %v6780_v6 = vrot.slane %v6777_v3, 7  ;;  %v6776_v28 = vld [vmem:[#allocation2 + $0x2d] sm:$0x1]  ;;  %v9301_v3 = vld [vmem:[#allocation2 + $0x7b] sm:$0x1] }
 0x264   :  { %14025 = vmatpush3.bf16.msra.mxu0 %v14724_v35  ;;  %13083 = vmatprep.mubr.msk.f32.mxu0 %vm14331_vm1, %v16189_v12 }
 0x265   :  { %14029 = vmatprep.subr.bf16.mxu0 %v16187_v0  ;;  %v15260_v29 = vsel %vm439_vm3, %v6780_v6, %v6776_v28  ;;  %v9304_v28 = vrot.slane %v9301_v3, 7 }
 0x267   :  { %13084 = vmatmul.mubr.msk.f32.vlgmr.msra.gmra.mrb[76].mxu0 %vm225_vm2, %v14886_v56 }
 0x268   :  { %14031 = vmatpush3.bf16.msra.mxu0 %v14752_v55  ;;  %13097 = vmatprep.mubr.msk.f32.mxu0 %vm14331_vm1, %v16189_v12 }
 0x269   :  { %14035 = vmatprep.subr.bf16.mxu0 %v16187_v0 }
 0x26b   :  { %13098 = vmatmul.mubr.msk.f32.vlgmr.msra.gmra.mrb[78].mxu0 %vm225_vm2, %v15159_v42 }
 0x26c   :  { %14037 = vmatpush3.bf16.msra.mxu0 %v14792_v7  ;;  %13111 = vmatprep.mubr.msk.f32.mxu0 %vm14331_vm1, %v16189_v12 }
 0x26d   :  { %14041 = vmatprep.subr.bf16.mxu0 %v16187_v0 }
 0x26f   :  { %13112 = vmatmul.mubr.msk.f32.vlgmr.msra.gmra.mrb[80].mxu0 %vm225_vm2, %v15168_v45 }
 0x270   :  { %14043 = vmatpush3.bf16.msra.mxu0 %v14820_v26  ;;  %13125 = vmatprep.mubr.msk.f32.mxu0 %vm14331_vm1, %v16189_v12 }
 0x271   :  { %14047 = vmatprep.subr.bf16.mxu0 %v16187_v0 }
 0x273   :  { %13126 = vmatmul.mubr.msk.f32.vlgmr.msra.gmra.mrb[82].mxu0 %vm225_vm2, %v15177_v61 }
 0x274   :  { %14049 = vmatpush3.bf16.msra.mxu0 %v14860_v43  ;;  %13139 = vmatprep.mubr.msk.f32.mxu0 %vm14331_vm1, %v16189_v12 }
 0x275   :  { %14056 = vmatprep.subr.bf16.mxu0 %v16187_v0 }
 0x277   :  { %13140 = vmatmul.mubr.msk.f32.vlgmr.msra.gmra.mrb[84].mxu0 %vm225_vm2, %v15186_v62 }
 0x278   :  { %14058 = vmatpush3.bf16.msra.mxu0 %v14522_v47  ;;  %13157 = vmatprep.mubr.msk.f32.mxu0 %vm14331_vm1, %v16189_v12 }
 0x279   :  { %14059 = vmatprep.subr.bf16.mxu0 %v16187_v0 }
 0x27b   :  { %13158 = vmatmul.mubr.msk.f32.vlgmr.msra.gmra.mrb[86].mxu0 %vm225_vm2, %v14843_v37  ;;  %v3056_v37 = vld [vmem:[%s16181_s6 + $0x28] sm:$0xff] }
 0x27c   :  { %14061 = vmatpush3.bf16.msra.mxu0 %v14525_v48  ;;  %13164 = vmatprep.mubr.msk.f32.mxu0 %vm14331_vm1, %v16189_v12  ;;  %v13943_v13 = vpack.c.bf16 %v3056_v37, %v3055_v9  ;;  %v8826_v37 = vld [vmem:[#allocation2 + $0x31] sm:$0x1] }
 0x27d   :  { %14065 = vmatprep.subr.bf16.mxu0 %v16187_v0 }
 0x27e   :  { %13944 = vmatpush3.bf16.msra.mxu1 %v13943_v13  ;;  %v8985_v13 = vld [vmem:[#allocation2 + $0x73] sm:$0x1] }
 0x27f   :  { %13165 = vmatmul.mubr.msk.f32.vlgmr.msra.gmra.mrb[88].mxu0 %vm225_vm2, %v14832_v32  ;;  %13945 = vmatprep.subr.bf16.mxu1 %v16187_v0  ;;  %v8988_v10 = vrot.slane %v8985_v13, 7 }
 0x280   :  { %14067 = vmatpush3.bf16.msra.mxu0 %v14658_v52  ;;  %13178 = vmatprep.mubr.msk.f32.mxu0 %vm14331_vm1, %v16189_v12 }
 0x281   :  { %14071 = vmatprep.subr.bf16.mxu0 %v16187_v0 }
 0x282   :  { %13947 = vmatpush3.bf16.msra.mxu1 %v13946_v16  ;;  %v9143_v16 = vld [vmem:[#allocation2 + $0x79] sm:$0x1] }
 0x283   :  { %13179 = vmatmul.mubr.msk.f32.vlgmr.msra.gmra.mrb[90].mxu0 %vm225_vm2, %v15043_v31  ;;  %13954 = vmatprep.subr.bf16.mxu1 %v16187_v0 }
 0x284   :  { %14073 = vmatpush3.bf16.msra.mxu0 %v14684_v14  ;;  %13192 = vmatprep.mubr.msk.f32.mxu0 %vm14331_vm1, %v16189_v12 }
 0x285   :  { %14077 = vmatprep.subr.bf16.mxu0 %v16187_v0 }
 0x287   :  { %13193 = vmatmul.mubr.msk.f32.vlgmr.msra.gmra.mrb[92].mxu0 %vm225_vm2, %v14886_v56  ;;  %v6477_v56 = vld [vmem:[#allocation2 + $0x65] sm:$0x1] }
 0x288   :  { %14079 = vmatpush3.bf16.msra.mxu0 %v14724_v35  ;;  %13206 = vmatprep.mubr.msk.f32.mxu0 %vm14331_vm1, %v16189_v12  ;;  %v6480_v19 = vrot.slane %v6477_v56, 7  ;;  %v15368_v56 = vsel %vm439_vm3, %v8988_v10, %v8984_v20 }
 0x289   :  { %14083 = vmatprep.subr.bf16.mxu0 %v16187_v0 }
 0x28a   :  { %v15245_v24 = vsel %vm439_vm3, %v6480_v19, %v6476_v22  ;;  %v9146_v19 = vrot.slane %v9143_v16, 7  ;;  %v9142_v22 = vld [vmem:[#allocation2 + $0x39] sm:$0x1] }
 0x28b   :  { %13207 = vmatmul.mubr.msk.f32.vlgmr.msra.gmra.mrb[94].mxu0 %vm225_vm2, %v15062_v54 }
 0x28c   :  { %14085 = vmatpush3.bf16.msra.mxu0 %v14752_v55  ;;  %13220 = vmatprep.mubr.msk.f32.mxu0 %vm14331_vm1, %v16189_v12  ;;  %v9147_v6 = vsel %vm439_vm3, %v9146_v19, %v9142_v22 }
 0x28d   :  { %14089 = vmatprep.subr.bf16.mxu0 %v16187_v0 }
 0x28f   :  { %13221 = vmatmul.mubr.msk.f32.vlgmr.msra.gmra.mrb[96].mxu0 %vm225_vm2, %v15168_v45 }
 0x290   :  { %14091 = vmatpush3.bf16.msra.mxu0 %v14792_v7  ;;  %13234 = vmatprep.mubr.msk.f32.mxu0 %vm14331_vm1, %v16189_v12 }
 0x291   :  { %14095 = vmatprep.subr.bf16.mxu0 %v16187_v0 }
 0x293   :  { %13235 = vmatmul.mubr.msk.f32.vlgmr.msra.gmra.mrb[98].mxu0 %vm225_vm2, %v15245_v24 }
 0x294   :  { %14097 = vmatpush3.bf16.msra.mxu0 %v14820_v26  ;;  %13248 = vmatprep.mubr.msk.f32.mxu0 %vm14331_vm1, %v16189_v12 }
 0x295   :  { %14101 = vmatprep.subr.bf16.mxu0 %v16187_v0 }
 0x297   :  { %13249 = vmatmul.mubr.msk.f32.vlgmr.msra.gmra.mrb[100].mxu0 %vm225_vm2, %v15186_v62 }
 0x298   :  { %14103 = vmatpush3.bf16.msra.mxu0 %v14860_v43  ;;  %13262 = vmatprep.mubr.msk.f32.mxu0 %vm14331_vm1, %v16189_v12 }
 0x299   :  { %14110 = vmatprep.subr.bf16.mxu0 %v16187_v0 }
 0x29b   :  { %13263 = vmatmul.mubr.msk.f32.vlgmr.msra.gmra.mrb[102].mxu0 %vm225_vm2, %v15260_v29 }
 0x29c   :  { %14112 = vmatpush3.bf16.msra.mxu0 %v14522_v47  ;;  %13280 = vmatprep.mubr.msk.f32.mxu0 %vm14331_vm1, %v16189_v12 }
 0x29d   :  { %14113 = vmatprep.subr.bf16.mxu0 %v16187_v0 }
 0x29f   :  { %13281 = vmatmul.mubr.msk.f32.vlgmr.msra.gmra.mrb[104].mxu0 %vm225_vm2, %v15043_v31  ;;  %v7723_v31 = vld [vmem:[#allocation2 + $0x67] sm:$0x1] }
 0x2a0   :  { %14115 = vmatpush3.bf16.msra.mxu0 %v14525_v48  ;;  %13287 = vmatprep.mubr.msk.f32.mxu0 %vm14331_vm1, %v16189_v12 }
 0x2a1   :  { %14119 = vmatprep.subr.bf16.mxu0 %v16187_v0 }
 0x2a3   :  { %13288 = vmatmul.mubr.msk.f32.vlgmr.msra.gmra.mrb[106].mxu0 %vm225_vm2, %v14940_v11 }
 0x2a4   :  { %14121 = vmatpush3.bf16.msra.mxu0 %v14658_v52  ;;  %13301 = vmatprep.mubr.msk.f32.mxu0 %vm14331_vm1, %v16189_v12 }
 0x2a5   :  { %14125 = vmatprep.subr.bf16.mxu0 %v16187_v0 }
 0x2a7   :  { %13302 = vmatmul.mubr.msk.f32.vlgmr.msra.gmra.mrb[108].mxu0 %vm225_vm2, %v15105_v17  ;;  %v7726_v17 = vrot.slane %v7723_v31, 7  ;;  %v9300_v31 = vld [vmem:[#allocation2 + $0x3b] sm:$0x1] }
 0x2a8   :  { %14127 = vmatpush3.bf16.msra.mxu0 %v14684_v14  ;;  %13315 = vmatprep.mubr.msk.f32.mxu0 %vm14331_vm1, %v16189_v12 }
 0x2a9   :  { %14131 = vmatprep.subr.bf16.mxu0 %v16187_v0 }
 0x2ab   :  { %13316 = vmatmul.mubr.msk.f32.vlgmr.msra.gmra.mrb[110].mxu0 %vm225_vm2, %v15062_v54  ;;  %v7722_v54 = vld [vmem:[#allocation2 + $0x27] sm:$0x1] }
 0x2ac   :  { %14133 = vmatpush3.bf16.msra.mxu0 %v14724_v35  ;;  %13329 = vmatprep.mubr.msk.f32.mxu0 %vm14331_vm1, %v16189_v12 }
 0x2ad   :  { %14137 = vmatprep.subr.bf16.mxu0 %v16187_v0 }
 0x2af   :  { %13330 = vmatmul.mubr.msk.f32.vlgmr.msra.gmra.mrb[112].mxu0 %vm225_vm2, %v15120_v1  ;;  %v15305_v1 = vsel %vm439_vm3, %v7726_v17, %v7722_v54  ;;  %v15383_v54 = vsel %vm439_vm3, %v9304_v28, %v9300_v31  ;;  %v10247_v31 = vld [vmem:[#allocation2 + $0x75] sm:$0x1] }
 0x2b0   :  { %14139 = vmatpush3.bf16.msra.mxu0 %v14752_v55  ;;  %13343 = vmatprep.mubr.msk.f32.mxu0 %vm14331_vm1, %v16189_v12 }
 0x2b1   :  { %14143 = vmatprep.subr.bf16.mxu0 %v16187_v0 }
 0x2b3   :  { %13344 = vmatmul.mubr.msk.f32.vlgmr.msra.gmra.mrb[114].mxu0 %vm225_vm2, %v15245_v24 }
 0x2b4   :  { %14145 = vmatpush3.bf16.msra.mxu0 %v14792_v7  ;;  %13357 = vmatprep.mubr.msk.f32.mxu0 %vm14331_vm1, %v16189_v12 }
 0x2b5   :  { %14149 = vmatprep.subr.bf16.mxu0 %v16187_v0 }
 0x2b7   :  { %13358 = vmatmul.mubr.msk.f32.vlgmr.msra.gmra.mrb[116].mxu0 %vm225_vm2, %v15305_v1 }
 0x2b8   :  { %14151 = vmatpush3.bf16.msra.mxu0 %v14820_v26  ;;  %13371 = vmatprep.mubr.msk.f32.mxu0 %vm14331_vm1, %v16189_v12 }
 0x2b9   :  { %14155 = vmatprep.subr.bf16.mxu0 %v16187_v0 }
 0x2bb   :  { %13372 = vmatmul.mubr.msk.f32.vlgmr.msra.gmra.mrb[118].mxu0 %vm225_vm2, %v15260_v29 }
 0x2bc   :  { %14157 = vmatpush3.bf16.msra.mxu0 %v14860_v43  ;;  %13385 = vmatprep.mubr.msk.f32.mxu0 %vm14331_vm1, %v16189_v12 }
 0x2bd   :  { %14164 = vmatprep.subr.bf16.mxu0 %v16187_v0 }
 0x2bf   :  { %13386 = vmatmul.mubr.msk.f32.vlgmr.msra.gmra.mrb[120].mxu0 %vm225_vm2, %v15320_v50 }
 0x2c0   :  { %14166 = vmatpush3.bf16.msra.mxu0 %v14522_v47  ;;  %13403 = vmatprep.mubr.msk.f32.mxu0 %vm14331_vm1, %v16189_v12 }
 0x2c1   :  { %14167 = vmatprep.subr.bf16.mxu0 %v16187_v0 }
 0x2c3   :  { %13404 = vmatmul.mubr.msk.f32.vlgmr.msra.gmra.mrb[122].mxu0 %vm225_vm2, %v15159_v42  ;;  %v8827_v42 = vld [vmem:[#allocation2 + $0x71] sm:$0x1] }
 0x2c4   :  { %14169 = vmatpush3.bf16.msra.mxu0 %v14525_v48  ;;  %13410 = vmatprep.mubr.msk.f32.mxu0 %vm14331_vm1, %v16189_v12  ;;  %v8830_v9 = vrot.slane %v8827_v42, 7 }
 0x2c5   :  { %14173 = vmatprep.subr.bf16.mxu0 %v16187_v0 }
 0x2c7   :  { %13411 = vmatmul.mubr.msk.f32.vlgmr.msra.gmra.mrb[124].mxu0 %vm225_vm2, %v15335_v2 }
 0x2c8   :  { %14175 = vmatpush3.bf16.msra.mxu0 %v14658_v52  ;;  %13424 = vmatprep.mubr.msk.f32.mxu0 %vm14331_vm1, %v16189_v12 }
 0x2c9   :  { %14179 = vmatprep.subr.bf16.mxu0 %v16187_v0 }
 0x2cb   :  { %13425 = vmatmul.mubr.msk.f32.vlgmr.msra.gmra.mrb[126].mxu0 %vm225_vm2, %v15168_v45 }
 0x2cc   :  { %14181 = vmatpush3.bf16.msra.mxu0 %v14684_v14  ;;  %13438 = vmatprep.mubr.msk.f32.mxu0 %vm14331_vm1, %v16189_v12 }
 0x2cd   :  { %14185 = vmatprep.subr.bf16.mxu0 %v16187_v0 }
 0x2cf   :  { %13439 = vmatmul.mubr.msk.f32.vlgmr.msra.gmra.mrb[128].mxu0 %vm225_vm2, %v15177_v61  ;;  %v8831_v61 = vsel %vm439_vm3, %v8830_v9, %v8826_v37 }
 0x2d0   :  { %14187 = vmatpush3.bf16.msra.mxu0 %v14724_v35  ;;  %13452 = vmatprep.mubr.msk.f32.mxu0 %vm14331_vm1, %v16189_v12 }
 0x2d1   :  { %14191 = vmatprep.subr.bf16.mxu0 %v16187_v0 }
 0x2d3   :  { %13453 = vmatmul.mubr.msk.f32.vlgmr.msra.gmra.mrb[130].mxu0 %vm225_vm2, %v15186_v62 }
 0x2d4   :  { %14193 = vmatpush3.bf16.msra.mxu0 %v14752_v55  ;;  %13466 = vmatprep.mubr.msk.f32.mxu0 %vm14331_vm1, %v16189_v12 }
 0x2d5   :  { %14197 = vmatprep.subr.bf16.mxu0 %v16187_v0 }
 0x2d7   :  { %13467 = vmatmul.mubr.msk.f32.vlgmr.msra.gmra.mrb[132].mxu0 %vm225_vm2, %v8831_v61 }
 0x2d8   :  { %14199 = vmatpush3.bf16.msra.mxu0 %v14792_v7  ;;  %13480 = vmatprep.mubr.msk.f32.mxu0 %vm14331_vm1, %v16189_v12 }
 0x2d9   :  { %14203 = vmatprep.subr.bf16.mxu0 %v16187_v0 }
 0x2db   :  { %13481 = vmatmul.mubr.msk.f32.vlgmr.msra.gmra.mrb[134].mxu0 %vm225_vm2, %v15368_v56 }
 0x2dc   :  { %14205 = vmatpush3.bf16.msra.mxu0 %v14820_v26  ;;  %13494 = vmatprep.mubr.msk.f32.mxu0 %vm14331_vm1, %v16189_v12 }
 0x2dd   :  { %14209 = vmatprep.subr.bf16.mxu0 %v16187_v0 }
 0x2df   :  { %13495 = vmatmul.mubr.msk.f32.vlgmr.msra.gmra.mrb[136].mxu0 %vm225_vm2, %v9147_v6 }
 0x2e0   :  { %14211 = vmatpush3.bf16.msra.mxu0 %v14860_v43  ;;  %13508 = vmatprep.mubr.msk.f32.mxu0 %vm14331_vm1, %v16189_v12 }
 0x2e1   :  { %14218 = vmatprep.subr.bf16.mxu0 %v16187_v0 }
 0x2e2   :  { %v1777_v17 = vpop.f32.mrb[32].mxu0 }
 0x2e3   :  { %v15386_v34 = vadd.f32 %v14993_v46, %v1777_v17  ;;  %v12778_v36 = vpop.f32.mrb[33].mxu0  ;;  %13509 = vmatmul.mubr.msk.f32.vlgmr.msra.gmra.mrb[138].mxu0 %vm225_vm2, %v15383_v54  ;;  %v5135_v46 = vld [vmem:[#allocation2 + $0x22] sm:$0x1] }
 0x2e4   :  { %14220 = vmatpush3.bf16.msra.mxu0 %v14522_v47  ;;  %13526 = vmatprep.mubr.msk.f32.mxu0 %vm14331_vm1, %v16189_v12  ;;  %v15403_v13 = vsel %vm439_vm3, %v5139_v59, %v5135_v46 }
 0x2e5   :  { %14221 = vmatprep.subr.bf16.mxu0 %v16187_v0 }
 0x2e6   :  { %v1991_v58 = vpop.f32.mrb[34].mxu0 }
 0x2e7   :  { %v1992_v25 = vadd.f32 %v1991_v58, %v14995_v57  ;;  %v12797_v42 = vpop.f32.mrb[35].mxu0  ;;  %13527 = vmatmul.mubr.msk.f32.vlgmr.msra.gmra.mrb[140].mxu0 %vm225_vm2, %v15168_v45  ;;  %v10246_v58 = vld [vmem:[#allocation2 + $0x35] sm:$0x1] }
 0x2e8   :  { %14223 = vmatpush3.bf16.msra.mxu0 %v14525_v48  ;;  %13533 = vmatprep.mubr.msk.f32.mxu0 %vm14331_vm1, %v16189_v12 }
 0x2e9   :  { %v2073_v9 = vadd.f32 %v15002_v63, %v1992_v25  ;;  %14227 = vmatprep.subr.bf16.mxu0 %v16187_v0 }
 0x2ea   :  { %v2148_v37 = vpop.f32.mrb[36].mxu0 }
 0x2eb   :  { %v2152_v61 = vadd.f32 %v2148_v37, %v2073_v9  ;;  %v12811_v57 = vpop.f32.mrb[37].mxu0  ;;  %13534 = vmatmul.mubr.msk.f32.vlgmr.msra.gmra.mrb[142].mxu0 %vm225_vm2, %v15403_v13 }
 0x2ec   :  { %14229 = vmatpush3.bf16.msra.mxu0 %v14658_v52  ;;  %13547 = vmatprep.mubr.msk.f32.mxu0 %vm14331_vm1, %v16189_v12 }
 0x2ed   :  { %v2223_v45 = vadd.f32 %v15011_v60, %v2152_v61  ;;  %14233 = vmatprep.subr.bf16.mxu0 %v16187_v0 }
 0x2ee   :  { %v2290_v63 = vpop.f32.mrb[38].mxu0 }
 0x2ef   :  { %v2294_v10 = vadd.f32 %v2290_v63, %v2223_v45  ;;  %v12825_v20 = vpop.f32.mrb[39].mxu0  ;;  %13548 = vmatmul.mubr.msk.f32.vlgmr.msra.gmra.mrb[144].mxu0 %vm225_vm2, %v15245_v24  ;;  %v10546_v45 = vld [vmem:[#allocation2 + $0x3d] sm:$0x1] }
 0x2f0   :  { %14235 = vmatpush3.bf16.msra.mxu0 %v14684_v14  ;;  %13561 = vmatprep.mubr.msk.f32.mxu0 %vm14331_vm1, %v16189_v12 }
 0x2f1   :  { %v2373_v16 = vadd.f32 %v15018_v15, %v2294_v10  ;;  %14239 = vmatprep.subr.bf16.mxu0 %v16187_v0 }
 0x2f2   :  { %v2448_v19 = vpop.f32.mrb[40].mxu0 }
 0x2f3   :  { %v2452_v22 = vadd.f32 %v2448_v19, %v2373_v16  ;;  %v12839_v60 = vpop.f32.mrb[41].mxu0  ;;  %13562 = vmatmul.mubr.msk.f32.vlgmr.msra.gmra.mrb[146].mxu0 %vm225_vm2, %v15186_v62 }
 0x2f4   :  { %14241 = vmatpush3.bf16.msra.mxu0 %v14724_v35  ;;  %13575 = vmatprep.mubr.msk.f32.mxu0 %vm14331_vm1, %v16189_v12 }
 0x2f5   :  { %v2523_v3 = vadd.f32 %v15027_v21, %v2452_v22  ;;  %14245 = vmatprep.subr.bf16.mxu0 %v16187_v0  ;;  %v10250_v21 = vrot.slane %v10247_v31, 7  ;;  %v3574_v31 = vld [vmem:[#allocation2 + $0x4e] sm:$0x1] }
 0x2f6   :  { %v2590_v6 = vpop.f32.mrb[42].mxu0 }
 0x2f7   :  { %v2594_v28 = vadd.f32 %v2590_v6, %v2523_v3  ;;  %v12853_v15 = vpop.f32.mrb[43].mxu0  ;;  %13576 = vmatmul.mubr.msk.f32.vlgmr.msra.gmra.mrb[148].mxu0 %vm225_vm2, %v15260_v29  ;;  %v15441_v25 = vsel %vm439_vm3, %v10250_v21, %v10246_v58  ;;  %v3573_v21 = vld [vmem:[#allocation2 + $0xe] sm:$0x1] }
 0x2f8   :  { %14247 = vmatpush3.bf16.msra.mxu0 %v14752_v55  ;;  %13589 = vmatprep.mubr.msk.f32.mxu0 %vm14331_vm1, %v16189_v12 }
 0x2f9   :  { %v2673_v62 = vadd.f32 %v15034_v27, %v2594_v28  ;;  %14251 = vmatprep.subr.bf16.mxu0 %v16187_v0 }
 0x2fa   :  { %v2748_v17 = vpop.f32.mrb[44].mxu0 }
 0x2fb   :  { %v2752_v36 = vadd.f32 %v2748_v17, %v2673_v62  ;;  %v12867_v41 = vpop.f32.mrb[45].mxu0  ;;  %13590 = vmatmul.mubr.msk.f32.vlgmr.msra.gmra.mrb[150].mxu0 %vm225_vm2, %v15368_v56  ;;  %v10547_v56 = vld [vmem:[#allocation2 + $0x7d] sm:$0x1]  ;;  %v3577_v17 = vrot.slane %v3574_v31, 7 }
 0x2fc   :  { %14253 = vmatpush3.bf16.msra.mxu0 %v14792_v7  ;;  %13603 = vmatprep.mubr.msk.f32.mxu0 %vm14331_vm1, %v16189_v12  ;;  %v10550_v37 = vrot.slane %v10547_v56, 7 }
 0x2fd   :  { %v2823_v59 = vadd.f32 %v15045_v33, %v2752_v36  ;;  %14257 = vmatprep.subr.bf16.mxu0 %v16187_v0 }
 0x2fe   :  { %v2890_v27 = vpop.f32.mrb[46].mxu0  ;;  %v15458_v20 = vsel %vm439_vm3, %v10550_v37, %v10546_v45  ;;  %v4173_v37 = vld [vmem:[#allocation2 + $0x1e] sm:$0x1] }
 0x2ff   :  { %v2894_v42 = vadd.f32 %v2890_v27, %v2823_v59  ;;  %v12881_v46 = vpop.f32.mrb[47].mxu0  ;;  %13604 = vmatmul.mubr.msk.f32.vlgmr.msra.gmra.mrb[152].mxu0 %vm225_vm2, %v15441_v25  ;;  %v3873_v59 = vld [vmem:[#allocation2 + $0x16] sm:$0x1] }
 0x300   :  { %14259 = vmatpush3.bf16.msra.mxu0 %v14820_v26  ;;  %13617 = vmatprep.mubr.msk.f32.mxu0 %vm14331_vm1, %v16189_v12  ;;  %v4174_v46 = vld [vmem:[#allocation2 + $0x5e] sm:$0x1] }
 0x301   :  { %v2973_v9 = vadd.f32 %v15053_v44, %v2894_v42  ;;  %14263 = vmatprep.subr.bf16.mxu0 %v16187_v0  ;;  %v3274_v44 = vld [vmem:[#allocation2 + $0x46] sm:$0x1] }
 0x302   :  { %v3048_v33 = vpop.f32.mrb[48].mxu0  ;;  %v3277_v22 = vrot.slane %v3274_v44, 7 }
 0x303   :  { %v3052_v61 = vadd.f32 %v3048_v33, %v2973_v9  ;;  %v12895_v57 = vpop.f32.mrb[49].mxu0  ;;  %13618 = vmatmul.mubr.msk.f32.vlgmr.msra.gmra.mrb[154].mxu0 %vm225_vm2, %v15383_v54  ;;  %v6398_v54 = vld [vmem:[#allocation2 + $0x64] sm:$0x1]  ;;  %v11492_v9 = vld [vmem:[#allocation2 + $0x37] sm:$0x1]  ;;  %v4177_v33 = vrot.slane %v4174_v46, 7 }
 0x304   :  { %14265 = vmatpush3.bf16.msra.mxu0 %v14860_v43  ;;  %13631 = vmatprep.mubr.msk.f32.mxu0 %vm14331_vm1, %v16189_v12  ;;  %v6401_v3 = vrot.slane %v6398_v54, 7  ;;  %v11793_v57 = vld [vmem:[#allocation2 + $0x7f] sm:$0x1] }
 0x305   :  { %v3053_v63 = vadd.f32 %v14990_v38, %v3052_v61  ;;  %14272 = vmatprep.subr.bf16.mxu0 %v16187_v0  ;;  %v3273_v38 = vld [vmem:[#allocation2 + $0x6] sm:$0x1]  ;;  %v15567_v45 = vsel %vm439_vm3, %v4177_v33, %v4173_v37  ;;  %v11796_v44 = vrot.slane %v11793_v57, 7 }
 0x306   :  { %v3199_v10 = vpop.f32.mrb[50].mxu0  ;;  %v3278_v15 = vsel %vm439_vm3, %v3277_v22, %v3273_v38 }
 0x307   :  { %v3054_v16 = vmax.f32 %v3053_v63, 0.0  ;;  %v12913_v19 = vpop.f32.mrb[51].mxu0  ;;  %13632 = vmatmul.mubr.msk.f32.vlgmr.msra.gmra.mrb[156].mxu0 %vm225_vm2, %v15458_v20 }
 0x308   :  { %14274 = vmatpush3.bf16.msra.mxu0 %v14522_v47  ;;  %13649 = vmatprep.mubr.msk.f32.mxu0 %vm14331_vm1, %v16189_v12  ;;  %v6397_v47 = vld [vmem:[#allocation2 + $0x24] sm:$0x1] }
 0x309   :  { %12905 = vmatmul.mubr.msk.f32.vlgmr.msra.gmra.mrb[50].mxu1 %vm1707_vm5, %v3054_v16  ;;  %14275 = vmatprep.subr.bf16.mxu0 %v16187_v0 }
 0x30a   :  { %13956 = vmatpush3.bf16.msra.mxu1 %v14655_v49  ;;  %v3269_v60 = vpop.f32.mrb[52].mxu0  ;;  %12925 = vmatprep.mubr.msk.f32.mxu1 %vm14331_vm1, %v16189_v12 }
 0x30b   :  { %v15470_v6 = vadd.f32 %v3269_v60, %v3199_v10  ;;  %v12920_v28 = vpop.f32.mrb[53].mxu0  ;;  %13650 = vmatmul.mubr.msk.f32.vlgmr.msra.gmra.mrb[158].mxu0 %vm225_vm2, %v15245_v24  ;;  %13960 = vmatprep.subr.bf16.mxu1 %v16187_v0  ;;  %v15485_v24 = vsel %vm439_vm3, %v6401_v3, %v6397_v47 }
 0x30c   :  { %14277 = vmatpush3.bf16.msra.mxu0 %v14525_v48  ;;  %13656 = vmatprep.mubr.msk.f32.mxu0 %vm14331_vm1, %v16189_v12 }
 0x30d   :  { %12926 = vmatmul.mubr.msk.f32.vlgmr.msra.gmra.mrb[52].mxu1 %vm225_vm2, %v3278_v15  ;;  %14281 = vmatprep.subr.bf16.mxu0 %v16187_v0 }
 0x30e   :  { %13962 = vmatpush3.bf16.msra.mxu1 %v14679_v8  ;;  %v15482_v62 = vpop.f32.mrb[54].mxu0  ;;  %12939 = vmatprep.mubr.msk.f32.mxu1 %vm14331_vm1, %v16189_v12 }
 0x30f   :  { %v12934_v48 = vpop.f32.mrb[55].mxu0  ;;  %13657 = vmatmul.mubr.msk.f32.vlgmr.msra.gmra.mrb[160].mxu0 %vm225_vm2, %v15485_v24  ;;  %13966 = vmatprep.subr.bf16.mxu1 %v16187_v0 }
 0x310   :  { %14283 = vmatpush3.bf16.msra.mxu0 %v14658_v52  ;;  %13670 = vmatprep.mubr.msk.f32.mxu0 %vm14331_vm1, %v16189_v12  ;;  %v3578_v52 = vsel %vm439_vm3, %v3577_v17, %v3573_v21 }
 0x311   :  { %12940 = vmatmul.mubr.msk.f32.vlgmr.msra.gmra.mrb[54].mxu1 %vm225_vm2, %v14925_v5  ;;  %14287 = vmatprep.subr.bf16.mxu0 %v16187_v0  ;;  %v3874_v5 = vld [vmem:[#allocation2 + $0x56] sm:$0x1] }
 0x312   :  { %13968 = vmatpush3.bf16.msra.mxu1 %v14717_v30  ;;  %v15499_v36 = vpop.f32.mrb[56].mxu0  ;;  %12953 = vmatprep.mubr.msk.f32.mxu1 %vm14331_vm1, %v16189_v12 }
 0x313   :  { %v12948_v41 = vpop.f32.mrb[57].mxu0  ;;  %13671 = vmatmul.mubr.msk.f32.vlgmr.msra.gmra.mrb[162].mxu0 %vm225_vm2, %v15305_v1  ;;  %13972 = vmatprep.subr.bf16.mxu1 %v16187_v0 }
 0x314   :  { %14289 = vmatpush3.bf16.msra.mxu0 %v14684_v14  ;;  %13684 = vmatprep.mubr.msk.f32.mxu0 %vm14331_vm1, %v16189_v12  ;;  %v3877_v14 = vrot.slane %v3874_v5, 7 }
 0x315   :  { %12954 = vmatmul.mubr.msk.f32.vlgmr.msra.gmra.mrb[56].mxu1 %vm225_vm2, %v3578_v52  ;;  %14293 = vmatprep.subr.bf16.mxu0 %v16187_v0 }
 0x316   :  { %13974 = vmatpush3.bf16.msra.mxu1 %v14746_v53  ;;  %v15513_v58 = vpop.f32.mrb[58].mxu0  ;;  %12967 = vmatprep.mubr.msk.f32.mxu1 %vm14331_vm1, %v16189_v12  ;;  %v15536_v42 = vsel %vm439_vm3, %v3877_v14, %v3873_v59 }
 0x317   :  { %v12962_v1 = vpop.f32.mrb[59].mxu0  ;;  %13685 = vmatmul.mubr.msk.f32.vlgmr.msra.gmra.mrb[164].mxu0 %vm225_vm2, %v15260_v29  ;;  %13978 = vmatprep.subr.bf16.mxu1 %v16187_v0 }
 0x318   :  { %14295 = vmatpush3.bf16.msra.mxu0 %v14724_v35  ;;  %13698 = vmatprep.mubr.msk.f32.mxu0 %vm14331_vm1, %v16189_v12  ;;  %v11493_v35 = vld [vmem:[#allocation2 + $0x77] sm:$0x1] }
 0x319   :  { %12968 = vmatmul.mubr.msk.f32.vlgmr.msra.gmra.mrb[58].mxu1 %vm225_vm2, %v14940_v11  ;;  %14299 = vmatprep.subr.bf16.mxu0 %v16187_v0 }
 0x31a   :  { %13980 = vmatpush3.bf16.msra.mxu1 %v14784_v4  ;;  %v15527_v27 = vpop.f32.mrb[60].mxu0  ;;  %12981 = vmatprep.mubr.msk.f32.mxu1 %vm14331_vm1, %v16189_v12 }
 0x31b   :  { %v12976_v29 = vpop.f32.mrb[61].mxu0  ;;  %13699 = vmatmul.mubr.msk.f32.vlgmr.msra.gmra.mrb[166].mxu0 %vm225_vm2, %v15320_v50  ;;  %13984 = vmatprep.subr.bf16.mxu1 %v16187_v0 }
 0x31c   :  { %14301 = vmatpush3.bf16.msra.mxu0 %v14752_v55  ;;  %13712 = vmatprep.mubr.msk.f32.mxu0 %vm14331_vm1, %v16189_v12  ;;  %v11496_v55 = vrot.slane %v11493_v35, 7 }
 0x31d   :  { %12982 = vmatmul.mubr.msk.f32.vlgmr.msra.gmra.mrb[60].mxu1 %vm225_vm2, %v15536_v42  ;;  %14305 = vmatprep.subr.bf16.mxu0 %v16187_v0 }
 0x31e   :  { %13986 = vmatpush3.bf16.msra.mxu1 %v14815_v23  ;;  %v15544_v50 = vpop.f32.mrb[62].mxu0  ;;  %12995 = vmatprep.mubr.msk.f32.mxu1 %vm14331_vm1, %v16189_v12 }
 0x31f   :  { %v12990_v56 = vpop.f32.mrb[63].mxu0  ;;  %13713 = vmatmul.mubr.msk.f32.vlgmr.msra.gmra.mrb[168].mxu0 %vm225_vm2, %v15441_v25  ;;  %13990 = vmatprep.subr.bf16.mxu1 %v16187_v0  ;;  %v11497_v25 = vsel %vm439_vm3, %v11496_v55, %v11492_v9 }
 0x320   :  { %14307 = vmatpush3.bf16.msra.mxu0 %v14792_v7  ;;  %13726 = vmatprep.mubr.msk.f32.mxu0 %vm14331_vm1, %v16189_v12 }
 0x321   :  { %12996 = vmatmul.mubr.msk.f32.vlgmr.msra.gmra.mrb[62].mxu1 %vm225_vm2, %v14955_v18  ;;  %14311 = vmatprep.subr.bf16.mxu0 %v16187_v0 }
 0x322   :  { %13992 = vmatpush3.bf16.msra.mxu1 %v14852_v40  ;;  %v15558_v61 = vpop.f32.mrb[64].mxu0  ;;  %13009 = vmatprep.mubr.msk.f32.mxu1 %vm14331_vm1, %v16189_v12 }
 0x323   :  { %v13004_v7 = vpop.f32.mrb[65].mxu0  ;;  %13727 = vmatmul.mubr.msk.f32.vlgmr.msra.gmra.mrb[170].mxu0 %vm225_vm2, %v11497_v25  ;;  %13996 = vmatprep.subr.bf16.mxu1 %v16187_v0 }
 0x324   :  { %14313 = vmatpush3.bf16.msra.mxu0 %v14820_v26  ;;  %13740 = vmatprep.mubr.msk.f32.mxu0 %vm14331_vm1, %v16189_v12  ;;  %v11792_v26 = vld [vmem:[#allocation2 + $0x3f] sm:$0x1] }
 0x325   :  { %13010 = vmatmul.mubr.msk.f32.vlgmr.msra.gmra.mrb[64].mxu1 %vm225_vm2, %v15567_v45  ;;  %14317 = vmatprep.subr.bf16.mxu0 %v16187_v0  ;;  %v11797_v19 = vsel %vm439_vm3, %v11796_v44, %v11792_v26 }
 0x326   :  { %v15574_v63 = vpop.f32.mrb[66].mxu0  ;;  %13027 = vmatprep.mubr.msk.f32.mxu1 %vm14331_vm1, %v16189_v12 }
 0x327   :  { %v13018_v10 = vpop.f32.mrb[67].mxu0  ;;  %13741 = vmatmul.mubr.msk.f32.vlgmr.msra.gmra.mrb[172].mxu0 %vm225_vm2, %v15458_v20 }
 0x328   :  { %14319 = vmatpush3.bf16.msra.mxu0 %v14860_v43  ;;  %13754 = vmatprep.mubr.msk.f32.mxu0 %vm14331_vm1, %v16189_v12 }
 0x32a   :  { %v4477_v16 = vpop.f32.mrb[68].mxu0 }
 0x32b   :  { %v13036_v54 = vpop.f32.mrb[69].mxu0  ;;  %13755 = vmatmul.mubr.msk.f32.vlgmr.msra.gmra.mrb[174].mxu0 %vm225_vm2, %v11797_v19 }
 0x32e   :  { %v4547_v22 = vpop.f32.mrb[70].mxu0 }
 0x32f   :  { %v15585_v38 = vadd.f32 %v4547_v22, %v4477_v16  ;;  %v13043_v60 = vpop.f32.mrb[71].mxu0 }
 0x332   :  { %v15587_v3 = vpop.f32.mrb[72].mxu0 }
 0x333   :  { %v13057_v28 = vpop.f32.mrb[73].mxu0 }
 0x336   :  { %v15589_v20 = vpop.f32.mrb[74].mxu0 }
 0x337   :  { %v13071_v47 = vpop.f32.mrb[75].mxu0 }
 0x33a   :  { %v15591_v43 = vpop.f32.mrb[76].mxu0 }
 0x33b   :  { %v13085_v15 = vpop.f32.mrb[77].mxu0 }
 0x33e   :  { %v15593_v31 = vpop.f32.mrb[78].mxu0 }
 0x33f   :  { %v13099_v48 = vpop.f32.mrb[79].mxu0 }
 0x342   :  { %v15595_v17 = vpop.f32.mrb[80].mxu0 }
 0x343   :  { %v13113_v21 = vpop.f32.mrb[81].mxu0 }
 0x346   :  { %v15597_v41 = vpop.f32.mrb[82].mxu0 }
 0x347   :  { %v13127_v52 = vpop.f32.mrb[83].mxu0 }
 0x34a   :  { %v15599_v5 = vpop.f32.mrb[84].mxu0 }
 0x34b   :  { %v13141_v1 = vpop.f32.mrb[85].mxu0 }
 0x34e   :  { %v5755_v14 = vpop.f32.mrb[86].mxu0 }
 0x34f   :  { %v13159_v59 = vpop.f32.mrb[87].mxu0 }
 0x350   :  { %v4334_v59 = vld [vmem:[%s16181_s6 + $0x48] sm:$0xff] }
 0x352   :  { %v5825_v29 = vpop.f32.mrb[88].mxu0 }
 0x353   :  { %v15601_v35 = vadd.f32 %v5825_v29, %v5755_v14  ;;  %v13166_v46 = vpop.f32.mrb[89].mxu0  ;;  %v4333_v14 = vld [vmem:[%s16181_s6 + $0x40] sm:$0xff]  ;;  %v4335_v29 = vld [vmem:[%s16181_s6 + $0x50] sm:$0xff] }
 0x354   :  { %v13997_v46 = vpack.c.bf16 %v4334_v59, %v4333_v14 }
 0x356   :  { %v15603_v55 = vpop.f32.mrb[90].mxu0  ;;  %13998 = vmatpush3.bf16.msra.mxu1 %v13997_v46 }
 0x357   :  { %v13180_v56 = vpop.f32.mrb[91].mxu0  ;;  %13999 = vmatprep.subr.bf16.mxu1 %v16187_v0 }
 0x358   :  { %v4336_v56 = vld [vmem:[%s16181_s6 + $0x58] sm:$0xff] }
 0x35a   :  { %v15605_v9 = vpop.f32.mrb[92].mxu0 }
 0x35b   :  { %v13194_v33 = vpop.f32.mrb[93].mxu0 }
 0x35e   :  { %v15607_v37 = vpop.f32.mrb[94].mxu0 }
 0x35f   :  { %v13208_v25 = vpop.f32.mrb[95].mxu0 }
 0x360   :  { %v14000_v25 = vpack.c.bf16 %v4336_v56, %v4335_v29 }
 0x362   :  { %v15609_v7 = vpop.f32.mrb[96].mxu0  ;;  %14001 = vmatpush3.bf16.msra.mxu1 %v14000_v25 }
 0x363   :  { %v13222_v57 = vpop.f32.mrb[97].mxu0  ;;  %14008 = vmatprep.subr.bf16.mxu1 %v16187_v0 }
 0x366   :  { %v15611_v44 = vpop.f32.mrb[98].mxu0 }
 0x367   :  { %v13236_v10 = vpop.f32.mrb[99].mxu0 }
 0x36a   :  { %v15613_v26 = vpop.f32.mrb[100].mxu0 }
 0x36b   :  { %v13250_v16 = vpop.f32.mrb[101].mxu0 }
 0x36e   :  { %v15615_v19 = vpop.f32.mrb[102].mxu0 }
 0x36f   :  { %v13264_v54 = vpop.f32.mrb[103].mxu0 }
 0x372   :  { %v7001_v22 = vpop.f32.mrb[104].mxu0 }
 0x373   :  { %v13282_v60 = vpop.f32.mrb[105].mxu0 }
 0x376   :  { %v7071_v28 = vpop.f32.mrb[106].mxu0 }
 0x377   :  { %v15617_v47 = vadd.f32 %v7071_v28, %v7001_v22  ;;  %v13289_v15 = vpop.f32.mrb[107].mxu0 }
 0x37a   :  { %v15619_v48 = vpop.f32.mrb[108].mxu0 }
 0x37b   :  { %v13303_v21 = vpop.f32.mrb[109].mxu0 }
 0x37e   :  { %v15621_v52 = vpop.f32.mrb[110].mxu0 }
 0x37f   :  { %v13317_v1 = vpop.f32.mrb[111].mxu0 }
 0x382   :  { %v15635_v33 = vpop.f32.mrb[112].mxu0 }
 0x383   :  { %v13331_v57 = vpop.f32.mrb[113].mxu0 }
 0x386   :  { %v15638_v10 = vpop.f32.mrb[114].mxu0 }
 0x387   :  { %16191 = vst [vmem:[#allocation4_spill] sm:$0xff] %v15638_v10  ;;  %v13345_v16 = vpop.f32.mrb[115].mxu0 }
 0x38a   :  { %v15641_v54 = vpop.f32.mrb[116].mxu0 }
 0x38b   :  { %16192 = vst [vmem:[#allocation5_spill] sm:$0xff] %v15641_v54  ;;  %v13359_v22 = vpop.f32.mrb[117].mxu0 }
 0x38e   :  { %v15643_v60 = vpop.f32.mrb[118].mxu0 }
 0x38f   :  { %16193 = vst [vmem:[#allocation6_spill] sm:$0xff] %v15643_v60  ;;  %v13373_v28 = vpop.f32.mrb[119].mxu0 }
 0x392   :  { %v15645_v15 = vpop.f32.mrb[120].mxu0 }
 0x393   :  { %16194 = vst [vmem:[#allocation7_spill] sm:$0xff] %v15645_v15  ;;  %v13387_v21 = vpop.f32.mrb[121].mxu0 }
 0x396   :  { %v8247_v1 = vpop.f32.mrb[122].mxu0 }
 0x397   :  { %v13405_v14 = vpop.f32.mrb[123].mxu0 }
 0x39a   :  { %v8317_v59 = vpop.f32.mrb[124].mxu0 }
 0x39b   :  { %v15647_v29 = vadd.f32 %v8317_v59, %v8247_v1  ;;  %v13412_v46 = vpop.f32.mrb[125].mxu0 }
 0x39d   :  { %16195 = vst [vmem:[#allocation8_spill] sm:$0xff] %v15647_v29 }
 0x39e   :  { %v15649_v56 = vpop.f32.mrb[126].mxu0 }
 0x39f   :  { %16196 = vst [vmem:[#allocation9_spill] sm:$0xff] %v15649_v56  ;;  %v13426_v25 = vpop.f32.mrb[127].mxu0 }
 0x3a2   :  { %v15651_v57 = vpop.f32.mrb[128].mxu0 }
 0x3a3   :  { %16197 = vst [vmem:[#allocation10_spill] sm:$0xff] %v15651_v57  ;;  %v13440_v16 = vpop.f32.mrb[129].mxu0 }
 0x3a6   :  { %v15653_v0 = vpop.f32.mrb[130].mxu0 }
 0x3a7   :  { %16198 = vst [vmem:[#allocation11_spill] sm:$0xff] %v15653_v0  ;;  %v13454_v22 = vpop.f32.mrb[131].mxu0 }
 0x3aa   :  { %v15655_v12 = vpop.f32.mrb[132].mxu0 }
 0x3ab   :  { %16199 = vst [vmem:[#allocation12_spill] sm:$0xff] %v15655_v12  ;;  %v13468_v28 = vpop.f32.mrb[133].mxu0 }
 0x3ae   :  { %v15657_v15 = vpop.f32.mrb[134].mxu0 }
 0x3af   :  { %16200 = vst [vmem:[#allocation13_spill] sm:$0xff] %v15657_v15  ;;  %v13482_v21 = vpop.f32.mrb[135].mxu0 }
 0x3b2   :  { %v15659_v14 = vpop.f32.mrb[136].mxu0 }
 0x3b3   :  { %16201 = vst [vmem:[#allocation14_spill] sm:$0xff] %v15659_v14  ;;  %v13496_v1 = vpop.f32.mrb[137].mxu0 }
 0x3b6   :  { %v15661_v59 = vpop.f32.mrb[138].mxu0 }
 0x3b7   :  { %16202 = vst [vmem:[#allocation15_spill] sm:$0xff] %v15661_v59  ;;  %v13510_v46 = vpop.f32.mrb[139].mxu0 }
 0x3ba   :  { %v9525_v56 = vpop.f32.mrb[140].mxu0 }
 0x3bb   :  { %v13528_v25 = vpop.f32.mrb[141].mxu0 }
 0x3be   :  { %v9595_v29 = vpop.f32.mrb[142].mxu0 }
 0x3bf   :  { %v15663_v57 = vadd.f32 %v9595_v29, %v9525_v56  ;;  %v13535_v16 = vpop.f32.mrb[143].mxu0 }
 0x3c1   :  { %16203 = vst [vmem:[#allocation16_spill] sm:$0xff] %v15663_v57 }
 0x3c2   :  { %v15665_v0 = vpop.f32.mrb[144].mxu0 }
 0x3c3   :  { %16204 = vst [vmem:[#allocation17_spill] sm:$0xff] %v15665_v0  ;;  %v13549_v22 = vpop.f32.mrb[145].mxu0 }
 0x3c6   :  { %v15667_v12 = vpop.f32.mrb[146].mxu0 }
 0x3c7   :  { %16205 = vst [vmem:[#allocation18_spill] sm:$0xff] %v15667_v12  ;;  %v13563_v28 = vpop.f32.mrb[147].mxu0 }
 0x3ca   :  { %v15669_v15 = vpop.f32.mrb[148].mxu0 }
 0x3cb   :  { %16206 = vst [vmem:[#allocation19_spill] sm:$0xff] %v15669_v15  ;;  %v13577_v21 = vpop.f32.mrb[149].mxu0 }
 0x3ce   :  { %v15671_v14 = vpop.f32.mrb[150].mxu0 }
 0x3cf   :  { %16207 = vst [vmem:[#allocation20_spill] sm:$0xff] %v15671_v14  ;;  %v13591_v1 = vpop.f32.mrb[151].mxu0 }
 0x3d2   :  { %v15673_v59 = vpop.f32.mrb[152].mxu0 }
 0x3d3   :  { %16208 = vst [vmem:[#allocation21_spill] sm:$0xff] %v15673_v59  ;;  %v13605_v46 = vpop.f32.mrb[153].mxu0 }
 0x3d6   :  { %v15675_v25 = vpop.f32.mrb[154].mxu0 }
 0x3d7   :  { %16209 = vst [vmem:[#allocation22_spill] sm:$0xff] %v15675_v25  ;;  %v13619_v29 = vpop.f32.mrb[155].mxu0 }
 0x3da   :  { %v15677_v56 = vpop.f32.mrb[156].mxu0 }
 0x3db   :  { %16210 = vst [vmem:[#allocation23_spill] sm:$0xff] %v15677_v56  ;;  %v13633_v16 = vpop.f32.mrb[157].mxu0 }
 0x3dc   :  { %v3128_v0 = vpop.f32.mrb[50].mxu1 }
 0x3dd   :  { %v15680_v22 = vadd.f32 %v3128_v0, %v15386_v34  ;;  %v12906_v28 = vpop.f32.mrb[51].mxu1 }
 0x3de   :  { %v10771_v12 = vpop.f32.mrb[158].mxu0 }
 0x3df   :  { %v13651_v15 = vpop.f32.mrb[159].mxu0 }
 0x3e0   :  { %v3347_v21 = vpop.f32.mrb[52].mxu1 }
 0x3e1   :  { %v3351_v14 = vadd.f32 %v3347_v21, %v15470_v6  ;;  %v12927_v1 = vpop.f32.mrb[53].mxu1 }
 0x3e2   :  { %v10841_v57 = vpop.f32.mrb[160].mxu0 }
 0x3e3   :  { %v15683_v59 = vadd.f32 %v10841_v57, %v10771_v12  ;;  %v13658_v46 = vpop.f32.mrb[161].mxu0  ;;  %v3430_v29 = vadd.f32 %v15482_v62, %v3351_v14 }
 0x3e4   :  { %v3497_v25 = vpop.f32.mrb[54].mxu1 }
 0x3e5   :  { %v3501_v56 = vadd.f32 %v3497_v25, %v3430_v29  ;;  %v12941_v16 = vpop.f32.mrb[55].mxu1 }
 0x3e6   :  { %v15686_v60 = vpop.f32.mrb[162].mxu0 }
 0x3e7   :  { %v13672_v0 = vpop.f32.mrb[163].mxu0  ;;  %v3572_v34 = vadd.f32 %v15499_v36, %v3501_v56 }
 0x3e8   :  { %v3647_v28 = vpop.f32.mrb[56].mxu1 }
 0x3e9   :  { %v3651_v15 = vadd.f32 %v3647_v28, %v3572_v34  ;;  %v12955_v54 = vpop.f32.mrb[57].mxu1 }
 0x3ea   :  { %v15689_v10 = vpop.f32.mrb[164].mxu0 }
 0x3eb   :  { %v13686_v6 = vpop.f32.mrb[165].mxu0  ;;  %v3730_v12 = vadd.f32 %v15513_v58, %v3651_v15 }
 0x3ec   :  { %v3797_v57 = vpop.f32.mrb[58].mxu1 }
 0x3ed   :  { %v3801_v21 = vadd.f32 %v3797_v57, %v3730_v12  ;;  %v12969_v1 = vpop.f32.mrb[59].mxu1 }
 0x3ee   :  { %v15692_v62 = vpop.f32.mrb[166].mxu0 }
 0x3ef   :  { %v13700_v14 = vpop.f32.mrb[167].mxu0  ;;  %v3872_v25 = vadd.f32 %v15527_v27, %v3801_v21 }
 0x3f0   :  { %v3947_v46 = vpop.f32.mrb[60].mxu1 }
 0x3f1   :  { %v3951_v29 = vadd.f32 %v3947_v46, %v3872_v25  ;;  %v12983_v16 = vpop.f32.mrb[61].mxu1 }
 0x3f2   :  { %v15695_v36 = vpop.f32.mrb[168].mxu0 }
 0x3f3   :  { %v13714_v56 = vpop.f32.mrb[169].mxu0  ;;  %v4030_v54 = vadd.f32 %v15544_v50, %v3951_v29  ;;  %v15707_v50 = vld [vmem:[%s16182_s5] ss:$0 sm:$0xff] }
 0x3f4   :  { %v4097_v0 = vpop.f32.mrb[62].mxu1  ;;  %v5293_v56 = vld [vmem:[#allocation2 + $0x28] sm:$0x1] }
 0x3f5   :  { %v4101_v34 = vadd.f32 %v4097_v0, %v4030_v54  ;;  %v12997_v28 = vpop.f32.mrb[63].mxu1  ;;  %v5452_v54 = vld [vmem:[#allocation2 + $0x6a] sm:$0x1] }
 0x3f6   :  { %v15698_v58 = vpop.f32.mrb[170].mxu0  ;;  %v5455_v0 = vrot.slane %v5452_v54, 7 }
 0x3f7   :  { %v13728_v15 = vpop.f32.mrb[171].mxu0  ;;  %v4172_v6 = vadd.f32 %v15558_v61, %v4101_v34  ;;  %v16212_v61 = vmov 0.0   ;;  %v5451_v34 = vld [vmem:[#allocation2 + $0x2a] sm:$0x1] }
 0x3f8   :  { %v4247_v12 = vpop.f32.mrb[64].mxu1  ;;  %v15757_v28 = vsel %vm439_vm3, %v5455_v0, %v5451_v34  ;;  %v5611_v15 = vld [vmem:[%s16181_s6 + $0x60] sm:$0xff] }
 0x3f9   :  { %v4251_v57 = vadd.f32 %v4247_v12, %v4172_v6  ;;  %v13011_v1 = vpop.f32.mrb[65].mxu1  ;;  %v5612_v6 = vld [vmem:[%s16181_s6 + $0x68] sm:$0xff]  ;;  %v5613_v12 = vld [vmem:[%s16181_s6 + $0x70] sm:$0xff] }
 0x3fa   :  { %v15701_v27 = vpop.f32.mrb[172].mxu0  ;;  %v5614_v1 = vld [vmem:[%s16181_s6 + $0x78] sm:$0xff] }
 0x3fb   :  { %v4330_v21 = vadd.f32 %v15574_v63, %v4251_v57  ;;  %v13742_v14 = vpop.f32.mrb[173].mxu0  ;;  %v16213_v63 = vmov 0.0|0.0   ;;  %v14051_v57 = vpack.c.bf16 %v5612_v6, %v5611_v15 }
 0x3fd   :  { %v4331_v25 = vadd.f32 %v15707_v50, %v4330_v21  ;;  %v14054_v21 = vpack.c.bf16 %v5614_v1, %v5613_v12 }
 0x3fe   :  { %v15710_v46 = vpop.f32.mrb[174].mxu0 }
 0x3ff   :  { %16211 = vst [vmem:[#allocation24_spill] sm:$0xff] %v15710_v46  ;;  %v4332_v29 = vmax.f32 %v4331_v25, 0.0  ;;  %v13756_v16 = vpop.f32.mrb[175].mxu0 }
 0x401   :  { %13028 = vmatmul.mubr.msk.f32.vlgmr.msra.gmra.mrb[66].mxu1 %vm1707_vm5, %v4332_v29 }
 0x402   :  { %14010 = vmatpush3.bf16.msra.mxu1 %v14655_v49  ;;  %13048 = vmatprep.mubr.msk.f32.mxu1 %vm14331_vm1, %v16212_v61 }
 0x403   :  { %14014 = vmatprep.subr.bf16.mxu1 %v16213_v63 }
 0x405   :  { %13049 = vmatmul.mubr.msk.f32.vlgmr.msra.gmra.mrb[68].mxu1 %vm225_vm2, %v14832_v32  ;;  %v5294_v32 = vld [vmem:[#allocation2 + $0x68] sm:$0x1] }
 0x406   :  { %14016 = vmatpush3.bf16.msra.mxu1 %v14679_v8  ;;  %13062 = vmatprep.mubr.msk.f32.mxu1 %vm14331_vm1, %v16212_v61 }
 0x407   :  { %14020 = vmatprep.subr.bf16.mxu1 %v16213_v63 }
 0x409   :  { %13063 = vmatmul.mubr.msk.f32.vlgmr.msra.gmra.mrb[70].mxu1 %vm225_vm2, %v14850_v39  ;;  %v5297_v39 = vrot.slane %v5294_v32, 7 }
 0x40a   :  { %14022 = vmatpush3.bf16.msra.mxu1 %v14717_v30  ;;  %13076 = vmatprep.mubr.msk.f32.mxu1 %vm14331_vm1, %v16212_v61 }
 0x40b   :  { %14026 = vmatprep.subr.bf16.mxu1 %v16213_v63 }
 0x40d   :  { %13077 = vmatmul.mubr.msk.f32.vlgmr.msra.gmra.mrb[72].mxu1 %vm225_vm2, %v14877_v51 }
 0x40e   :  { %14028 = vmatpush3.bf16.msra.mxu1 %v14746_v53  ;;  %13090 = vmatprep.mubr.msk.f32.mxu1 %vm14331_vm1, %v16212_v61 }
 0x40f   :  { %14032 = vmatprep.subr.bf16.mxu1 %v16213_v63 }
 0x411   :  { %13091 = vmatmul.mubr.msk.f32.vlgmr.msra.gmra.mrb[74].mxu1 %vm225_vm2, %v15335_v2  ;;  %v15748_v2 = vsel %vm439_vm3, %v5297_v39, %v5293_v56 }
 0x412   :  { %14034 = vmatpush3.bf16.msra.mxu1 %v14784_v4  ;;  %13104 = vmatprep.mubr.msk.f32.mxu1 %vm14331_vm1, %v16212_v61 }
 0x413   :  { %14038 = vmatprep.subr.bf16.mxu1 %v16213_v63 }
 0x415   :  { %13105 = vmatmul.mubr.msk.f32.vlgmr.msra.gmra.mrb[76].mxu1 %vm225_vm2, %v15403_v13 }
 0x416   :  { %14040 = vmatpush3.bf16.msra.mxu1 %v14815_v23  ;;  %13118 = vmatprep.mubr.msk.f32.mxu1 %vm14331_vm1, %v16212_v61 }
 0x417   :  { %14044 = vmatprep.subr.bf16.mxu1 %v16213_v63 }
 0x419   :  { %13119 = vmatmul.mubr.msk.f32.vlgmr.msra.gmra.mrb[78].mxu1 %vm225_vm2, %v15748_v2 }
 0x41a   :  { %14046 = vmatpush3.bf16.msra.mxu1 %v14852_v40  ;;  %13132 = vmatprep.mubr.msk.f32.mxu1 %vm14331_vm1, %v16212_v61 }
 0x41b   :  { %14050 = vmatprep.subr.bf16.mxu1 %v16213_v63 }
 0x41d   :  { %13133 = vmatmul.mubr.msk.f32.vlgmr.msra.gmra.mrb[80].mxu1 %vm225_vm2, %v15757_v28 }
 0x41e   :  { %13150 = vmatprep.mubr.msk.f32.mxu1 %vm14331_vm1, %v16212_v61  ;;  %14052 = vmatpush3.bf16.msra.mxu1 %v14051_v57 }
 0x41f   :  { %14053 = vmatprep.subr.bf16.mxu1 %v16213_v63 }
 0x422   :  { %14055 = vmatpush3.bf16.msra.mxu1 %v14054_v21 }
 0x423   :  { %14062 = vmatprep.subr.bf16.mxu1 %v16213_v63 }
 0x4d4   :  { %v4406_v14 = vpop.f32.mrb[66].mxu1 }
 0x4d5   :  { %v15778_v25 = vadd.f32 %v4406_v14, %v15680_v22  ;;  %v13029_v29 = vpop.f32.mrb[67].mxu1 }
 0x4d8   :  { %v4617_v16 = vpop.f32.mrb[68].mxu1 }
 0x4d9   :  { %v4621_v32 = vadd.f32 %v4617_v16, %v15585_v38  ;;  %v13050_v39 = vpop.f32.mrb[69].mxu1 }
 0x4db   :  { %v4692_v56 = vadd.f32 %v15587_v3, %v4621_v32 }
 0x4dc   :  { %v4759_v54 = vpop.f32.mrb[70].mxu1 }
 0x4dd   :  { %v4763_v0 = vadd.f32 %v4759_v54, %v4692_v56  ;;  %v13064_v34 = vpop.f32.mrb[71].mxu1 }
 0x4df   :  { %v4834_v15 = vadd.f32 %v15589_v20, %v4763_v0 }
 0x4e0   :  { %v4901_v6 = vpop.f32.mrb[72].mxu1 }
 0x4e1   :  { %v4905_v12 = vadd.f32 %v4901_v6, %v4834_v15  ;;  %v13078_v57 = vpop.f32.mrb[73].mxu1 }
 0x4e2   :  { %v6860_v57 = vld [vmem:[%s16181_s6 + $0x98] sm:$0xff] }
 0x4e3   :  { %v4976_v1 = vadd.f32 %v15591_v43, %v4905_v12 }
 0x4e4   :  { %v5051_v21 = vpop.f32.mrb[74].mxu1 }
 0x4e5   :  { %v5055_v22 = vadd.f32 %v5051_v21, %v4976_v1  ;;  %v13092_v14 = vpop.f32.mrb[75].mxu1 }
 0x4e7   :  { %v5134_v29 = vadd.f32 %v15593_v31, %v5055_v22  ;;  %v6697_v31 = vld [vmem:[#allocation2 + $0x2c] sm:$0x1] }
 0x4e8   :  { %v5209_v46 = vpop.f32.mrb[76].mxu1 }
 0x4e9   :  { %v5213_v38 = vadd.f32 %v5209_v46, %v5134_v29  ;;  %v13106_v16 = vpop.f32.mrb[77].mxu1  ;;  %v6859_v46 = vld [vmem:[%s16181_s6 + $0x90] sm:$0xff] }
 0x4ea   :  { %v14108_v1 = vpack.c.bf16 %v6860_v57, %v6859_v46 }
 0x4eb   :  { %v5292_v3 = vadd.f32 %v15595_v17, %v5213_v38 }
 0x4ec   :  { %v5367_v32 = vpop.f32.mrb[78].mxu1 }
 0x4ed   :  { %v5371_v39 = vadd.f32 %v5367_v32, %v5292_v3  ;;  %v13120_v56 = vpop.f32.mrb[79].mxu1 }
 0x4ef   :  { %v5450_v20 = vadd.f32 %v15597_v41, %v5371_v39  ;;  %v6857_v41 = vld [vmem:[%s16181_s6 + $0x80] sm:$0xff] }
 0x4f0   :  { %v5525_v54 = vpop.f32.mrb[80].mxu1 }
 0x4f1   :  { %v5529_v0 = vadd.f32 %v5525_v54, %v5450_v20  ;;  %v13134_v34 = vpop.f32.mrb[81].mxu1 }
 0x4f3   :  { %v5608_v43 = vadd.f32 %v15599_v5, %v5529_v0  ;;  %v6858_v5 = vld [vmem:[%s16181_s6 + $0x88] sm:$0xff] }
 0x4f4   :  { %v14105_v12 = vpack.c.bf16 %v6858_v5, %v6857_v41 }
 0x4f5   :  { %v5609_v15 = vadd.f32 %v15707_v50, %v5608_v43 }
 0x4f7   :  { %v5610_v6 = vmax.f32 %v5609_v15, 0.0 }
 0x4f9   :  { %13151 = vmatmul.mubr.msk.f32.vlgmr.msra.gmra.mrb[82].mxu1 %vm1707_vm5, %v5610_v6 }
 0x4fa   :  { %14064 = vmatpush3.bf16.msra.mxu1 %v14655_v49  ;;  %13171 = vmatprep.mubr.msk.f32.mxu1 %vm14331_vm1, %v16212_v61 }
 0x4fb   :  { %14068 = vmatprep.subr.bf16.mxu1 %v16213_v63 }
 0x4fd   :  { %13172 = vmatmul.mubr.msk.f32.vlgmr.msra.gmra.mrb[84].mxu1 %vm225_vm2, %v14940_v11 }
 0x4fe   :  { %14070 = vmatpush3.bf16.msra.mxu1 %v14679_v8  ;;  %13185 = vmatprep.mubr.msk.f32.mxu1 %vm14331_vm1, %v16212_v61 }
 0x4ff   :  { %14074 = vmatprep.subr.bf16.mxu1 %v16213_v63 }
 0x501   :  { %13186 = vmatmul.mubr.msk.f32.vlgmr.msra.gmra.mrb[86].mxu1 %vm225_vm2, %v14877_v51  ;;  %v6698_v51 = vld [vmem:[#allocation2 + $0x6c] sm:$0x1] }
 0x502   :  { %14076 = vmatpush3.bf16.msra.mxu1 %v14717_v30  ;;  %13199 = vmatprep.mubr.msk.f32.mxu1 %vm14331_vm1, %v16212_v61  ;;  %v6701_v11 = vrot.slane %v6698_v51, 7 }
 0x503   :  { %14080 = vmatprep.subr.bf16.mxu1 %v16213_v63 }
 0x504   :  { %v15831_v17 = vsel %vm439_vm3, %v6701_v11, %v6697_v31 }
 0x505   :  { %13200 = vmatmul.mubr.msk.f32.vlgmr.msra.gmra.mrb[88].mxu1 %vm225_vm2, %v14955_v18 }
 0x506   :  { %14082 = vmatpush3.bf16.msra.mxu1 %v14746_v53  ;;  %13213 = vmatprep.mubr.msk.f32.mxu1 %vm14331_vm1, %v16212_v61 }
 0x507   :  { %14086 = vmatprep.subr.bf16.mxu1 %v16213_v63 }
 0x509   :  { %13214 = vmatmul.mubr.msk.f32.vlgmr.msra.gmra.mrb[90].mxu1 %vm225_vm2, %v15403_v13 }
 0x50a   :  { %14088 = vmatpush3.bf16.msra.mxu1 %v14784_v4  ;;  %13227 = vmatprep.mubr.msk.f32.mxu1 %vm14331_vm1, %v16212_v61 }
 0x50b   :  { %14092 = vmatprep.subr.bf16.mxu1 %v16213_v63 }
 0x50d   :  { %13228 = vmatmul.mubr.msk.f32.vlgmr.msra.gmra.mrb[92].mxu1 %vm225_vm2, %v15485_v24 }
 0x50e   :  { %14094 = vmatpush3.bf16.msra.mxu1 %v14815_v23  ;;  %13241 = vmatprep.mubr.msk.f32.mxu1 %vm14331_vm1, %v16212_v61 }
 0x50f   :  { %14098 = vmatprep.subr.bf16.mxu1 %v16213_v63 }
 0x511   :  { %13242 = vmatmul.mubr.msk.f32.vlgmr.msra.gmra.mrb[94].mxu1 %vm225_vm2, %v15757_v28 }
 0x512   :  { %14100 = vmatpush3.bf16.msra.mxu1 %v14852_v40  ;;  %13255 = vmatprep.mubr.msk.f32.mxu1 %vm14331_vm1, %v16212_v61 }
 0x513   :  { %14104 = vmatprep.subr.bf16.mxu1 %v16213_v63 }
 0x515   :  { %13256 = vmatmul.mubr.msk.f32.vlgmr.msra.gmra.mrb[96].mxu1 %vm225_vm2, %v15831_v17 }
 0x516   :  { %13273 = vmatprep.mubr.msk.f32.mxu1 %vm14331_vm1, %v16212_v61  ;;  %14106 = vmatpush3.bf16.msra.mxu1 %v14105_v12 }
 0x517   :  { %14107 = vmatprep.subr.bf16.mxu1 %v16213_v63 }
 0x51a   :  { %14109 = vmatpush3.bf16.msra.mxu1 %v14108_v1 }
 0x51b   :  { %14116 = vmatprep.subr.bf16.mxu1 %v16213_v63 }
 0x5cc   :  { %v5684_v21 = vpop.f32.mrb[82].mxu1 }
 0x5cd   :  { %v15852_v22 = vadd.f32 %v5684_v21, %v15778_v25  ;;  %v13152_v14 = vpop.f32.mrb[83].mxu1 }
 0x5d0   :  { %v5895_v29 = vpop.f32.mrb[84].mxu1 }
 0x5d1   :  { %v5899_v38 = vadd.f32 %v5895_v29, %v15601_v35  ;;  %v13173_v16 = vpop.f32.mrb[85].mxu1 }
 0x5d2   :  { %v8104_v16 = vld [vmem:[%s16181_s6 + $0xa8] sm:$0xff] }
 0x5d3   :  { %v5970_v3 = vadd.f32 %v15603_v55, %v5899_v38  ;;  %v8103_v38 = vld [vmem:[%s16181_s6 + $0xa0] sm:$0xff] }
 0x5d4   :  { %v6037_v32 = vpop.f32.mrb[86].mxu1 }
 0x5d5   :  { %v6041_v39 = vadd.f32 %v6037_v32, %v5970_v3  ;;  %v13187_v56 = vpop.f32.mrb[87].mxu1  ;;  %v8105_v3 = vld [vmem:[%s16181_s6 + $0xb0] sm:$0xff]  ;;  %v14159_v32 = vpack.c.bf16 %v8104_v16, %v8103_v38  ;;  %v16217_v38 = vld [vmem:[#allocation7_spill] sm:$0xff] }
 0x5d7   :  { %v6112_v20 = vadd.f32 %v15605_v9, %v6041_v39  ;;  %v8106_v39 = vld [vmem:[%s16181_s6 + $0xb8] sm:$0xff] }
 0x5d8   :  { %v6179_v54 = vpop.f32.mrb[88].mxu1  ;;  %v14162_v56 = vpack.c.bf16 %v8106_v39, %v8105_v3 }
 0x5d9   :  { %v6183_v0 = vadd.f32 %v6179_v54, %v6112_v20  ;;  %v13201_v34 = vpop.f32.mrb[89].mxu1 }
 0x5db   :  { %v6254_v43 = vadd.f32 %v15607_v37, %v6183_v0 }
 0x5dc   :  { %v6321_v15 = vpop.f32.mrb[90].mxu1 }
 0x5dd   :  { %v6325_v25 = vadd.f32 %v6321_v15, %v6254_v43  ;;  %v13215_v6 = vpop.f32.mrb[91].mxu1 }
 0x5df   :  { %v6396_v51 = vadd.f32 %v15609_v7, %v6325_v25 }
 0x5e0   :  { %v6471_v11 = vpop.f32.mrb[92].mxu1 }
 0x5e1   :  { %v6475_v35 = vadd.f32 %v6471_v11, %v6396_v51  ;;  %v13229_v31 = vpop.f32.mrb[93].mxu1 }
 0x5e3   :  { %v6554_v55 = vadd.f32 %v15611_v44, %v6475_v35  ;;  %v7944_v44 = vld [vmem:[#allocation2 + $0x6e] sm:$0x1] }
 0x5e4   :  { %v6621_v41 = vpop.f32.mrb[94].mxu1 }
 0x5e5   :  { %v6625_v5 = vadd.f32 %v6621_v41, %v6554_v55  ;;  %v13243_v46 = vpop.f32.mrb[95].mxu1 }
 0x5e7   :  { %v6696_v9 = vadd.f32 %v15613_v26, %v6625_v5  ;;  %v7947_v26 = vrot.slane %v7944_v44, 7 }
 0x5e8   :  { %v6771_v12 = vpop.f32.mrb[96].mxu1 }
 0x5e9   :  { %v6775_v57 = vadd.f32 %v6771_v12, %v6696_v9  ;;  %v13257_v1 = vpop.f32.mrb[97].mxu1  ;;  %v16214_v12 = vld [vmem:[#allocation4_spill] sm:$0xff] }
 0x5eb   :  { %v6854_v37 = vadd.f32 %v15615_v19, %v6775_v57  ;;  %v7943_v19 = vld [vmem:[#allocation2 + $0x2e] sm:$0x1] }
 0x5ec   :  { %v15908_v29 = vsel %vm439_vm3, %v7947_v26, %v7943_v19 }
 0x5ed   :  { %v6855_v21 = vadd.f32 %v15707_v50, %v6854_v37 }
 0x5ef   :  { %v6856_v14 = vmax.f32 %v6855_v21, 0.0  ;;  %v16215_v21 = vld [vmem:[#allocation5_spill] sm:$0xff] }
 0x5f1   :  { %13274 = vmatmul.mubr.msk.f32.vlgmr.msra.gmra.mrb[98].mxu1 %vm1707_vm5, %v6856_v14 }
 0x5f2   :  { %14118 = vmatpush3.bf16.msra.mxu1 %v14655_v49  ;;  %13294 = vmatprep.mubr.msk.f32.mxu1 %vm14331_vm1, %v16212_v61 }
 0x5f3   :  { %14122 = vmatprep.subr.bf16.mxu1 %v16213_v63 }
 0x5f5   :  { %13295 = vmatmul.mubr.msk.f32.vlgmr.msra.gmra.mrb[100].mxu1 %vm225_vm2, %v15536_v42  ;;  %v7644_v42 = vld [vmem:[#allocation2 + $0x66] sm:$0x1] }
 0x5f6   :  { %14124 = vmatpush3.bf16.msra.mxu1 %v14679_v8  ;;  %13308 = vmatprep.mubr.msk.f32.mxu1 %vm14331_vm1, %v16212_v61  ;;  %v7647_v7 = vrot.slane %v7644_v42, 7 }
 0x5f7   :  { %14128 = vmatprep.subr.bf16.mxu1 %v16213_v63 }
 0x5f9   :  { %13309 = vmatmul.mubr.msk.f32.vlgmr.msra.gmra.mrb[102].mxu1 %vm225_vm2, %v14955_v18  ;;  %v7643_v18 = vld [vmem:[#allocation2 + $0x26] sm:$0x1] }
 0x5fa   :  { %14130 = vmatpush3.bf16.msra.mxu1 %v14717_v30  ;;  %13322 = vmatprep.mubr.msk.f32.mxu1 %vm14331_vm1, %v16212_v61 }
 0x5fb   :  { %14134 = vmatprep.subr.bf16.mxu1 %v16213_v63 }
 0x5fd   :  { %13323 = vmatmul.mubr.msk.f32.vlgmr.msra.gmra.mrb[104].mxu1 %vm225_vm2, %v15567_v45  ;;  %v15893_v45 = vsel %vm439_vm3, %v7647_v7, %v7643_v18  ;;  %v16216_v18 = vld [vmem:[#allocation6_spill] sm:$0xff] }
 0x5fe   :  { %14136 = vmatpush3.bf16.msra.mxu1 %v14746_v53  ;;  %13336 = vmatprep.mubr.msk.f32.mxu1 %vm14331_vm1, %v16212_v61 }
 0x5ff   :  { %14140 = vmatprep.subr.bf16.mxu1 %v16213_v63 }
 0x601   :  { %13337 = vmatmul.mubr.msk.f32.vlgmr.msra.gmra.mrb[106].mxu1 %vm225_vm2, %v15485_v24 }
 0x602   :  { %14142 = vmatpush3.bf16.msra.mxu1 %v14784_v4  ;;  %13350 = vmatprep.mubr.msk.f32.mxu1 %vm14331_vm1, %v16212_v61 }
 0x603   :  { %14146 = vmatprep.subr.bf16.mxu1 %v16213_v63 }
 0x605   :  { %13351 = vmatmul.mubr.msk.f32.vlgmr.msra.gmra.mrb[108].mxu1 %vm225_vm2, %v15893_v45 }
 0x606   :  { %14148 = vmatpush3.bf16.msra.mxu1 %v14815_v23  ;;  %13364 = vmatprep.mubr.msk.f32.mxu1 %vm14331_vm1, %v16212_v61 }
 0x607   :  { %14152 = vmatprep.subr.bf16.mxu1 %v16213_v63 }
 0x609   :  { %13365 = vmatmul.mubr.msk.f32.vlgmr.msra.gmra.mrb[110].mxu1 %vm225_vm2, %v15831_v17 }
 0x60a   :  { %14154 = vmatpush3.bf16.msra.mxu1 %v14852_v40  ;;  %13378 = vmatprep.mubr.msk.f32.mxu1 %vm14331_vm1, %v16212_v61 }
 0x60b   :  { %14158 = vmatprep.subr.bf16.mxu1 %v16213_v63 }
 0x60d   :  { %13379 = vmatmul.mubr.msk.f32.vlgmr.msra.gmra.mrb[112].mxu1 %vm225_vm2, %v15908_v29 }
 0x60e   :  { %13396 = vmatprep.mubr.msk.f32.mxu1 %vm14331_vm1, %v16212_v61  ;;  %14160 = vmatpush3.bf16.msra.mxu1 %v14159_v32  ;;  %v8748_v32 = vld [vmem:[#allocation2 + $0x70] sm:$0x1] }
 0x60f   :  { %14161 = vmatprep.subr.bf16.mxu1 %v16213_v63  ;;  %v8751_v39 = vrot.slane %v8748_v32, 7 }
 0x612   :  { %14163 = vmatpush3.bf16.msra.mxu1 %v14162_v56  ;;  %v8906_v56 = vld [vmem:[#allocation2 + $0x72] sm:$0x1] }
 0x613   :  { %14170 = vmatprep.subr.bf16.mxu1 %v16213_v63 }
 0x6c4   :  { %v6930_v20 = vpop.f32.mrb[98].mxu1 }
 0x6c5   :  { %v15929_v54 = vadd.f32 %v6930_v20, %v15852_v22  ;;  %v13275_v0 = vpop.f32.mrb[99].mxu1  ;;  %v8909_v20 = vrot.slane %v8906_v56, 7 }
 0x6c6   :  { %v8905_v0 = vld [vmem:[#allocation2 + $0x32] sm:$0x1] }
 0x6c8   :  { %v7141_v34 = vpop.f32.mrb[100].mxu1 }
 0x6c9   :  { %v7145_v43 = vadd.f32 %v7141_v34, %v15617_v47  ;;  %v13296_v15 = vpop.f32.mrb[101].mxu1  ;;  %v9064_v34 = vld [vmem:[#allocation2 + $0x78] sm:$0x1] }
 0x6ca   :  { %v9067_v15 = vrot.slane %v9064_v34, 7  ;;  %v16223_v34 = vld [vmem:[#allocation13_spill] sm:$0xff] }
 0x6cb   :  { %v7216_v25 = vadd.f32 %v15619_v48, %v7145_v43  ;;  %v15970_v43 = vsel %vm439_vm3, %v8909_v20, %v8905_v0 }
 0x6cc   :  { %v7283_v6 = vpop.f32.mrb[102].mxu1 }
 0x6cd   :  { %v7287_v51 = vadd.f32 %v7283_v6, %v7216_v25  ;;  %v13310_v11 = vpop.f32.mrb[103].mxu1  ;;  %v9063_v25 = vld [vmem:[#allocation2 + $0x38] sm:$0x1]  ;;  %v9222_v6 = vld [vmem:[#allocation2 + $0x7a] sm:$0x1] }
 0x6ce   :  { %v9225_v11 = vrot.slane %v9222_v6, 7 }
 0x6cf   :  { %v7358_v35 = vadd.f32 %v15621_v52, %v7287_v51  ;;  %v9068_v51 = vsel %vm439_vm3, %v9067_v15, %v9063_v25 }
 0x6d0   :  { %v7425_v31 = vpop.f32.mrb[104].mxu1 }
 0x6d1   :  { %v7429_v55 = vadd.f32 %v7425_v31, %v7358_v35  ;;  %v13324_v41 = vpop.f32.mrb[105].mxu1  ;;  %v9221_v35 = vld [vmem:[#allocation2 + $0x3a] sm:$0x1] }
 0x6d2   :  { %v15985_v31 = vsel %vm439_vm3, %v9225_v11, %v9221_v35  ;;  %v9382_v41 = vld [vmem:[%s16181_s6 + $0xc8] sm:$0xff]  ;;  %v16224_v11 = vld [vmem:[#allocation14_spill] sm:$0xff] }
 0x6d3   :  { %v7500_v5 = vadd.f32 %v15635_v33, %v7429_v55  ;;  %v9381_v55 = vld [vmem:[%s16181_s6 + $0xc0] sm:$0xff] }
 0x6d4   :  { %v7567_v46 = vpop.f32.mrb[106].mxu1 }
 0x6d5   :  { %v7571_v22 = vadd.f32 %v7567_v46, %v7500_v5  ;;  %v13338_v9 = vpop.f32.mrb[107].mxu1  ;;  %v9383_v5 = vld [vmem:[%s16181_s6 + $0xd0] sm:$0xff]  ;;  %v14213_v46 = vpack.c.bf16 %v9382_v41, %v9381_v55 }
 0x6d7   :  { %v7642_v57 = vadd.f32 %v16214_v12, %v7571_v22  ;;  %v9384_v22 = vld [vmem:[%s16181_s6 + $0xd8] sm:$0xff] }
 0x6d8   :  { %v7717_v1 = vpop.f32.mrb[108].mxu1  ;;  %v14216_v9 = vpack.c.bf16 %v9384_v22, %v9383_v5 }
 0x6d9   :  { %v7721_v47 = vadd.f32 %v7717_v1, %v7642_v57  ;;  %v13352_v37 = vpop.f32.mrb[109].mxu1 }
 0x6da   :  { %v16218_v37 = vld [vmem:[#allocation8_spill] sm:$0xff] }
 0x6db   :  { %v7800_v48 = vadd.f32 %v16215_v21, %v7721_v47 }
 0x6dc   :  { %v7867_v14 = vpop.f32.mrb[110].mxu1 }
 0x6dd   :  { %v7871_v42 = vadd.f32 %v7867_v14, %v7800_v48  ;;  %v13366_v7 = vpop.f32.mrb[111].mxu1  ;;  %v16219_v14 = vld [vmem:[#allocation9_spill] sm:$0xff] }
 0x6df   :  { %v7942_v52 = vadd.f32 %v16216_v18, %v7871_v42 }
 0x6e0   :  { %v8017_v44 = vpop.f32.mrb[112].mxu1 }
 0x6e1   :  { %v8021_v26 = vadd.f32 %v8017_v44, %v7942_v52  ;;  %v13380_v19 = vpop.f32.mrb[113].mxu1  ;;  %v16220_v44 = vld [vmem:[#allocation10_spill] sm:$0xff] }
 0x6e3   :  { %v8100_v33 = vadd.f32 %v16217_v38, %v8021_v26 }
 0x6e5   :  { %v8101_v16 = vadd.f32 %v15707_v50, %v8100_v33 }
 0x6e7   :  { %v8102_v3 = vmax.f32 %v8101_v16, 0.0  ;;  %v16221_v16 = vld [vmem:[#allocation11_spill] sm:$0xff] }
 0x6e9   :  { %13397 = vmatmul.mubr.msk.f32.vlgmr.msra.gmra.mrb[114].mxu1 %vm1707_vm5, %v8102_v3 }
 0x6ea   :  { %14172 = vmatpush3.bf16.msra.mxu1 %v14655_v49  ;;  %13417 = vmatprep.mubr.msk.f32.mxu1 %vm14331_vm1, %v16212_v61 }
 0x6eb   :  { %14176 = vmatprep.subr.bf16.mxu1 %v16213_v63 }
 0x6ed   :  { %13418 = vmatmul.mubr.msk.f32.vlgmr.msra.gmra.mrb[116].mxu1 %vm225_vm2, %v15403_v13  ;;  %v8747_v13 = vld [vmem:[#allocation2 + $0x30] sm:$0x1] }
 0x6ee   :  { %14178 = vmatpush3.bf16.msra.mxu1 %v14679_v8  ;;  %13431 = vmatprep.mubr.msk.f32.mxu1 %vm14331_vm1, %v16212_v61 }
 0x6ef   :  { %14182 = vmatprep.subr.bf16.mxu1 %v16213_v63 }
 0x6f1   :  { %13432 = vmatmul.mubr.msk.f32.vlgmr.msra.gmra.mrb[118].mxu1 %vm225_vm2, %v15748_v2  ;;  %v8752_v2 = vsel %vm439_vm3, %v8751_v39, %v8747_v13  ;;  %v16222_v13 = vld [vmem:[#allocation12_spill] sm:$0xff] }
 0x6f2   :  { %14184 = vmatpush3.bf16.msra.mxu1 %v14717_v30  ;;  %13445 = vmatprep.mubr.msk.f32.mxu1 %vm14331_vm1, %v16212_v61 }
 0x6f3   :  { %14188 = vmatprep.subr.bf16.mxu1 %v16213_v63 }
 0x6f5   :  { %13446 = vmatmul.mubr.msk.f32.vlgmr.msra.gmra.mrb[120].mxu1 %vm225_vm2, %v15757_v28 }
 0x6f6   :  { %14190 = vmatpush3.bf16.msra.mxu1 %v14746_v53  ;;  %13459 = vmatprep.mubr.msk.f32.mxu1 %vm14331_vm1, %v16212_v61 }
 0x6f7   :  { %14194 = vmatprep.subr.bf16.mxu1 %v16213_v63 }
 0x6f9   :  { %13460 = vmatmul.mubr.msk.f32.vlgmr.msra.gmra.mrb[122].mxu1 %vm225_vm2, %v8752_v2 }
 0x6fa   :  { %14196 = vmatpush3.bf16.msra.mxu1 %v14784_v4  ;;  %13473 = vmatprep.mubr.msk.f32.mxu1 %vm14331_vm1, %v16212_v61 }
 0x6fb   :  { %14200 = vmatprep.subr.bf16.mxu1 %v16213_v63 }
 0x6fd   :  { %13474 = vmatmul.mubr.msk.f32.vlgmr.msra.gmra.mrb[124].mxu1 %vm225_vm2, %v15970_v43 }
 0x6fe   :  { %14202 = vmatpush3.bf16.msra.mxu1 %v14815_v23  ;;  %13487 = vmatprep.mubr.msk.f32.mxu1 %vm14331_vm1, %v16212_v61 }
 0x6ff   :  { %14206 = vmatprep.subr.bf16.mxu1 %v16213_v63 }
 0x701   :  { %13488 = vmatmul.mubr.msk.f32.vlgmr.msra.gmra.mrb[126].mxu1 %vm225_vm2, %v9068_v51 }
 0x702   :  { %14208 = vmatpush3.bf16.msra.mxu1 %v14852_v40  ;;  %13501 = vmatprep.mubr.msk.f32.mxu1 %vm14331_vm1, %v16212_v61 }
 0x703   :  { %14212 = vmatprep.subr.bf16.mxu1 %v16213_v63 }
 0x705   :  { %13502 = vmatmul.mubr.msk.f32.vlgmr.msra.gmra.mrb[128].mxu1 %vm225_vm2, %v15985_v31 }
 0x706   :  { %13519 = vmatprep.mubr.msk.f32.mxu1 %vm14331_vm1, %v16212_v61  ;;  %14214 = vmatpush3.bf16.msra.mxu1 %v14213_v46  ;;  %v16225_v46 = vld [vmem:[#allocation15_spill] sm:$0xff] }
 0x707   :  { %14215 = vmatprep.subr.bf16.mxu1 %v16213_v63 }
 0x70a   :  { %14217 = vmatpush3.bf16.msra.mxu1 %v14216_v9 }
 0x70b   :  { %14224 = vmatprep.subr.bf16.mxu1 %v16213_v63 }
 0x7bc   :  { %v8176_v12 = vpop.f32.mrb[114].mxu1 }
 0x7bd   :  { %v16006_v57 = vadd.f32 %v8176_v12, %v15929_v54  ;;  %v13398_v1 = vpop.f32.mrb[115].mxu1 }
 0x7c0   :  { %v8387_v47 = vpop.f32.mrb[116].mxu1 }
 0x7c1   :  { %v8391_v21 = vadd.f32 %v8387_v47, %v16218_v37  ;;  %v13419_v48 = vpop.f32.mrb[117].mxu1  ;;  %v10468_v37 = vld [vmem:[#allocation2 + $0x7c] sm:$0x1] }
 0x7c3   :  { %v8462_v42 = vadd.f32 %v16219_v14, %v8391_v21  ;;  %v10467_v21 = vld [vmem:[#allocation2 + $0x3c] sm:$0x1]  ;;  %v10628_v14 = vld [vmem:[%s16181_s6 + $0xe8] sm:$0xff] }
 0x7c4   :  { %v8529_v7 = vpop.f32.mrb[118].mxu1 }
 0x7c5   :  { %v8533_v18 = vadd.f32 %v8529_v7, %v8462_v42  ;;  %v13433_v52 = vpop.f32.mrb[119].mxu1  ;;  %v10629_v42 = vld [vmem:[%s16181_s6 + $0xf0] sm:$0xff] }
 0x7c7   :  { %v8604_v26 = vadd.f32 %v16220_v44, %v8533_v18  ;;  %v10630_v18 = vld [vmem:[%s16181_s6 + $0xf8] sm:$0xff] }
 0x7c8   :  { %v8671_v19 = vpop.f32.mrb[120].mxu1  ;;  %v14270_v52 = vpack.c.bf16 %v10630_v18, %v10629_v42 }
 0x7c9   :  { %v8675_v38 = vadd.f32 %v8671_v19, %v8604_v26  ;;  %v13447_v33 = vpop.f32.mrb[121].mxu1 }
 0x7ca   :  { %v16226_v33 = vld [vmem:[#allocation16_spill] sm:$0xff] }
 0x7cb   :  { %v8746_v3 = vadd.f32 %v16221_v16, %v8675_v38 }
 0x7cc   :  { %v8821_v32 = vpop.f32.mrb[122].mxu1 }
 0x7cd   :  { %v8825_v54 = vadd.f32 %v8821_v32, %v8746_v3  ;;  %v13461_v39 = vpop.f32.mrb[123].mxu1  ;;  %v16227_v32 = vld [vmem:[#allocation17_spill] sm:$0xff] }
 0x7cf   :  { %v8904_v56 = vadd.f32 %v16222_v13, %v8825_v54 }
 0x7d0   :  { %v8979_v2 = vpop.f32.mrb[124].mxu1 }
 0x7d1   :  { %v8983_v20 = vadd.f32 %v8979_v2, %v8904_v56  ;;  %v13475_v0 = vpop.f32.mrb[125].mxu1  ;;  %v16228_v2 = vld [vmem:[#allocation18_spill] sm:$0xff] }
 0x7d3   :  { %v9062_v15 = vadd.f32 %v16223_v34, %v8983_v20 }
 0x7d4   :  { %v9137_v25 = vpop.f32.mrb[126].mxu1 }
 0x7d5   :  { %v9141_v6 = vadd.f32 %v9137_v25, %v9062_v15  ;;  %v13489_v51 = vpop.f32.mrb[127].mxu1  ;;  %v16229_v25 = vld [vmem:[#allocation19_spill] sm:$0xff] }
 0x7d7   :  { %v9220_v35 = vadd.f32 %v16224_v11, %v9141_v6 }
 0x7d8   :  { %v9295_v55 = vpop.f32.mrb[128].mxu1 }
 0x7d9   :  { %v9299_v41 = vadd.f32 %v9295_v55, %v9220_v35  ;;  %v13503_v5 = vpop.f32.mrb[129].mxu1  ;;  %v16230_v35 = vld [vmem:[#allocation20_spill] sm:$0xff] }
 0x7db   :  { %v9378_v22 = vadd.f32 %v16225_v46, %v9299_v41 }
 0x7dd   :  { %v9379_v9 = vadd.f32 %v15707_v50, %v9378_v22  ;;  %v16231_v22 = vld [vmem:[#allocation21_spill] sm:$0xff] }
 0x7df   :  { %v9380_v12 = vmax.f32 %v9379_v9, 0.0 }
 0x7e1   :  { %13520 = vmatmul.mubr.msk.f32.vlgmr.msra.gmra.mrb[130].mxu1 %vm1707_vm5, %v9380_v12 }
 0x7e2   :  { %14226 = vmatpush3.bf16.msra.mxu1 %v14655_v49  ;;  %13540 = vmatprep.mubr.msk.f32.mxu1 %vm14331_vm1, %v16212_v61 }
 0x7e3   :  { %14230 = vmatprep.subr.bf16.mxu1 %v16213_v63 }
 0x7e5   :  { %13541 = vmatmul.mubr.msk.f32.vlgmr.msra.gmra.mrb[132].mxu1 %vm225_vm2, %v15485_v24  ;;  %v10168_v24 = vld [vmem:[#allocation2 + $0x74] sm:$0x1] }
 0x7e6   :  { %14232 = vmatpush3.bf16.msra.mxu1 %v14679_v8  ;;  %13554 = vmatprep.mubr.msk.f32.mxu1 %vm14331_vm1, %v16212_v61  ;;  %v10171_v1 = vrot.slane %v10168_v24, 7 }
 0x7e7   :  { %14236 = vmatprep.subr.bf16.mxu1 %v16213_v63 }
 0x7e9   :  { %13555 = vmatmul.mubr.msk.f32.vlgmr.msra.gmra.mrb[134].mxu1 %vm225_vm2, %v15757_v28  ;;  %v10167_v28 = vld [vmem:[#allocation2 + $0x34] sm:$0x1] }
 0x7ea   :  { %14238 = vmatpush3.bf16.msra.mxu1 %v14717_v30  ;;  %13568 = vmatprep.mubr.msk.f32.mxu1 %vm14331_vm1, %v16212_v61  ;;  %v16047_v47 = vsel %vm439_vm3, %v10171_v1, %v10167_v28  ;;  %v16232_v28 = vld [vmem:[#allocation22_spill] sm:$0xff] }
 0x7eb   :  { %14242 = vmatprep.subr.bf16.mxu1 %v16213_v63 }
 0x7ed   :  { %13569 = vmatmul.mubr.msk.f32.vlgmr.msra.gmra.mrb[136].mxu1 %vm225_vm2, %v15831_v17 }
 0x7ee   :  { %14244 = vmatpush3.bf16.msra.mxu1 %v14746_v53  ;;  %13582 = vmatprep.mubr.msk.f32.mxu1 %vm14331_vm1, %v16212_v61 }
 0x7ef   :  { %14248 = vmatprep.subr.bf16.mxu1 %v16213_v63 }
 0x7f1   :  { %13583 = vmatmul.mubr.msk.f32.vlgmr.msra.gmra.mrb[138].mxu1 %vm225_vm2, %v15970_v43  ;;  %v10471_v43 = vrot.slane %v10468_v37, 7 }
 0x7f2   :  { %14250 = vmatpush3.bf16.msra.mxu1 %v14784_v4  ;;  %13596 = vmatprep.mubr.msk.f32.mxu1 %vm14331_vm1, %v16212_v61 }
 0x7f3   :  { %14254 = vmatprep.subr.bf16.mxu1 %v16213_v63  ;;  %v16062_v48 = vsel %vm439_vm3, %v10471_v43, %v10467_v21 }
 0x7f5   :  { %13597 = vmatmul.mubr.msk.f32.vlgmr.msra.gmra.mrb[140].mxu1 %vm225_vm2, %v16047_v47 }
 0x7f6   :  { %14256 = vmatpush3.bf16.msra.mxu1 %v14815_v23  ;;  %13610 = vmatprep.mubr.msk.f32.mxu1 %vm14331_vm1, %v16212_v61 }
 0x7f7   :  { %14260 = vmatprep.subr.bf16.mxu1 %v16213_v63 }
 0x7f9   :  { %13611 = vmatmul.mubr.msk.f32.vlgmr.msra.gmra.mrb[142].mxu1 %vm225_vm2, %v15985_v31  ;;  %v10627_v31 = vld [vmem:[%s16181_s6 + $0xe0] sm:$0xff] }
 0x7fa   :  { %14262 = vmatpush3.bf16.msra.mxu1 %v14852_v40  ;;  %13624 = vmatprep.mubr.msk.f32.mxu1 %vm14331_vm1, %v16212_v61  ;;  %v14267_v7 = vpack.c.bf16 %v10628_v14, %v10627_v31  ;;  %v16233_v14 = vld [vmem:[#allocation23_spill] sm:$0xff] }
 0x7fb   :  { %14266 = vmatprep.subr.bf16.mxu1 %v16213_v63 }
 0x7fd   :  { %13625 = vmatmul.mubr.msk.f32.vlgmr.msra.gmra.mrb[144].mxu1 %vm225_vm2, %v16062_v48 }
 0x7fe   :  { %13642 = vmatprep.mubr.msk.f32.mxu1 %vm14331_vm1, %v16212_v61  ;;  %14268 = vmatpush3.bf16.msra.mxu1 %v14267_v7 }
 0x7ff   :  { %14269 = vmatprep.subr.bf16.mxu1 %v16213_v63 }
 0x802   :  { %14271 = vmatpush3.bf16.msra.mxu1 %v14270_v52  ;;  %v11876_v52 = vld [vmem:[%s16181_s6 + $0x118] sm:$0xff] }
 0x803   :  { %14278 = vmatprep.subr.bf16.mxu1 %v16213_v63 }
 0x8b4   :  { %v9454_v44 = vpop.f32.mrb[130].mxu1 }
 0x8b5   :  { %v16083_v26 = vadd.f32 %v9454_v44, %v16006_v57  ;;  %v13521_v19 = vpop.f32.mrb[131].mxu1 }
 0x8b8   :  { %v9665_v38 = vpop.f32.mrb[132].mxu1 }
 0x8b9   :  { %v9669_v16 = vadd.f32 %v9665_v38, %v16226_v33  ;;  %v13542_v3 = vpop.f32.mrb[133].mxu1 }
 0x8bb   :  { %v9740_v54 = vadd.f32 %v16227_v32, %v9669_v16 }
 0x8bc   :  { %v9807_v39 = vpop.f32.mrb[134].mxu1 }
 0x8bd   :  { %v9811_v13 = vadd.f32 %v9807_v39, %v9740_v54  ;;  %v13556_v56 = vpop.f32.mrb[135].mxu1 }
 0x8bf   :  { %v9882_v20 = vadd.f32 %v16228_v2, %v9811_v13 }
 0x8c0   :  { %v9949_v0 = vpop.f32.mrb[136].mxu1 }
 0x8c1   :  { %v9953_v34 = vadd.f32 %v9949_v0, %v9882_v20  ;;  %v13570_v15 = vpop.f32.mrb[137].mxu1 }
 0x8c3   :  { %v10024_v6 = vadd.f32 %v16229_v25, %v9953_v34 }
 0x8c4   :  { %v10091_v51 = vpop.f32.mrb[138].mxu1 }
 0x8c5   :  { %v10095_v57 = vadd.f32 %v10091_v51, %v10024_v6  ;;  %v13584_v11 = vpop.f32.mrb[139].mxu1 }
 0x8c7   :  { %v10166_v55 = vadd.f32 %v16230_v35, %v10095_v57 }
 0x8c8   :  { %v10241_v41 = vpop.f32.mrb[140].mxu1 }
 0x8c9   :  { %v10245_v5 = vadd.f32 %v10241_v41, %v10166_v55  ;;  %v13598_v46 = vpop.f32.mrb[141].mxu1 }
 0x8ca   :  { %v16234_v46 = vld [vmem:[#allocation24_spill] sm:$0xff] }
 0x8cb   :  { %v10324_v9 = vadd.f32 %v16231_v22, %v10245_v5 }
 0x8cc   :  { %v10391_v12 = vpop.f32.mrb[142].mxu1 }
 0x8cd   :  { %v10395_v24 = vadd.f32 %v10391_v12, %v10324_v9  ;;  %v13612_v1 = vpop.f32.mrb[143].mxu1 }
 0x8cf   :  { %v10466_v37 = vadd.f32 %v16232_v28, %v10395_v24 }
 0x8d0   :  { %v10541_v43 = vpop.f32.mrb[144].mxu1 }
 0x8d1   :  { %v10545_v21 = vadd.f32 %v10541_v43, %v10466_v37  ;;  %v13626_v31 = vpop.f32.mrb[145].mxu1 }
 0x8d3   :  { %v10624_v42 = vadd.f32 %v16233_v14, %v10545_v21 }
 0x8d5   :  { %v10625_v7 = vadd.f32 %v15707_v50, %v10624_v42 }
 0x8d7   :  { %v10626_v18 = vmax.f32 %v10625_v7, 0.0 }
 0x8d9   :  { %13643 = vmatmul.mubr.msk.f32.vlgmr.msra.gmra.mrb[146].mxu1 %vm1707_vm5, %v10626_v18 }
 0x8da   :  { %14280 = vmatpush3.bf16.msra.mxu1 %v14655_v49  ;;  %13663 = vmatprep.mubr.msk.f32.mxu1 %vm14331_vm1, %v16212_v61  ;;  %v11414_v49 = vld [vmem:[#allocation2 + $0x76] sm:$0x1] }
 0x8db   :  { %14284 = vmatprep.subr.bf16.mxu1 %v16213_v63 }
 0x8dd   :  { %13664 = vmatmul.mubr.msk.f32.vlgmr.msra.gmra.mrb[148].mxu1 %vm225_vm2, %v15893_v45 }
 0x8de   :  { %14286 = vmatpush3.bf16.msra.mxu1 %v14679_v8  ;;  %13677 = vmatprep.mubr.msk.f32.mxu1 %vm14331_vm1, %v16212_v61  ;;  %v11417_v8 = vrot.slane %v11414_v49, 7 }
 0x8df   :  { %14290 = vmatprep.subr.bf16.mxu1 %v16213_v63 }
 0x8e1   :  { %13678 = vmatmul.mubr.msk.f32.vlgmr.msra.gmra.mrb[150].mxu1 %vm225_vm2, %v15831_v17 }
 0x8e2   :  { %14292 = vmatpush3.bf16.msra.mxu1 %v14717_v30  ;;  %13691 = vmatprep.mubr.msk.f32.mxu1 %vm14331_vm1, %v16212_v61  ;;  %v11413_v30 = vld [vmem:[#allocation2 + $0x36] sm:$0x1] }
 0x8e3   :  { %14296 = vmatprep.subr.bf16.mxu1 %v16213_v63  ;;  %v11418_v17 = vsel %vm439_vm3, %v11417_v8, %v11413_v30 }
 0x8e5   :  { %13692 = vmatmul.mubr.msk.f32.vlgmr.msra.gmra.mrb[152].mxu1 %vm225_vm2, %v15908_v29 }
 0x8e6   :  { %14298 = vmatpush3.bf16.msra.mxu1 %v14746_v53  ;;  %13705 = vmatprep.mubr.msk.f32.mxu1 %vm14331_vm1, %v16212_v61  ;;  %v11714_v53 = vld [vmem:[#allocation2 + $0x7e] sm:$0x1] }
 0x8e7   :  { %14302 = vmatprep.subr.bf16.mxu1 %v16213_v63  ;;  %v11717_v45 = vrot.slane %v11714_v53, 7 }
 0x8e9   :  { %13706 = vmatmul.mubr.msk.f32.vlgmr.msra.gmra.mrb[154].mxu1 %vm225_vm2, %v16047_v47  ;;  %v11875_v47 = vld [vmem:[%s16181_s6 + $0x110] sm:$0xff] }
 0x8ea   :  { %14304 = vmatpush3.bf16.msra.mxu1 %v14784_v4  ;;  %13719 = vmatprep.mubr.msk.f32.mxu1 %vm14331_vm1, %v16212_v61  ;;  %v11713_v4 = vld [vmem:[#allocation2 + $0x3e] sm:$0x1]  ;;  %v14324_v44 = vpack.c.bf16 %v11876_v52, %v11875_v47 }
 0x8eb   :  { %14308 = vmatprep.subr.bf16.mxu1 %v16213_v63  ;;  %v11718_v29 = vsel %vm439_vm3, %v11717_v45, %v11713_v4 }
 0x8ed   :  { %13720 = vmatmul.mubr.msk.f32.vlgmr.msra.gmra.mrb[156].mxu1 %vm225_vm2, %v11418_v17 }
 0x8ee   :  { %14310 = vmatpush3.bf16.msra.mxu1 %v14815_v23  ;;  %13733 = vmatprep.mubr.msk.f32.mxu1 %vm14331_vm1, %v16212_v61  ;;  %v11873_v23 = vld [vmem:[%s16181_s6 + $0x100] sm:$0xff] }
 0x8ef   :  { %14314 = vmatprep.subr.bf16.mxu1 %v16213_v63 }
 0x8f1   :  { %13734 = vmatmul.mubr.msk.f32.vlgmr.msra.gmra.mrb[158].mxu1 %vm225_vm2, %v16062_v48 }
 0x8f2   :  { %14316 = vmatpush3.bf16.msra.mxu1 %v14852_v40  ;;  %13747 = vmatprep.mubr.msk.f32.mxu1 %vm14331_vm1, %v16212_v61  ;;  %v11874_v40 = vld [vmem:[%s16181_s6 + $0x108] sm:$0xff] }
 0x8f3   :  { %14320 = vmatprep.subr.bf16.mxu1 %v16213_v63  ;;  %v14321_v48 = vpack.c.bf16 %v11874_v40, %v11873_v23 }
 0x8f5   :  { %13748 = vmatmul.mubr.msk.f32.vlgmr.msra.gmra.mrb[160].mxu1 %vm225_vm2, %v11718_v29 }
 0x8f6   :  { %13765 = vmatprep.mubr.msk.f32.mxu1 %vm14331_vm1, %v16212_v61  ;;  %14322 = vmatpush3.bf16.msra.mxu1 %v14321_v48 }
 0x8f7   :  { %14323 = vmatprep.subr.bf16.mxu1 %v16213_v63 }
 0x8fa   :  { %14325 = vmatpush3.bf16.msra.mxu1 %v14324_v44 }
 0x9ac   :  { %v10700_v61 = vpop.f32.mrb[146].mxu1 }
 0x9ad   :  { %v10704_v19 = vadd.f32 %v10700_v61, %v16083_v26  ;;  %v13644_v38 = vpop.f32.mrb[147].mxu1 }
 0x9b0   :  { %v10911_v33 = vpop.f32.mrb[148].mxu1 }
 0x9b1   :  { %v10915_v16 = vadd.f32 %v10911_v33, %v15683_v59  ;;  %v13665_v3 = vpop.f32.mrb[149].mxu1 }
 0x9b3   :  { %v10986_v32 = vadd.f32 %v15686_v60, %v10915_v16 }
 0x9b4   :  { %v11053_v54 = vpop.f32.mrb[150].mxu1 }
 0x9b5   :  { %v11057_v39 = vadd.f32 %v11053_v54, %v10986_v32  ;;  %v13679_v13 = vpop.f32.mrb[151].mxu1 }
 0x9b7   :  { %v11128_v56 = vadd.f32 %v15689_v10, %v11057_v39 }
 0x9b8   :  { %v11195_v2 = vpop.f32.mrb[152].mxu1 }
 0x9b9   :  { %v11199_v20 = vadd.f32 %v11195_v2, %v11128_v56  ;;  %v13693_v0 = vpop.f32.mrb[153].mxu1 }
 0x9bb   :  { %v11270_v63 = vadd.f32 %v15692_v62, %v11199_v20 }
 0x9bc   :  { %v11337_v34 = vpop.f32.mrb[154].mxu1 }
 0x9bd   :  { %v11341_v15 = vadd.f32 %v11337_v34, %v11270_v63  ;;  %v13707_v26 = vpop.f32.mrb[155].mxu1 }
 0x9bf   :  { %v11412_v25 = vadd.f32 %v15695_v36, %v11341_v15  ;;  %v16_v36 = vstv %s16183_s10 }
 0x9c0   :  { %v11487_v6 = vpop.f32.mrb[156].mxu1  ;;  %17 = vst [vmem:[#allocation3] sm:$0x1] %v16_v36 }
 0x9c1   :  { %v11491_v59 = vadd.f32 %v11487_v6, %v11412_v25  ;;  %v13721_v51 = vpop.f32.mrb[157].mxu1 }
 0x9c3   :  { %v11570_v60 = vadd.f32 %v15698_v58, %v11491_v59 }
 0x9c4   :  { %v11637_v57 = vpop.f32.mrb[158].mxu1 }
 0x9c5   :  { %v11641_v11 = vadd.f32 %v11637_v57, %v11570_v60  ;;  %v13735_v35 = vpop.f32.mrb[159].mxu1 }
 0x9c7   :  { %v11712_v10 = vadd.f32 %v15701_v27, %v11641_v11  ;;  %v12174_v27 = vld [vmem:[%s16184_s8] ss:$0 sm:$0xff] }
 0x9c8   :  { %v11787_v55 = vpop.f32.mrb[160].mxu1  ;;  %v12176_v21 = vld [vmem:[#allocation3] ss:$0 sm:$0xff] }
 0x9c9   :  { %v11791_v41 = vadd.f32 %v11787_v55, %v11712_v10  ;;  %v13749_v5 = vpop.f32.mrb[161].mxu1 }
 0x9cb   :  { %v11870_v62 = vadd.f32 %v16234_v46, %v11791_v41 }
 0x9cd   :  { %v11871_v22 = vadd.f32 %v15707_v50, %v11870_v62  ;;  %v12175_v50 = vld [vmem:[%s16185_s9] ss:$0 sm:$0xff] }
 0x9cf   :  { %v11872_v9 = vmax.f32 %v11871_v22, 0.0 }
 0x9d1   :  { %13766 = vmatmul.mubr.msk.f32.vlgmr.msra.gmra.mrb[162].mxu1 %vm1707_vm5, %v11872_v9 }
 0xaa4   :  { %v11946_v58 = vpop.f32.mrb[162].mxu1 }
 0xaa5   :  { %v11950_v12 = vadd.f32 %v11946_v58, %v10704_v19  ;;  %v13767_v24 = vpop.f32.mrb[163].mxu1 }
 0xaa7   :  { %v11958_v1 = vadd.f32 %v12174_v27, %v11950_v12 }
 0xaa9   :  { %v11959_v28 = vmax.f32 %v11958_v1, 0.0 }
 0xaab   :  { %v11967_v37 = vmul.f32 %v12175_v50, %v11959_v28 }
 0xaad   :  { %v11969_v43 = vsel %vm11968_vm6, %v11967_v37, 0.0 }
 0xaae   :  { %11970 = vadd.xlane.f32.xlu0 %v11969_v43 }
 0xb3b   :  { %v11971_v31 = vpop.xlane.xlu0 %11970 }
 0xb3c   :  { %v11979_v14 = vadd.f32 %v12176_v21, %v11971_v31 }
 0xb3e   :  { %11981 = vst.msk [vmem:[%s16186_s11] sm:$0x3] %vm11980_vm7, %v11979_v14 }

</bundles_post_ra>
